<compile_context>
chip_gen: v7x
topology: tpu7x:2x2x1
jax: 0.10.0
libtpu: 0.0.40
codegen_flags: <defaults>
</compile_context>

<pallas_src>
import functools

import jax
import jax.numpy as jnp
from jax import lax
from jax.experimental import pallas as pl
from jax.experimental.pallas import tpu as pltpu

DIM = 64                 # model width
D_STATE = 64             # Mamba d_state
D_CONV = 4               # Mamba d_conv
EXPAND = 2
D_INNER = EXPAND * DIM   # 128
C_IN = 10                # stem input channels
OUT_CH = 3               # Net_Mamba out_channels
N_BLOCKS = 12
HEAD_W = 8               # merged head width: [spot, recog0..2, zero pad]
CHUNK = 8                # scan time-chunk (one sublane group)
LN_EPS = 1e-5
BN_EPS = 1e-5


# ----------------------------- in-kernel math helpers -------------------------

def _sigmoid(x):
    return 1.0 / (1.0 + jnp.exp(-x))


def _silu(x):
    return x * _sigmoid(x)


def _softplus(x):
    return jnp.maximum(x, 0.0) + jnp.log(1.0 + jnp.exp(-jnp.abs(x)))


def _ln_lanes(x, w, b):
    # x: (T, C) time-major; LayerNorm over the channel (lane) axis.
    mu = jnp.mean(x, axis=1, keepdims=True)
    var = jnp.mean((x - mu) ** 2, axis=1, keepdims=True)
    return (x - mu) * lax.rsqrt(var + LN_EPS) * w + b


def _mm(a, w_bf16):
    # bf16 MXU matmul with f32 accumulation.
    return jnp.dot(a.astype(jnp.bfloat16), w_bf16,
                   preferred_element_type=jnp.float32)


def _tshift(v, s, seq_len):
    # Row t of the result holds v[t - s]; zero outside [0, seq_len).
    # Implemented as a sublane roll (XLU) + boundary mask (no (T,T) matmuls).
    if s == 0:
        return v
    r = pltpu.roll(v, shift=s % seq_len, axis=0)
    idx = lax.broadcasted_iota(jnp.int32, v.shape, 0)
    if s > 0:
        return jnp.where(idx >= s, r, 0.0)
    return jnp.where(idx < seq_len + s, r, 0.0)


# ----------------------------- fused kernel -----------------------------------

def net_mamba_kernel(
    # inputs
    x_ref,
    w1_ref, b1_ref, s1_ref, t1_ref, w2_ref, b2_ref, s2_ref, t2_ref,      # stem
    lnw_ref, lnb_ref, win_ref, cw_ref, cb_ref, wxp_ref, dtb_ref,         # block
    alog_ref, d_ref, wout_ref, ln1w_ref, ln1b_ref,                       # block
    wh_ref, bh_ref,                                                      # head
    # output
    out_ref,
    # scratch
    act_ref, dt_sc, u_sc, bc_sc, y_sc,
    *, seq_len, valid_len):
    Tp = seq_len
    l = pl.program_id(1)

    # ---------------- stem (only at block 0): Conv1d+BN+ReLU twice ------------
    @pl.when(l == 0)
    def _stem():
        x = x_ref[0]                                           # (Tp, C_IN) f32
        h = jnp.zeros((Tp, DIM), jnp.float32)
        for k in range(3):                                     # k=3, pad=1
            h = h + _mm(_tshift(x, 1 - k, Tp), w1_ref[k])
        h = h + b1_ref[...]
        h = jnp.maximum(h * s1_ref[...] + t1_ref[...], 0.0)    # folded BN + ReLU
        if Tp != valid_len:
            # keep PyTorch zero-padding semantics for the 2nd conv's right tap
            ridx = lax.broadcasted_iota(jnp.int32, (Tp, DIM), 0)
            h = jnp.where(ridx < valid_len, h, 0.0)
        h2 = jnp.zeros((Tp, DIM), jnp.float32)
        for k in range(3):
            h2 = h2 + _mm(_tshift(h, 1 - k, Tp), w2_ref[k])
        h2 = h2 + b2_ref[...]
        h2 = jnp.maximum(h2 * s2_ref[...] + t2_ref[...], 0.0)
        act_ref[...] = h2

    # ---------------- one Block_mamba:  x + LN1( Mamba( LN(x) ) ) -------------
    a = act_ref[...]                                           # (Tp, DIM)
    xn = _ln_lanes(a, lnw_ref[0], lnb_ref[0])

    # in_proj (no bias): (Tp,64) @ (64,256)
    xz = _mm(xn, win_ref[0])                                   # (Tp, 2*D_INNER)
    xm = xz[:, :D_INNER]
    z = xz[:, D_INNER:]

    # depthwise causal conv (k=4, left pad 3) via rolls, then SiLU
    conv = jnp.zeros((Tp, D_INNER), jnp.float32) + cb_ref[0]
    cw = cw_ref[0]                                             # (D_CONV, D_INNER)
    for k in range(D_CONV):
        conv = conv + cw[k:k + 1, :] * _tshift(xm, D_CONV - 1 - k, Tp)
    xc = _silu(conv)                                           # (Tp, D_INNER)

    # fused x_proj: [folded dt | B | C]  -> one (Tp,128)@(128,256) matmul
    proj = _mm(xc, wxp_ref[0])
    dt = _softplus(proj[:, :D_INNER] + dtb_ref[0])             # (Tp, D_INNER)
    bc = proj[:, D_INNER:]                                     # (Tp, 2*D_STATE)

    At = -jnp.exp(alog_ref[0])                                 # (D_STATE, D_INNER)

    dt_sc[...] = dt
    u_sc[...] = dt * xc                                        # dt * x
    bc_sc[...] = bc

    # ---- selective scan: chunked sequential recurrence (VPU/XLU/EUP only) ----
    nchunks = Tp // CHUNK

    def chunk_body(c, h):
        base = pl.multiple_of(c * CHUNK, CHUNK)
        dt_c = dt_sc[pl.ds(base, CHUNK), :]                    # (8, D_INNER)
        u_c = u_sc[pl.ds(base, CHUNK), :]                      # (8, D_INNER)
        bcT = jnp.transpose(bc_sc[pl.ds(base, CHUNK), :])      # (2*D_STATE, 8)
        rows = []
        for j in range(CHUNK):                                 # unrolled
            dA = jnp.exp(At * dt_c[j:j + 1, :])                # (D_STATE, D_INNER)
            b_j = bcT[:D_STATE, j:j + 1]                       # (D_STATE, 1)
            c_j = bcT[D_STATE:, j:j + 1]                       # (D_STATE, 1)
            h = dA * h + b_j * u_c[j:j + 1, :]                 # rank-1 update, VPU
            rows.append(jnp.sum(h * c_j, axis=0, keepdims=True))   # readout, XLU
        y_sc[pl.ds(base, CHUNK), :] = jnp.concatenate(rows, axis=0)
        return h

    _ = lax.fori_loop(0, nchunks, chunk_body,
                      jnp.zeros((D_STATE, D_INNER), jnp.float32))

    y = y_sc[...] + d_ref[0] * xc                              # + D * x (vectorized)
    y = y * _silu(z)                                           # gate
    om = _mm(y, wout_ref[0])                                   # out_proj (Tp, DIM)
    a_new = a + _ln_lanes(om, ln1w_ref[0], ln1b_ref[0])        # residual
    act_ref[...] = a_new

    # ---------------- merged heads (only at last block) -----------------------
    @pl.when(l == N_BLOCKS - 1)
    def _head():
        r = _mm(a_new, wh_ref[...]) + bh_ref[...]              # (Tp, HEAD_W)
        col = lax.broadcasted_iota(jnp.int32, (Tp, HEAD_W), 1)
        out_ref[0] = jnp.where(col == 0, _sigmoid(r), r)       # sigmoid only on spot


# ----------------------------- pallas_call wrapper ----------------------------

def _const_spec(shape):
    zeros = (0,) * len(shape)
    return pl.BlockSpec(shape, lambda b, l, _z=zeros: _z)


def _block_spec(stacked_shape):
    tail = stacked_shape[1:]
    nz = (0,) * len(tail)
    return pl.BlockSpec((1,) + tail, lambda b, l, _nz=nz: (l,) + _nz)


def net_mamba_pallas(x_tm, params, valid_len):
    B, Tp, _ = x_tm.shape
    stem, blocks, head = params["stem"], params["blocks"], params["head"]
    kern = functools.partial(net_mamba_kernel, seq_len=Tp, valid_len=valid_len)

    args = (x_tm,
            stem["w1_t"], stem["b1"], stem["s1"], stem["t1"],
            stem["w2_t"], stem["b2"], stem["s2"], stem["t2"],
            blocks["ln_w"], blocks["ln_b"], blocks["w_in_t"], blocks["conv_w"],
            blocks["conv_b"], blocks["w_xproj_t"], blocks["dt_b"],
            blocks["A_log_t"], blocks["D"], blocks["w_out_t"],
            blocks["ln1_w"], blocks["ln1_b"],
            head["w_head_t"], head["b_head"])

    in_specs = [pl.BlockSpec((1, Tp, C_IN), lambda b, l: (b, 0, 0))]
    in_specs += [_const_spec(a.shape) for a in args[1:9]]      # stem params
    in_specs += [_block_spec(a.shape) for a in args[9:21]]     # stacked block params
    in_specs += [_const_spec(a.shape) for a in args[21:]]      # head params

    return pl.pallas_call(
        kern,
        out_shape=jax.ShapeDtypeStruct((B, Tp, HEAD_W), jnp.float32),
        grid=(B, N_BLOCKS),
        in_specs=in_specs,
        out_specs=pl.BlockSpec((1, Tp, HEAD_W), lambda b, l: (b, 0, 0)),
        scratch_shapes=[
            pltpu.VMEM((Tp, DIM), jnp.float32),          # resident activation
            pltpu.VMEM((Tp, D_INNER), jnp.float32),      # dt
            pltpu.VMEM((Tp, D_INNER), jnp.float32),      # u = dt * x
            pltpu.VMEM((Tp, 2 * D_STATE), jnp.float32),  # [B | C]
            pltpu.VMEM((Tp, D_INNER), jnp.float32),      # scan output y
        ],
        compiler_params=pltpu.CompilerParams(
            dimension_semantics=("parallel", "arbitrary")),
    )(*args)


def net_mamba_forward(x, params):
    # x: (B, 1, C_IN, T) float32, matching the PyTorch module's input.
    x = jnp.squeeze(x, 1)                                 # (B, C_IN, T)
    B, _, T = x.shape
    Tp = ((T + CHUNK - 1) // CHUNK) * CHUNK
    x_tm = jnp.transpose(x, (0, 2, 1)).astype(jnp.float32)   # time-major (B, T, C_IN)
    if Tp != T:
        x_tm = jnp.pad(x_tm, ((0, 0), (0, Tp - T), (0, 0)))
    out = net_mamba_pallas(x_tm, params, valid_len=T)     # (B, Tp, HEAD_W)
    x_spot = out[:, :T, 0]                                # (B, T)
    x_recog = out[:, :T, 1:1 + OUT_CH]                    # (B, T, OUT_CH)
    return x_spot, x_recog


# ----------------------------- parameter setup (deterministic) ----------------

class _KeyGen:
    def __init__(self, key):
        self.key = key

    def __call__(self):
        self.key, sub = jax.random.split(self.key)
        return sub


def _fold_bn(gamma, beta, mean, var, eps=BN_EPS):
    s = gamma * lax.rsqrt(var + eps)
    return s, beta - mean * s


def init_params(key):
    kg = _KeyGen(key)

    def nrm(shape, scale=0.02, dtype=jnp.float32):
        return (scale * jax.random.normal(kg(), shape, dtype=jnp.float32)).astype(dtype)

    ones = jnp.ones((1, DIM), jnp.float32)
    zeros = jnp.zeros((1, DIM), jnp.float32)
    s1, t1 = _fold_bn(ones, zeros, zeros, ones)            # fresh BN stats (eval)
    s2, t2 = _fold_bn(ones, zeros, zeros, ones)
    stem = dict(
        w1_t=nrm((3, C_IN, DIM), 0.1, jnp.bfloat16), b1=zeros, s1=s1, t1=t1,
        w2_t=nrm((3, DIM, DIM), 0.1, jnp.bfloat16), b2=zeros, s2=s2, t2=t2,
    )

    # A_log stored pre-transposed: (d_state, d_inner), A_log_t[n, d] = log(n+1)
    a_log_t = (jnp.zeros((N_BLOCKS, D_STATE, D_INNER), jnp.float32)
               + jnp.log(jnp.arange(1, D_STATE + 1, dtype=jnp.float32))[None, :, None])

    blocks = dict(
        ln_w=jnp.ones((N_BLOCKS, 1, DIM), jnp.float32),
        ln_b=jnp.zeros((N_BLOCKS, 1, DIM), jnp.float32),
        w_in_t=nrm((N_BLOCKS, DIM, 2 * D_INNER), 0.02, jnp.bfloat16),
        conv_w=nrm((N_BLOCKS, D_CONV, D_INNER), 0.1),
        conv_b=jnp.zeros((N_BLOCKS, 1, D_INNER), jnp.float32),
        # [folded dt_rank path | B proj | C proj], all transposed for time-major
        w_xproj_t=nrm((N_BLOCKS, D_INNER, D_INNER + 2 * D_STATE), 0.02, jnp.bfloat16),
        dt_b=nrm((N_BLOCKS, 1, D_INNER), 0.1),
        A_log_t=a_log_t,
        D=jnp.ones((N_BLOCKS, 1, D_INNER), jnp.float32),
        w_out_t=nrm((N_BLOCKS, D_INNER, DIM), 0.02, jnp.bfloat16),
        ln1_w=jnp.ones((N_BLOCKS, 1, DIM), jnp.float32),
        ln1_b=jnp.zeros((N_BLOCKS, 1, DIM), jnp.float32),
    )

    # merged heads: col 0 = fc_spot, cols 1..3 = fc_recog, cols 4..7 zero pad
    w_spot = nrm((DIM, 1), 0.02)
    w_recog = nrm((DIM, OUT_CH), 0.02)
    w_head = jnp.concatenate(
        [w_spot, w_recog, jnp.zeros((DIM, HEAD_W - 1 - OUT_CH), jnp.float32)], axis=1)
    head = dict(w_head_t=w_head.astype(jnp.bfloat16),
                b_head=jnp.zeros((1, HEAD_W), jnp.float32))

    return dict(stem=stem, blocks=blocks, head=head)


# ----------------------------- main --------------------------------------------

if __name__ == "__main__":
    B, T = 2, 16
    key = jax.random.PRNGKey(0)
    pkey, xkey = jax.random.split(key)
    params = init_params(pkey)
    x = jax.random.normal(xkey, (B, 1, C_IN, T), dtype=jnp.float32)

    fwd = jax.jit(net_mamba_forward)
    x_spot, x_recog = fwd(x, params)
    jax.block_until_ready((x_spot, x_recog))

    assert x_spot.shape == (B, T), x_spot.shape
    assert x_recog.shape == (B, T, OUT_CH), x_recog.shape
    assert bool(jnp.all(jnp.isfinite(x_spot))) and bool(jnp.all(jnp.isfinite(x_recog)))
    print("KERNEL_OK")
</pallas_src>

<mosaic_0001>
module attributes {stable_mosaic.version = 11 : i64} {
  func.func @net_mamba_kernel(%arg0: i32, %arg1: i32, %arg2: memref<1x16x10xf32, #tpu.memory_space<vmem>>, %arg3: memref<3x10x64xbf16, #tpu.memory_space<vmem>>, %arg4: memref<1x64xf32, #tpu.memory_space<vmem>>, %arg5: memref<1x64xf32, #tpu.memory_space<vmem>>, %arg6: memref<1x64xf32, #tpu.memory_space<vmem>>, %arg7: memref<3x64x64xbf16, #tpu.memory_space<vmem>>, %arg8: memref<1x64xf32, #tpu.memory_space<vmem>>, %arg9: memref<1x64xf32, #tpu.memory_space<vmem>>, %arg10: memref<1x64xf32, #tpu.memory_space<vmem>>, %arg11: memref<1x1x64xf32, #tpu.memory_space<vmem>>, %arg12: memref<1x1x64xf32, #tpu.memory_space<vmem>>, %arg13: memref<1x64x256xbf16, #tpu.memory_space<vmem>>, %arg14: memref<1x4x128xf32, #tpu.memory_space<vmem>>, %arg15: memref<1x1x128xf32, #tpu.memory_space<vmem>>, %arg16: memref<1x128x256xbf16, #tpu.memory_space<vmem>>, %arg17: memref<1x1x128xf32, #tpu.memory_space<vmem>>, %arg18: memref<1x64x128xf32, #tpu.memory_space<vmem>>, %arg19: memref<1x1x128xf32, #tpu.memory_space<vmem>>, %arg20: memref<1x128x64xbf16, #tpu.memory_space<vmem>>, %arg21: memref<1x1x64xf32, #tpu.memory_space<vmem>>, %arg22: memref<1x1x64xf32, #tpu.memory_space<vmem>>, %arg23: memref<64x8xbf16, #tpu.memory_space<vmem>>, %arg24: memref<1x8xf32, #tpu.memory_space<vmem>>, %arg25: memref<1x16x8xf32, #tpu.memory_space<vmem>>, %arg26: memref<16x64xf32, #tpu.memory_space<vmem>>, %arg27: memref<16x128xf32, #tpu.memory_space<vmem>>, %arg28: memref<16x128xf32, #tpu.memory_space<vmem>>, %arg29: memref<16x128xf32, #tpu.memory_space<vmem>>, %arg30: memref<16x128xf32, #tpu.memory_space<vmem>>) attributes {dimension_semantics = [#tpu.dimension_semantics<parallel>, #tpu.dimension_semantics<arbitrary>], iteration_bounds = array<i64: 2, 12>, scalar_prefetch = 0 : i64, scratch_operands = 5 : i64, tpu.core_type = #tpu.core_type<tc>, window_params = [{transform_indices = @transform_0, window_bounds = array<i64: 1, 16, 10>}, {pipeline_mode = #tpu.pipeline_mode<synchronous>, transform_indices = @transform_1, window_bounds = array<i64: 3, 10, 64>}, {pipeline_mode = #tpu.pipeline_mode<synchronous>, transform_indices = @transform_2, window_bounds = array<i64: 1, 64>}, {pipeline_mode = #tpu.pipeline_mode<synchronous>, transform_indices = @transform_3, window_bounds = array<i64: 1, 64>}, {pipeline_mode = #tpu.pipeline_mode<synchronous>, transform_indices = @transform_4, window_bounds = array<i64: 1, 64>}, {pipeline_mode = #tpu.pipeline_mode<synchronous>, transform_indices = @transform_5, window_bounds = array<i64: 3, 64, 64>}, {pipeline_mode = #tpu.pipeline_mode<synchronous>, transform_indices = @transform_6, window_bounds = array<i64: 1, 64>}, {pipeline_mode = #tpu.pipeline_mode<synchronous>, transform_indices = @transform_7, window_bounds = array<i64: 1, 64>}, {pipeline_mode = #tpu.pipeline_mode<synchronous>, transform_indices = @transform_8, window_bounds = array<i64: 1, 64>}, {transform_indices = @transform_9, window_bounds = array<i64: 1, 1, 64>}, {transform_indices = @transform_10, window_bounds = array<i64: 1, 1, 64>}, {transform_indices = @transform_11, window_bounds = array<i64: 1, 64, 256>}, {transform_indices = @transform_12, window_bounds = array<i64: 1, 4, 128>}, {transform_indices = @transform_13, window_bounds = array<i64: 1, 1, 128>}, {transform_indices = @transform_14, window_bounds = array<i64: 1, 128, 256>}, {transform_indices = @transform_15, window_bounds = array<i64: 1, 1, 128>}, {transform_indices = @transform_16, window_bounds = array<i64: 1, 64, 128>}, {transform_indices = @transform_17, window_bounds = array<i64: 1, 1, 128>}, {transform_indices = @transform_18, window_bounds = array<i64: 1, 128, 64>}, {transform_indices = @transform_19, window_bounds = array<i64: 1, 1, 64>}, {transform_indices = @transform_20, window_bounds = array<i64: 1, 1, 64>}, {pipeline_mode = #tpu.pipeline_mode<synchronous>, transform_indices = @transform_21, window_bounds = array<i64: 64, 8>}, {pipeline_mode = #tpu.pipeline_mode<synchronous>, transform_indices = @transform_22, window_bounds = array<i64: 1, 8>}, {transform_indices = @transform_23, window_bounds = array<i64: 1, 16, 8>}]} {
    %c0_i32 = arith.constant 0 : i32
    %0 = arith.cmpi eq, %arg1, %c0_i32 : i32
    %1 = arith.extui %0 : i1 to i32
    %c0_i32_0 = arith.constant 0 : i32
    %2 = arith.cmpi ne, %1, %c0_i32_0 : i32
    scf.if %2 {
      %c0_83 = arith.constant 0 : index
      %c0_84 = arith.constant 0 : index
      %c0_85 = arith.constant 0 : index
      %167 = vector.load %arg2[%c0_83, %c0_84, %c0_85] : memref<1x16x10xf32, #tpu.memory_space<vmem>>, vector<1x16x10xf32>
      %168 = vector.shape_cast %167 : vector<1x16x10xf32> to vector<16x10xf32>
      %cst_86 = arith.constant 0.000000e+00 : f32
      %169 = vector.broadcast %cst_86 : f32 to vector<16x64xf32>
      %c1_i32_87 = arith.constant 1 : i32
      %170 = tpu.dynamic_rotate %168 by %c1_i32_87 dim 0 : vector<16x10xf32>, i32 -> vector<16x10xf32>
      %171 = tpu.iota {dimensions = array<i32: 0>} : vector<16x10xi32>
      %c1_i32_88 = arith.constant 1 : i32
      %172 = vector.broadcast %c1_i32_88 : i32 to vector<16x10xi32>
      %173 = arith.cmpi sge, %171, %172 : vector<16x10xi32>
      %cst_89 = arith.constant 0.000000e+00 : f32
      %174 = vector.broadcast %cst_89 : f32 to vector<16x10xf32>
      %175 = arith.select %173, %170, %174 : vector<16x10xi1>, vector<16x10xf32>
      %c0_90 = arith.constant 0 : index
      %c0_91 = arith.constant 0 : index
      %c0_92 = arith.constant 0 : index
      %176 = vector.load %arg3[%c0_90, %c0_91, %c0_92] : memref<3x10x64xbf16, #tpu.memory_space<vmem>>, vector<1x10x64xbf16>
      %177 = vector.shape_cast %176 : vector<1x10x64xbf16> to vector<10x64xbf16>
      %178 = arith.truncf %175 : vector<16x10xf32> to vector<16x10xbf16>
      %cst_93 = arith.constant dense<0.000000e+00> : vector<16x64xf32>
      %179 = tpu.matmul %178, %177, %cst_93 {dimension_numbers = #tpu.dot_dimension_numbers<[1], [0], [0], [1], [0, 0, 1, 1], [], []>} : vector<16x10xbf16>, vector<10x64xbf16>, vector<16x64xf32> -> vector<16x64xf32>
      %180 = arith.addf %169, %179 : vector<16x64xf32>
      %c1 = arith.constant 1 : index
      %c0_94 = arith.constant 0 : index
      %c0_95 = arith.constant 0 : index
      %181 = vector.load %arg3[%c1, %c0_94, %c0_95] : memref<3x10x64xbf16, #tpu.memory_space<vmem>>, vector<1x10x64xbf16>
      %182 = vector.shape_cast %181 : vector<1x10x64xbf16> to vector<10x64xbf16>
      %183 = arith.truncf %168 : vector<16x10xf32> to vector<16x10xbf16>
      %cst_96 = arith.constant dense<0.000000e+00> : vector<16x64xf32>
      %184 = tpu.matmul %183, %182, %cst_96 {dimension_numbers = #tpu.dot_dimension_numbers<[1], [0], [0], [1], [0, 0, 1, 1], [], []>} : vector<16x10xbf16>, vector<10x64xbf16>, vector<16x64xf32> -> vector<16x64xf32>
      %185 = arith.addf %180, %184 : vector<16x64xf32>
      %c15_i32 = arith.constant 15 : i32
      %186 = tpu.dynamic_rotate %168 by %c15_i32 dim 0 : vector<16x10xf32>, i32 -> vector<16x10xf32>
      %187 = tpu.iota {dimensions = array<i32: 0>} : vector<16x10xi32>
      %c15_i32_97 = arith.constant 15 : i32
      %188 = vector.broadcast %c15_i32_97 : i32 to vector<16x10xi32>
      %189 = arith.cmpi slt, %187, %188 : vector<16x10xi32>
      %cst_98 = arith.constant 0.000000e+00 : f32
      %190 = vector.broadcast %cst_98 : f32 to vector<16x10xf32>
      %191 = arith.select %189, %186, %190 : vector<16x10xi1>, vector<16x10xf32>
      %c2 = arith.constant 2 : index
      %c0_99 = arith.constant 0 : index
      %c0_100 = arith.constant 0 : index
      %192 = vector.load %arg3[%c2, %c0_99, %c0_100] : memref<3x10x64xbf16, #tpu.memory_space<vmem>>, vector<1x10x64xbf16>
      %193 = vector.shape_cast %192 : vector<1x10x64xbf16> to vector<10x64xbf16>
      %194 = arith.truncf %191 : vector<16x10xf32> to vector<16x10xbf16>
      %cst_101 = arith.constant dense<0.000000e+00> : vector<16x64xf32>
      %195 = tpu.matmul %194, %193, %cst_101 {dimension_numbers = #tpu.dot_dimension_numbers<[1], [0], [0], [1], [0, 0, 1, 1], [], []>} : vector<16x10xbf16>, vector<10x64xbf16>, vector<16x64xf32> -> vector<16x64xf32>
      %196 = arith.addf %185, %195 : vector<16x64xf32>
      %c0_102 = arith.constant 0 : index
      %c0_103 = arith.constant 0 : index
      %197 = vector.load %arg4[%c0_102, %c0_103] : memref<1x64xf32, #tpu.memory_space<vmem>>, vector<1x64xf32>
      %198 = vector.broadcast %197 : vector<1x64xf32> to vector<16x64xf32>
      %199 = arith.addf %196, %198 : vector<16x64xf32>
      %c0_104 = arith.constant 0 : index
      %c0_105 = arith.constant 0 : index
      %200 = vector.load %arg5[%c0_104, %c0_105] : memref<1x64xf32, #tpu.memory_space<vmem>>, vector<1x64xf32>
      %201 = vector.broadcast %200 : vector<1x64xf32> to vector<16x64xf32>
      %202 = arith.mulf %199, %201 : vector<16x64xf32>
      %c0_106 = arith.constant 0 : index
      %c0_107 = arith.constant 0 : index
      %203 = vector.load %arg6[%c0_106, %c0_107] : memref<1x64xf32, #tpu.memory_space<vmem>>, vector<1x64xf32>
      %204 = vector.broadcast %203 : vector<1x64xf32> to vector<16x64xf32>
      %205 = arith.addf %202, %204 : vector<16x64xf32>
      %cst_108 = arith.constant 0.000000e+00 : f32
      %206 = vector.broadcast %cst_108 : f32 to vector<16x64xf32>
      %207 = arith.maximumf %205, %206 : vector<16x64xf32>
      %cst_109 = arith.constant 0.000000e+00 : f32
      %208 = vector.broadcast %cst_109 : f32 to vector<16x64xf32>
      %c1_i32_110 = arith.constant 1 : i32
      %209 = tpu.dynamic_rotate %207 by %c1_i32_110 dim 0 : vector<16x64xf32>, i32 -> vector<16x64xf32>
      %210 = tpu.iota {dimensions = array<i32: 0>} : vector<16x64xi32>
      %c1_i32_111 = arith.constant 1 : i32
      %211 = vector.broadcast %c1_i32_111 : i32 to vector<16x64xi32>
      %212 = arith.cmpi sge, %210, %211 : vector<16x64xi32>
      %cst_112 = arith.constant 0.000000e+00 : f32
      %213 = vector.broadcast %cst_112 : f32 to vector<16x64xf32>
      %214 = arith.select %212, %209, %213 : vector<16x64xi1>, vector<16x64xf32>
      %c0_113 = arith.constant 0 : index
      %c0_114 = arith.constant 0 : index
      %c0_115 = arith.constant 0 : index
      %215 = vector.load %arg7[%c0_113, %c0_114, %c0_115] : memref<3x64x64xbf16, #tpu.memory_space<vmem>>, vector<1x64x64xbf16>
      %216 = vector.shape_cast %215 : vector<1x64x64xbf16> to vector<64x64xbf16>
      %217 = arith.truncf %214 : vector<16x64xf32> to vector<16x64xbf16>
      %cst_116 = arith.constant dense<0.000000e+00> : vector<16x64xf32>
      %218 = tpu.matmul %217, %216, %cst_116 {dimension_numbers = #tpu.dot_dimension_numbers<[1], [0], [0], [1], [0, 0, 1, 1], [], []>} : vector<16x64xbf16>, vector<64x64xbf16>, vector<16x64xf32> -> vector<16x64xf32>
      %219 = arith.addf %208, %218 : vector<16x64xf32>
      %c1_117 = arith.constant 1 : index
      %c0_118 = arith.constant 0 : index
      %c0_119 = arith.constant 0 : index
      %220 = vector.load %arg7[%c1_117, %c0_118, %c0_119] : memref<3x64x64xbf16, #tpu.memory_space<vmem>>, vector<1x64x64xbf16>
      %221 = vector.shape_cast %220 : vector<1x64x64xbf16> to vector<64x64xbf16>
      %222 = arith.truncf %207 : vector<16x64xf32> to vector<16x64xbf16>
      %cst_120 = arith.constant dense<0.000000e+00> : vector<16x64xf32>
      %223 = tpu.matmul %222, %221, %cst_120 {dimension_numbers = #tpu.dot_dimension_numbers<[1], [0], [0], [1], [0, 0, 1, 1], [], []>} : vector<16x64xbf16>, vector<64x64xbf16>, vector<16x64xf32> -> vector<16x64xf32>
      %224 = arith.addf %219, %223 : vector<16x64xf32>
      %c15_i32_121 = arith.constant 15 : i32
      %225 = tpu.dynamic_rotate %207 by %c15_i32_121 dim 0 : vector<16x64xf32>, i32 -> vector<16x64xf32>
      %226 = tpu.iota {dimensions = array<i32: 0>} : vector<16x64xi32>
      %c15_i32_122 = arith.constant 15 : i32
      %227 = vector.broadcast %c15_i32_122 : i32 to vector<16x64xi32>
      %228 = arith.cmpi slt, %226, %227 : vector<16x64xi32>
      %cst_123 = arith.constant 0.000000e+00 : f32
      %229 = vector.broadcast %cst_123 : f32 to vector<16x64xf32>
      %230 = arith.select %228, %225, %229 : vector<16x64xi1>, vector<16x64xf32>
      %c2_124 = arith.constant 2 : index
      %c0_125 = arith.constant 0 : index
      %c0_126 = arith.constant 0 : index
      %231 = vector.load %arg7[%c2_124, %c0_125, %c0_126] : memref<3x64x64xbf16, #tpu.memory_space<vmem>>, vector<1x64x64xbf16>
      %232 = vector.shape_cast %231 : vector<1x64x64xbf16> to vector<64x64xbf16>
      %233 = arith.truncf %230 : vector<16x64xf32> to vector<16x64xbf16>
      %cst_127 = arith.constant dense<0.000000e+00> : vector<16x64xf32>
      %234 = tpu.matmul %233, %232, %cst_127 {dimension_numbers = #tpu.dot_dimension_numbers<[1], [0], [0], [1], [0, 0, 1, 1], [], []>} : vector<16x64xbf16>, vector<64x64xbf16>, vector<16x64xf32> -> vector<16x64xf32>
      %235 = arith.addf %224, %234 : vector<16x64xf32>
      %c0_128 = arith.constant 0 : index
      %c0_129 = arith.constant 0 : index
      %236 = vector.load %arg8[%c0_128, %c0_129] : memref<1x64xf32, #tpu.memory_space<vmem>>, vector<1x64xf32>
      %237 = vector.broadcast %236 : vector<1x64xf32> to vector<16x64xf32>
      %238 = arith.addf %235, %237 : vector<16x64xf32>
      %c0_130 = arith.constant 0 : index
      %c0_131 = arith.constant 0 : index
      %239 = vector.load %arg9[%c0_130, %c0_131] : memref<1x64xf32, #tpu.memory_space<vmem>>, vector<1x64xf32>
      %240 = vector.broadcast %239 : vector<1x64xf32> to vector<16x64xf32>
      %241 = arith.mulf %238, %240 : vector<16x64xf32>
      %c0_132 = arith.constant 0 : index
      %c0_133 = arith.constant 0 : index
      %242 = vector.load %arg10[%c0_132, %c0_133] : memref<1x64xf32, #tpu.memory_space<vmem>>, vector<1x64xf32>
      %243 = vector.broadcast %242 : vector<1x64xf32> to vector<16x64xf32>
      %244 = arith.addf %241, %243 : vector<16x64xf32>
      %cst_134 = arith.constant 0.000000e+00 : f32
      %245 = vector.broadcast %cst_134 : f32 to vector<16x64xf32>
      %246 = arith.maximumf %244, %245 : vector<16x64xf32>
      %c0_135 = arith.constant 0 : index
      %c0_136 = arith.constant 0 : index
      %247 = vector.load %arg26[%c0_135, %c0_136] : memref<16x64xf32, #tpu.memory_space<vmem>>, vector<16x64xf32>
      tpu.vector_store %arg26[%c0_135, %c0_136], %246 {strides = array<i32>} : memref<16x64xf32, #tpu.memory_space<vmem>>, vector<16x64xf32>,
    } else {
    }
    %c0 = arith.constant 0 : index
    %c0_1 = arith.constant 0 : index
    %3 = vector.load %arg26[%c0, %c0_1] : memref<16x64xf32, #tpu.memory_space<vmem>>, vector<16x64xf32>
    %c0_2 = arith.constant 0 : index
    %c0_3 = arith.constant 0 : index
    %c0_4 = arith.constant 0 : index
    %4 = vector.load %arg11[%c0_2, %c0_3, %c0_4] : memref<1x1x64xf32, #tpu.memory_space<vmem>>, vector<1x1x64xf32>
    %5 = vector.shape_cast %4 : vector<1x1x64xf32> to vector<1x64xf32>
    %c0_5 = arith.constant 0 : index
    %c0_6 = arith.constant 0 : index
    %c0_7 = arith.constant 0 : index
    %6 = vector.load %arg12[%c0_5, %c0_6, %c0_7] : memref<1x1x64xf32, #tpu.memory_space<vmem>>, vector<1x1x64xf32>
    %7 = vector.shape_cast %6 : vector<1x1x64xf32> to vector<1x64xf32>
    %cst = arith.constant dense<0.000000e+00> : vector<16xf32>
    %8 = vector.multi_reduction <add>, %3, %cst [1] : vector<16x64xf32> to vector<16xf32>
    %9 = vector.shape_cast %8 : vector<16xf32> to vector<16x1xf32>
    %cst_8 = arith.constant 6.400000e+01 : f32
    %10 = vector.broadcast %cst_8 : f32 to vector<16x1xf32>
    %11 = arith.divf %9, %10 : vector<16x1xf32>
    %12 = vector.broadcast %11 : vector<16x1xf32> to vector<16x64xf32>
    %13 = arith.subf %3, %12 : vector<16x64xf32>
    %14 = arith.mulf %13, %13 : vector<16x64xf32>
    %cst_9 = arith.constant dense<0.000000e+00> : vector<16xf32>
    %15 = vector.multi_reduction <add>, %14, %cst_9 [1] : vector<16x64xf32> to vector<16xf32>
    %16 = vector.shape_cast %15 : vector<16xf32> to vector<16x1xf32>
    %cst_10 = arith.constant 6.400000e+01 : f32
    %17 = vector.broadcast %cst_10 : f32 to vector<16x1xf32>
    %18 = arith.divf %16, %17 : vector<16x1xf32>
    %19 = vector.broadcast %11 : vector<16x1xf32> to vector<16x64xf32>
    %20 = arith.subf %3, %19 : vector<16x64xf32>
    %cst_11 = arith.constant 9.99999974E-6 : f32
    %21 = vector.broadcast %cst_11 : f32 to vector<16x1xf32>
    %22 = arith.addf %18, %21 : vector<16x1xf32>
    %23 = math.rsqrt %22 : vector<16x1xf32>
    %24 = vector.broadcast %23 : vector<16x1xf32> to vector<16x64xf32>
    %25 = arith.mulf %20, %24 : vector<16x64xf32>
    %26 = vector.broadcast %5 : vector<1x64xf32> to vector<16x64xf32>
    %27 = arith.mulf %25, %26 : vector<16x64xf32>
    %28 = vector.broadcast %7 : vector<1x64xf32> to vector<16x64xf32>
    %29 = arith.addf %27, %28 : vector<16x64xf32>
    %c0_12 = arith.constant 0 : index
    %c0_13 = arith.constant 0 : index
    %c0_14 = arith.constant 0 : index
    %30 = vector.load %arg13[%c0_12, %c0_13, %c0_14] : memref<1x64x256xbf16, #tpu.memory_space<vmem>>, vector<1x64x256xbf16>
    %31 = vector.shape_cast %30 : vector<1x64x256xbf16> to vector<64x256xbf16>
    %32 = arith.truncf %29 : vector<16x64xf32> to vector<16x64xbf16>
    %cst_15 = arith.constant dense<0.000000e+00> : vector<16x256xf32>
    %33 = tpu.matmul %32, %31, %cst_15 {dimension_numbers = #tpu.dot_dimension_numbers<[1], [0], [0], [1], [0, 0, 1, 1], [], []>} : vector<16x64xbf16>, vector<64x256xbf16>, vector<16x256xf32> -> vector<16x256xf32>
    %34 = vector.extract_strided_slice %33 {offsets = [0, 0], sizes = [16, 128], strides = [1, 1]} : vector<16x256xf32> to vector<16x128xf32>
    %35 = vector.extract_strided_slice %33 {offsets = [0, 128], sizes = [16, 128], strides = [1, 1]} : vector<16x256xf32> to vector<16x128xf32>
    %cst_16 = arith.constant 0.000000e+00 : f32
    %36 = vector.broadcast %cst_16 : f32 to vector<16x128xf32>
    %c0_17 = arith.constant 0 : index
    %c0_18 = arith.constant 0 : index
    %c0_19 = arith.constant 0 : index
    %37 = vector.load %arg15[%c0_17, %c0_18, %c0_19] : memref<1x1x128xf32, #tpu.memory_space<vmem>>, vector<1x1x128xf32>
    %38 = vector.shape_cast %37 : vector<1x1x128xf32> to vector<1x128xf32>
    %39 = vector.broadcast %38 : vector<1x128xf32> to vector<16x128xf32>
    %40 = arith.addf %36, %39 : vector<16x128xf32>
    %c0_20 = arith.constant 0 : index
    %c0_21 = arith.constant 0 : index
    %c0_22 = arith.constant 0 : index
    %41 = vector.load %arg14[%c0_20, %c0_21, %c0_22] : memref<1x4x128xf32, #tpu.memory_space<vmem>>, vector<1x4x128xf32>
    %42 = vector.shape_cast %41 : vector<1x4x128xf32> to vector<4x128xf32>
    %43 = vector.extract_strided_slice %42 {offsets = [0, 0], sizes = [1, 128], strides = [1, 1]} : vector<4x128xf32> to vector<1x128xf32>
    %c3_i32 = arith.constant 3 : i32
    %44 = tpu.dynamic_rotate %34 by %c3_i32 dim 0 : vector<16x128xf32>, i32 -> vector<16x128xf32>
    %45 = tpu.iota {dimensions = array<i32: 0>} : vector<16x128xi32>
    %c3_i32_23 = arith.constant 3 : i32
    %46 = vector.broadcast %c3_i32_23 : i32 to vector<16x128xi32>
    %47 = arith.cmpi sge, %45, %46 : vector<16x128xi32>
    %cst_24 = arith.constant 0.000000e+00 : f32
    %48 = vector.broadcast %cst_24 : f32 to vector<16x128xf32>
    %49 = arith.select %47, %44, %48 : vector<16x128xi1>, vector<16x128xf32>
    %50 = vector.broadcast %43 : vector<1x128xf32> to vector<16x128xf32>
    %51 = arith.mulf %50, %49 : vector<16x128xf32>
    %52 = arith.addf %40, %51 : vector<16x128xf32>
    %53 = vector.extract_strided_slice %42 {offsets = [1, 0], sizes = [1, 128], strides = [1, 1]} : vector<4x128xf32> to vector<1x128xf32>
    %c2_i32 = arith.constant 2 : i32
    %54 = tpu.dynamic_rotate %34 by %c2_i32 dim 0 : vector<16x128xf32>, i32 -> vector<16x128xf32>
    %55 = tpu.iota {dimensions = array<i32: 0>} : vector<16x128xi32>
    %c2_i32_25 = arith.constant 2 : i32
    %56 = vector.broadcast %c2_i32_25 : i32 to vector<16x128xi32>
    %57 = arith.cmpi sge, %55, %56 : vector<16x128xi32>
    %cst_26 = arith.constant 0.000000e+00 : f32
    %58 = vector.broadcast %cst_26 : f32 to vector<16x128xf32>
    %59 = arith.select %57, %54, %58 : vector<16x128xi1>, vector<16x128xf32>
    %60 = vector.broadcast %53 : vector<1x128xf32> to vector<16x128xf32>
    %61 = arith.mulf %60, %59 : vector<16x128xf32>
    %62 = arith.addf %52, %61 : vector<16x128xf32>
    %63 = vector.extract_strided_slice %42 {offsets = [2, 0], sizes = [1, 128], strides = [1, 1]} : vector<4x128xf32> to vector<1x128xf32>
    %c1_i32 = arith.constant 1 : i32
    %64 = tpu.dynamic_rotate %34 by %c1_i32 dim 0 : vector<16x128xf32>, i32 -> vector<16x128xf32>
    %65 = tpu.iota {dimensions = array<i32: 0>} : vector<16x128xi32>
    %c1_i32_27 = arith.constant 1 : i32
    %66 = vector.broadcast %c1_i32_27 : i32 to vector<16x128xi32>
    %67 = arith.cmpi sge, %65, %66 : vector<16x128xi32>
    %cst_28 = arith.constant 0.000000e+00 : f32
    %68 = vector.broadcast %cst_28 : f32 to vector<16x128xf32>
    %69 = arith.select %67, %64, %68 : vector<16x128xi1>, vector<16x128xf32>
    %70 = vector.broadcast %63 : vector<1x128xf32> to vector<16x128xf32>
    %71 = arith.mulf %70, %69 : vector<16x128xf32>
    %72 = arith.addf %62, %71 : vector<16x128xf32>
    %73 = vector.extract_strided_slice %42 {offsets = [3, 0], sizes = [1, 128], strides = [1, 1]} : vector<4x128xf32> to vector<1x128xf32>
    %74 = vector.broadcast %73 : vector<1x128xf32> to vector<16x128xf32>
    %75 = arith.mulf %74, %34 : vector<16x128xf32>
    %76 = arith.addf %72, %75 : vector<16x128xf32>
    %cst_29 = arith.constant 0.000000e+00 : f32
    %77 = vector.broadcast %cst_29 : f32 to vector<16x128xf32>
    %78 = arith.subf %77, %76 : vector<16x128xf32>
    %79 = math.exp %78 : vector<16x128xf32>
    %cst_30 = arith.constant 1.000000e+00 : f32
    %80 = vector.broadcast %cst_30 : f32 to vector<16x128xf32>
    %81 = arith.addf %80, %79 : vector<16x128xf32>
    %cst_31 = arith.constant 1.000000e+00 : f32
    %82 = vector.broadcast %cst_31 : f32 to vector<16x128xf32>
    %83 = arith.divf %82, %81 : vector<16x128xf32>
    %84 = arith.mulf %76, %83 : vector<16x128xf32>
    %c0_32 = arith.constant 0 : index
    %c0_33 = arith.constant 0 : index
    %c0_34 = arith.constant 0 : index
    %85 = vector.load %arg16[%c0_32, %c0_33, %c0_34] : memref<1x128x256xbf16, #tpu.memory_space<vmem>>, vector<1x128x256xbf16>
    %86 = vector.shape_cast %85 : vector<1x128x256xbf16> to vector<128x256xbf16>
    %87 = arith.truncf %84 : vector<16x128xf32> to vector<16x128xbf16>
    %cst_35 = arith.constant dense<0.000000e+00> : vector<16x256xf32>
    %88 = tpu.matmul %87, %86, %cst_35 {dimension_numbers = #tpu.dot_dimension_numbers<[1], [0], [0], [1], [0, 0, 1, 1], [], []>} : vector<16x128xbf16>, vector<128x256xbf16>, vector<16x256xf32> -> vector<16x256xf32>
    %89 = vector.extract_strided_slice %88 {offsets = [0, 0], sizes = [16, 128], strides = [1, 1]} : vector<16x256xf32> to vector<16x128xf32>
    %c0_36 = arith.constant 0 : index
    %c0_37 = arith.constant 0 : index
    %c0_38 = arith.constant 0 : index
    %90 = vector.load %arg17[%c0_36, %c0_37, %c0_38] : memref<1x1x128xf32, #tpu.memory_space<vmem>>, vector<1x1x128xf32>
    %91 = vector.shape_cast %90 : vector<1x1x128xf32> to vector<1x128xf32>
    %92 = vector.broadcast %91 : vector<1x128xf32> to vector<16x128xf32>
    %93 = arith.addf %89, %92 : vector<16x128xf32>
    %cst_39 = arith.constant 0.000000e+00 : f32
    %94 = vector.broadcast %cst_39 : f32 to vector<16x128xf32>
    %95 = arith.maximumf %93, %94 : vector<16x128xf32>
    %96 = math.absf %93 : vector<16x128xf32>
    %cst_40 = arith.constant 0.000000e+00 : f32
    %97 = vector.broadcast %cst_40 : f32 to vector<16x128xf32>
    %98 = arith.subf %97, %96 : vector<16x128xf32>
    %99 = math.exp %98 : vector<16x128xf32>
    %cst_41 = arith.constant 1.000000e+00 : f32
    %100 = vector.broadcast %cst_41 : f32 to vector<16x128xf32>
    %101 = arith.addf %100, %99 : vector<16x128xf32>
    %102 = math.log %101 : vector<16x128xf32>
    %103 = arith.addf %95, %102 : vector<16x128xf32>
    %104 = vector.extract_strided_slice %88 {offsets = [0, 128], sizes = [16, 128], strides = [1, 1]} : vector<16x256xf32> to vector<16x128xf32>
    %c0_42 = arith.constant 0 : index
    %c0_43 = arith.constant 0 : index
    %c0_44 = arith.constant 0 : index
    %105 = vector.load %arg18[%c0_42, %c0_43, %c0_44] : memref<1x64x128xf32, #tpu.memory_space<vmem>>, vector<1x64x128xf32>
    %106 = vector.shape_cast %105 : vector<1x64x128xf32> to vector<64x128xf32>
    %107 = math.exp %106 : vector<64x128xf32>
    %cst_45 = arith.constant 0.000000e+00 : f32
    %108 = vector.broadcast %cst_45 : f32 to vector<64x128xf32>
    %109 = arith.subf %108, %107 : vector<64x128xf32>
    %c0_46 = arith.constant 0 : index
    %c0_47 = arith.constant 0 : index
    %110 = vector.load %arg27[%c0_46, %c0_47] : memref<16x128xf32, #tpu.memory_space<vmem>>, vector<16x128xf32>
    tpu.vector_store %arg27[%c0_46, %c0_47], %103 {strides = array<i32>} : memref<16x128xf32, #tpu.memory_space<vmem>>, vector<16x128xf32>,
    %111 = arith.mulf %103, %84 : vector<16x128xf32>
    %c0_48 = arith.constant 0 : index
    %c0_49 = arith.constant 0 : index
    %112 = vector.load %arg28[%c0_48, %c0_49] : memref<16x128xf32, #tpu.memory_space<vmem>>, vector<16x128xf32>
    tpu.vector_store %arg28[%c0_48, %c0_49], %111 {strides = array<i32>} : memref<16x128xf32, #tpu.memory_space<vmem>>, vector<16x128xf32>,
    %c0_50 = arith.constant 0 : index
    %c0_51 = arith.constant 0 : index
    %113 = vector.load %arg29[%c0_50, %c0_51] : memref<16x128xf32, #tpu.memory_space<vmem>>, vector<16x128xf32>
    tpu.vector_store %arg29[%c0_50, %c0_51], %104 {strides = array<i32>} : memref<16x128xf32, #tpu.memory_space<vmem>>, vector<16x128xf32>,
    %cst_52 = arith.constant 0.000000e+00 : f32
    %114 = vector.broadcast %cst_52 : f32 to vector<64x128xf32>
    %c0_i32_53 = arith.constant 0 : i32
    %c2_i32_54 = arith.constant 2 : i32
    %115 = arith.addi %c0_i32_53, %c2_i32_54 : i32
    %c1_i32_55 = arith.constant 1 : i32
    %116 = scf.for %arg31 = %c0_i32_53 to %115 step %c1_i32_55 iter_args(%arg32 = %114) -> (vector<64x128xf32>)  : i32 {
      %c8_i32 = arith.constant 8 : i32
      %167 = arith.muli %arg31, %c8_i32 : i32
      %168 = tpu.assume_multiple %167, 8 : i32
      %169 = arith.index_cast %168 : i32 to index
      %c0_83 = arith.constant 0 : index
      %170 = vector.load %arg27[%169, %c0_83] : memref<16x128xf32, #tpu.memory_space<vmem>>, vector<8x128xf32>
      %171 = arith.index_cast %168 : i32 to index
      %c0_84 = arith.constant 0 : index
      %172 = vector.load %arg28[%171, %c0_84] : memref<16x128xf32, #tpu.memory_space<vmem>>, vector<8x128xf32>
      %173 = arith.index_cast %168 : i32 to index
      %c0_85 = arith.constant 0 : index
      %174 = vector.load %arg29[%173, %c0_85] : memref<16x128xf32, #tpu.memory_space<vmem>>, vector<8x128xf32>
      %175 = tpu.transpose %174, [1, 0] : vector<8x128xf32> -> vector<128x8xf32>
      %176 = vector.extract_strided_slice %170 {offsets = [0, 0], sizes = [1, 128], strides = [1, 1]} : vector<8x128xf32> to vector<1x128xf32>
      %177 = vector.broadcast %176 : vector<1x128xf32> to vector<64x128xf32>
      %178 = arith.mulf %109, %177 : vector<64x128xf32>
      %179 = math.exp %178 : vector<64x128xf32>
      %180 = vector.extract_strided_slice %175 {offsets = [0, 0], sizes = [64, 1], strides = [1, 1]} : vector<128x8xf32> to vector<64x1xf32>
      %181 = vector.extract_strided_slice %175 {offsets = [64, 0], sizes = [64, 1], strides = [1, 1]} : vector<128x8xf32> to vector<64x1xf32>
      %182 = arith.mulf %179, %arg32 : vector<64x128xf32>
      %183 = vector.extract_strided_slice %172 {offsets = [0, 0], sizes = [1, 128], strides = [1, 1]} : vector<8x128xf32> to vector<1x128xf32>
      %184 = vector.broadcast %180 : vector<64x1xf32> to vector<64x128xf32>
      %185 = vector.broadcast %183 : vector<1x128xf32> to vector<64x128xf32>
      %186 = arith.mulf %184, %185 : vector<64x128xf32>
      %187 = arith.addf %182, %186 : vector<64x128xf32>
      %188 = vector.broadcast %181 : vector<64x1xf32> to vector<64x128xf32>
      %189 = arith.mulf %187, %188 : vector<64x128xf32>
      %cst_86 = arith.constant dense<0.000000e+00> : vector<128xf32>
      %190 = vector.multi_reduction <add>, %189, %cst_86 [0] : vector<64x128xf32> to vector<128xf32>
      %191 = vector.shape_cast %190 : vector<128xf32> to vector<1x128xf32>
      %192 = vector.extract_strided_slice %170 {offsets = [1, 0], sizes = [1, 128], strides = [1, 1]} : vector<8x128xf32> to vector<1x128xf32>
      %193 = vector.broadcast %192 : vector<1x128xf32> to vector<64x128xf32>
      %194 = arith.mulf %109, %193 : vector<64x128xf32>
      %195 = math.exp %194 : vector<64x128xf32>
      %196 = vector.extract_strided_slice %175 {offsets = [0, 1], sizes = [64, 1], strides = [1, 1]} : vector<128x8xf32> to vector<64x1xf32>
      %197 = vector.extract_strided_slice %175 {offsets = [64, 1], sizes = [64, 1], strides = [1, 1]} : vector<128x8xf32> to vector<64x1xf32>
      %198 = arith.mulf %195, %187 : vector<64x128xf32>
      %199 = vector.extract_strided_slice %172 {offsets = [1, 0], sizes = [1, 128], strides = [1, 1]} : vector<8x128xf32> to vector<1x128xf32>
      %200 = vector.broadcast %196 : vector<64x1xf32> to vector<64x128xf32>
      %201 = vector.broadcast %199 : vector<1x128xf32> to vector<64x128xf32>
      %202 = arith.mulf %200, %201 : vector<64x128xf32>
      %203 = arith.addf %198, %202 : vector<64x128xf32>
      %204 = vector.broadcast %197 : vector<64x1xf32> to vector<64x128xf32>
      %205 = arith.mulf %203, %204 : vector<64x128xf32>
      %cst_87 = arith.constant dense<0.000000e+00> : vector<128xf32>
      %206 = vector.multi_reduction <add>, %205, %cst_87 [0] : vector<64x128xf32> to vector<128xf32>
      %207 = vector.shape_cast %206 : vector<128xf32> to vector<1x128xf32>
      %208 = vector.extract_strided_slice %170 {offsets = [2, 0], sizes = [1, 128], strides = [1, 1]} : vector<8x128xf32> to vector<1x128xf32>
      %209 = vector.broadcast %208 : vector<1x128xf32> to vector<64x128xf32>
      %210 = arith.mulf %109, %209 : vector<64x128xf32>
      %211 = math.exp %210 : vector<64x128xf32>
      %212 = vector.extract_strided_slice %175 {offsets = [0, 2], sizes = [64, 1], strides = [1, 1]} : vector<128x8xf32> to vector<64x1xf32>
      %213 = vector.extract_strided_slice %175 {offsets = [64, 2], sizes = [64, 1], strides = [1, 1]} : vector<128x8xf32> to vector<64x1xf32>
      %214 = arith.mulf %211, %203 : vector<64x128xf32>
      %215 = vector.extract_strided_slice %172 {offsets = [2, 0], sizes = [1, 128], strides = [1, 1]} : vector<8x128xf32> to vector<1x128xf32>
      %216 = vector.broadcast %212 : vector<64x1xf32> to vector<64x128xf32>
      %217 = vector.broadcast %215 : vector<1x128xf32> to vector<64x128xf32>
      %218 = arith.mulf %216, %217 : vector<64x128xf32>
      %219 = arith.addf %214, %218 : vector<64x128xf32>
      %220 = vector.broadcast %213 : vector<64x1xf32> to vector<64x128xf32>
      %221 = arith.mulf %219, %220 : vector<64x128xf32>
      %cst_88 = arith.constant dense<0.000000e+00> : vector<128xf32>
      %222 = vector.multi_reduction <add>, %221, %cst_88 [0] : vector<64x128xf32> to vector<128xf32>
      %223 = vector.shape_cast %222 : vector<128xf32> to vector<1x128xf32>
      %224 = vector.extract_strided_slice %170 {offsets = [3, 0], sizes = [1, 128], strides = [1, 1]} : vector<8x128xf32> to vector<1x128xf32>
      %225 = vector.broadcast %224 : vector<1x128xf32> to vector<64x128xf32>
      %226 = arith.mulf %109, %225 : vector<64x128xf32>
      %227 = math.exp %226 : vector<64x128xf32>
      %228 = vector.extract_strided_slice %175 {offsets = [0, 3], sizes = [64, 1], strides = [1, 1]} : vector<128x8xf32> to vector<64x1xf32>
      %229 = vector.extract_strided_slice %175 {offsets = [64, 3], sizes = [64, 1], strides = [1, 1]} : vector<128x8xf32> to vector<64x1xf32>
      %230 = arith.mulf %227, %219 : vector<64x128xf32>
      %231 = vector.extract_strided_slice %172 {offsets = [3, 0], sizes = [1, 128], strides = [1, 1]} : vector<8x128xf32> to vector<1x128xf32>
      %232 = vector.broadcast %228 : vector<64x1xf32> to vector<64x128xf32>
      %233 = vector.broadcast %231 : vector<1x128xf32> to vector<64x128xf32>
      %234 = arith.mulf %232, %233 : vector<64x128xf32>
      %235 = arith.addf %230, %234 : vector<64x128xf32>
      %236 = vector.broadcast %229 : vector<64x1xf32> to vector<64x128xf32>
      %237 = arith.mulf %235, %236 : vector<64x128xf32>
      %cst_89 = arith.constant dense<0.000000e+00> : vector<128xf32>
      %238 = vector.multi_reduction <add>, %237, %cst_89 [0] : vector<64x128xf32> to vector<128xf32>
      %239 = vector.shape_cast %238 : vector<128xf32> to vector<1x128xf32>
      %240 = vector.extract_strided_slice %170 {offsets = [4, 0], sizes = [1, 128], strides = [1, 1]} : vector<8x128xf32> to vector<1x128xf32>
      %241 = vector.broadcast %240 : vector<1x128xf32> to vector<64x128xf32>
      %242 = arith.mulf %109, %241 : vector<64x128xf32>
      %243 = math.exp %242 : vector<64x128xf32>
      %244 = vector.extract_strided_slice %175 {offsets = [0, 4], sizes = [64, 1], strides = [1, 1]} : vector<128x8xf32> to vector<64x1xf32>
      %245 = vector.extract_strided_slice %175 {offsets = [64, 4], sizes = [64, 1], strides = [1, 1]} : vector<128x8xf32> to vector<64x1xf32>
      %246 = arith.mulf %243, %235 : vector<64x128xf32>
      %247 = vector.extract_strided_slice %172 {offsets = [4, 0], sizes = [1, 128], strides = [1, 1]} : vector<8x128xf32> to vector<1x128xf32>
      %248 = vector.broadcast %244 : vector<64x1xf32> to vector<64x128xf32>
      %249 = vector.broadcast %247 : vector<1x128xf32> to vector<64x128xf32>
      %250 = arith.mulf %248, %249 : vector<64x128xf32>
      %251 = arith.addf %246, %250 : vector<64x128xf32>
      %252 = vector.broadcast %245 : vector<64x1xf32> to vector<64x128xf32>
      %253 = arith.mulf %251, %252 : vector<64x128xf32>
      %cst_90 = arith.constant dense<0.000000e+00> : vector<128xf32>
      %254 = vector.multi_reduction <add>, %253, %cst_90 [0] : vector<64x128xf32> to vector<128xf32>
      %255 = vector.shape_cast %254 : vector<128xf32> to vector<1x128xf32>
      %256 = vector.extract_strided_slice %170 {offsets = [5, 0], sizes = [1, 128], strides = [1, 1]} : vector<8x128xf32> to vector<1x128xf32>
      %257 = vector.broadcast %256 : vector<1x128xf32> to vector<64x128xf32>
      %258 = arith.mulf %109, %257 : vector<64x128xf32>
      %259 = math.exp %258 : vector<64x128xf32>
      %260 = vector.extract_strided_slice %175 {offsets = [0, 5], sizes = [64, 1], strides = [1, 1]} : vector<128x8xf32> to vector<64x1xf32>
      %261 = vector.extract_strided_slice %175 {offsets = [64, 5], sizes = [64, 1], strides = [1, 1]} : vector<128x8xf32> to vector<64x1xf32>
      %262 = arith.mulf %259, %251 : vector<64x128xf32>
      %263 = vector.extract_strided_slice %172 {offsets = [5, 0], sizes = [1, 128], strides = [1, 1]} : vector<8x128xf32> to vector<1x128xf32>
      %264 = vector.broadcast %260 : vector<64x1xf32> to vector<64x128xf32>
      %265 = vector.broadcast %263 : vector<1x128xf32> to vector<64x128xf32>
      %266 = arith.mulf %264, %265 : vector<64x128xf32>
      %267 = arith.addf %262, %266 : vector<64x128xf32>
      %268 = vector.broadcast %261 : vector<64x1xf32> to vector<64x128xf32>
      %269 = arith.mulf %267, %268 : vector<64x128xf32>
      %cst_91 = arith.constant dense<0.000000e+00> : vector<128xf32>
      %270 = vector.multi_reduction <add>, %269, %cst_91 [0] : vector<64x128xf32> to vector<128xf32>
      %271 = vector.shape_cast %270 : vector<128xf32> to vector<1x128xf32>
      %272 = vector.extract_strided_slice %170 {offsets = [6, 0], sizes = [1, 128], strides = [1, 1]} : vector<8x128xf32> to vector<1x128xf32>
      %273 = vector.broadcast %272 : vector<1x128xf32> to vector<64x128xf32>
      %274 = arith.mulf %109, %273 : vector<64x128xf32>
      %275 = math.exp %274 : vector<64x128xf32>
      %276 = vector.extract_strided_slice %175 {offsets = [0, 6], sizes = [64, 1], strides = [1, 1]} : vector<128x8xf32> to vector<64x1xf32>
      %277 = vector.extract_strided_slice %175 {offsets = [64, 6], sizes = [64, 1], strides = [1, 1]} : vector<128x8xf32> to vector<64x1xf32>
      %278 = arith.mulf %275, %267 : vector<64x128xf32>
      %279 = vector.extract_strided_slice %172 {offsets = [6, 0], sizes = [1, 128], strides = [1, 1]} : vector<8x128xf32> to vector<1x128xf32>
      %280 = vector.broadcast %276 : vector<64x1xf32> to vector<64x128xf32>
      %281 = vector.broadcast %279 : vector<1x128xf32> to vector<64x128xf32>
      %282 = arith.mulf %280, %281 : vector<64x128xf32>
      %283 = arith.addf %278, %282 : vector<64x128xf32>
      %284 = vector.broadcast %277 : vector<64x1xf32> to vector<64x128xf32>
      %285 = arith.mulf %283, %284 : vector<64x128xf32>
      %cst_92 = arith.constant dense<0.000000e+00> : vector<128xf32>
      %286 = vector.multi_reduction <add>, %285, %cst_92 [0] : vector<64x128xf32> to vector<128xf32>
      %287 = vector.shape_cast %286 : vector<128xf32> to vector<1x128xf32>
      %288 = vector.extract_strided_slice %170 {offsets = [7, 0], sizes = [1, 128], strides = [1, 1]} : vector<8x128xf32> to vector<1x128xf32>
      %289 = vector.broadcast %288 : vector<1x128xf32> to vector<64x128xf32>
      %290 = arith.mulf %109, %289 : vector<64x128xf32>
      %291 = math.exp %290 : vector<64x128xf32>
      %292 = vector.extract_strided_slice %175 {offsets = [0, 7], sizes = [64, 1], strides = [1, 1]} : vector<128x8xf32> to vector<64x1xf32>
      %293 = vector.extract_strided_slice %175 {offsets = [64, 7], sizes = [64, 1], strides = [1, 1]} : vector<128x8xf32> to vector<64x1xf32>
      %294 = arith.mulf %291, %283 : vector<64x128xf32>
      %295 = vector.extract_strided_slice %172 {offsets = [7, 0], sizes = [1, 128], strides = [1, 1]} : vector<8x128xf32> to vector<1x128xf32>
      %296 = vector.broadcast %292 : vector<64x1xf32> to vector<64x128xf32>
      %297 = vector.broadcast %295 : vector<1x128xf32> to vector<64x128xf32>
      %298 = arith.mulf %296, %297 : vector<64x128xf32>
      %299 = arith.addf %294, %298 : vector<64x128xf32>
      %300 = vector.broadcast %293 : vector<64x1xf32> to vector<64x128xf32>
      %301 = arith.mulf %299, %300 : vector<64x128xf32>
      %cst_93 = arith.constant dense<0.000000e+00> : vector<128xf32>
      %302 = vector.multi_reduction <add>, %301, %cst_93 [0] : vector<64x128xf32> to vector<128xf32>
      %303 = vector.shape_cast %302 : vector<128xf32> to vector<1x128xf32>
      %304 = tpu.concatenate %191, %207, %223, %239, %255, %271, %287, %303 in 0 : vector<1x128xf32>, vector<1x128xf32>, vector<1x128xf32>, vector<1x128xf32>, vector<1x128xf32>, vector<1x128xf32>, vector<1x128xf32>, vector<1x128xf32> -> vector<8x128xf32>
      %305 = arith.index_cast %168 : i32 to index
      %c0_94 = arith.constant 0 : index
      %306 = vector.load %arg30[%305, %c0_94] : memref<16x128xf32, #tpu.memory_space<vmem>>, vector<8x128xf32>
      tpu.vector_store %arg30[%305, %c0_94], %304 {strides = array<i32>} : memref<16x128xf32, #tpu.memory_space<vmem>>, vector<8x128xf32>,
      scf.yield %299 : vector<64x128xf32>
    }
    %c2_i32_56 = arith.constant 2 : i32
    %c0_57 = arith.constant 0 : index
    %c0_58 = arith.constant 0 : index
    %117 = vector.load %arg30[%c0_57, %c0_58] : memref<16x128xf32, #tpu.memory_space<vmem>>, vector<16x128xf32>
    %c0_59 = arith.constant 0 : index
    %c0_60 = arith.constant 0 : index
    %c0_61 = arith.constant 0 : index
    %118 = vector.load %arg19[%c0_59, %c0_60, %c0_61] : memref<1x1x128xf32, #tpu.memory_space<vmem>>, vector<1x1x128xf32>
    %119 = vector.shape_cast %118 : vector<1x1x128xf32> to vector<1x128xf32>
    %120 = vector.broadcast %119 : vector<1x128xf32> to vector<16x128xf32>
    %121 = arith.mulf %120, %84 : vector<16x128xf32>
    %122 = arith.addf %117, %121 : vector<16x128xf32>
    %cst_62 = arith.constant 0.000000e+00 : f32
    %123 = vector.broadcast %cst_62 : f32 to vector<16x128xf32>
    %124 = arith.subf %123, %35 : vector<16x128xf32>
    %125 = math.exp %124 : vector<16x128xf32>
    %cst_63 = arith.constant 1.000000e+00 : f32
    %126 = vector.broadcast %cst_63 : f32 to vector<16x128xf32>
    %127 = arith.addf %126, %125 : vector<16x128xf32>
    %cst_64 = arith.constant 1.000000e+00 : f32
    %128 = vector.broadcast %cst_64 : f32 to vector<16x128xf32>
    %129 = arith.divf %128, %127 : vector<16x128xf32>
    %130 = arith.mulf %35, %129 : vector<16x128xf32>
    %131 = arith.mulf %122, %130 : vector<16x128xf32>
    %c0_65 = arith.constant 0 : index
    %c0_66 = arith.constant 0 : index
    %c0_67 = arith.constant 0 : index
    %132 = vector.load %arg20[%c0_65, %c0_66, %c0_67] : memref<1x128x64xbf16, #tpu.memory_space<vmem>>, vector<1x128x64xbf16>
    %133 = vector.shape_cast %132 : vector<1x128x64xbf16> to vector<128x64xbf16>
    %134 = arith.truncf %131 : vector<16x128xf32> to vector<16x128xbf16>
    %cst_68 = arith.constant dense<0.000000e+00> : vector<16x64xf32>
    %135 = tpu.matmul %134, %133, %cst_68 {dimension_numbers = #tpu.dot_dimension_numbers<[1], [0], [0], [1], [0, 0, 1, 1], [], []>} : vector<16x128xbf16>, vector<128x64xbf16>, vector<16x64xf32> -> vector<16x64xf32>
    %c0_69 = arith.constant 0 : index
    %c0_70 = arith.constant 0 : index
    %c0_71 = arith.constant 0 : index
    %136 = vector.load %arg21[%c0_69, %c0_70, %c0_71] : memref<1x1x64xf32, #tpu.memory_space<vmem>>, vector<1x1x64xf32>
    %137 = vector.shape_cast %136 : vector<1x1x64xf32> to vector<1x64xf32>
    %c0_72 = arith.constant 0 : index
    %c0_73 = arith.constant 0 : index
    %c0_74 = arith.constant 0 : index
    %138 = vector.load %arg22[%c0_72, %c0_73, %c0_74] : memref<1x1x64xf32, #tpu.memory_space<vmem>>, vector<1x1x64xf32>
    %139 = vector.shape_cast %138 : vector<1x1x64xf32> to vector<1x64xf32>
    %cst_75 = arith.constant dense<0.000000e+00> : vector<16xf32>
    %140 = vector.multi_reduction <add>, %135, %cst_75 [1] : vector<16x64xf32> to vector<16xf32>
    %141 = vector.shape_cast %140 : vector<16xf32> to vector<16x1xf32>
    %cst_76 = arith.constant 6.400000e+01 : f32
    %142 = vector.broadcast %cst_76 : f32 to vector<16x1xf32>
    %143 = arith.divf %141, %142 : vector<16x1xf32>
    %144 = vector.broadcast %143 : vector<16x1xf32> to vector<16x64xf32>
    %145 = arith.subf %135, %144 : vector<16x64xf32>
    %146 = arith.mulf %145, %145 : vector<16x64xf32>
    %cst_77 = arith.constant dense<0.000000e+00> : vector<16xf32>
    %147 = vector.multi_reduction <add>, %146, %cst_77 [1] : vector<16x64xf32> to vector<16xf32>
    %148 = vector.shape_cast %147 : vector<16xf32> to vector<16x1xf32>
    %cst_78 = arith.constant 6.400000e+01 : f32
    %149 = vector.broadcast %cst_78 : f32 to vector<16x1xf32>
    %150 = arith.divf %148, %149 : vector<16x1xf32>
    %151 = vector.broadcast %143 : vector<16x1xf32> to vector<16x64xf32>
    %152 = arith.subf %135, %151 : vector<16x64xf32>
    %cst_79 = arith.constant 9.99999974E-6 : f32
    %153 = vector.broadcast %cst_79 : f32 to vector<16x1xf32>
    %154 = arith.addf %150, %153 : vector<16x1xf32>
    %155 = math.rsqrt %154 : vector<16x1xf32>
    %156 = vector.broadcast %155 : vector<16x1xf32> to vector<16x64xf32>
    %157 = arith.mulf %152, %156 : vector<16x64xf32>
    %158 = vector.broadcast %137 : vector<1x64xf32> to vector<16x64xf32>
    %159 = arith.mulf %157, %158 : vector<16x64xf32>
    %160 = vector.broadcast %139 : vector<1x64xf32> to vector<16x64xf32>
    %161 = arith.addf %159, %160 : vector<16x64xf32>
    %162 = arith.addf %3, %161 : vector<16x64xf32>
    %c0_80 = arith.constant 0 : index
    %c0_81 = arith.constant 0 : index
    %163 = vector.load %arg26[%c0_80, %c0_81] : memref<16x64xf32, #tpu.memory_space<vmem>>, vector<16x64xf32>
    tpu.vector_store %arg26[%c0_80, %c0_81], %162 {strides = array<i32>} : memref<16x64xf32, #tpu.memory_space<vmem>>, vector<16x64xf32>,
    %c11_i32 = arith.constant 11 : i32
    %164 = arith.cmpi eq, %arg1, %c11_i32 : i32
    %165 = arith.extui %164 : i1 to i32
    %c0_i32_82 = arith.constant 0 : i32
    %166 = arith.cmpi ne, %165, %c0_i32_82 : i32
    scf.if %166 {
      %c0_83 = arith.constant 0 : index
      %c0_84 = arith.constant 0 : index
      %167 = vector.load %arg23[%c0_83, %c0_84] : memref<64x8xbf16, #tpu.memory_space<vmem>>, vector<64x8xbf16>
      %168 = arith.truncf %162 : vector<16x64xf32> to vector<16x64xbf16>
      %cst_85 = arith.constant dense<0.000000e+00> : vector<16x8xf32>
      %169 = tpu.matmul %168, %167, %cst_85 {dimension_numbers = #tpu.dot_dimension_numbers<[1], [0], [0], [1], [0, 0, 1, 1], [], []>} : vector<16x64xbf16>, vector<64x8xbf16>, vector<16x8xf32> -> vector<16x8xf32>
      %c0_86 = arith.constant 0 : index
      %c0_87 = arith.constant 0 : index
      %170 = vector.load %arg24[%c0_86, %c0_87] : memref<1x8xf32, #tpu.memory_space<vmem>>, vector<1x8xf32>
      %171 = vector.broadcast %170 : vector<1x8xf32> to vector<16x8xf32>
      %172 = arith.addf %169, %171 : vector<16x8xf32>
      %173 = tpu.iota {dimensions = array<i32: 1>} : vector<16x8xi32>
      %c0_i32_88 = arith.constant 0 : i32
      %174 = vector.broadcast %c0_i32_88 : i32 to vector<16x8xi32>
      %175 = arith.cmpi eq, %173, %174 : vector<16x8xi32>
      %cst_89 = arith.constant 0.000000e+00 : f32
      %176 = vector.broadcast %cst_89 : f32 to vector<16x8xf32>
      %177 = arith.subf %176, %172 : vector<16x8xf32>
      %178 = math.exp %177 : vector<16x8xf32>
      %cst_90 = arith.constant 1.000000e+00 : f32
      %179 = vector.broadcast %cst_90 : f32 to vector<16x8xf32>
      %180 = arith.addf %179, %178 : vector<16x8xf32>
      %cst_91 = arith.constant 1.000000e+00 : f32
      %181 = vector.broadcast %cst_91 : f32 to vector<16x8xf32>
      %182 = arith.divf %181, %180 : vector<16x8xf32>
      %183 = arith.select %175, %182, %172 : vector<16x8xi1>, vector<16x8xf32>
      %c0_92 = arith.constant 0 : index
      %c0_93 = arith.constant 0 : index
      %c0_94 = arith.constant 0 : index
      %184 = vector.load %arg25[%c0_92, %c0_93, %c0_94] : memref<1x16x8xf32, #tpu.memory_space<vmem>>, vector<1x16x8xf32>
      %185 = vector.shape_cast %184 : vector<1x16x8xf32> to vector<16x8xf32>
      %186 = vector.shape_cast %183 : vector<16x8xf32> to vector<1x16x8xf32>
      tpu.vector_store %arg25[%c0_92, %c0_93, %c0_94], %186 {strides = array<i32>} : memref<1x16x8xf32, #tpu.memory_space<vmem>>, vector<1x16x8xf32>,
    } else {
    }
    return
  }
  func.func @transform_0(%arg0: i32, %arg1: i32) -> (i32, i32, i32) {
    %c0_i32 = arith.constant 0 : i32
    %c0_i32_0 = arith.constant 0 : i32
    %c0_i32_1 = arith.constant 0 : i32
    return %arg0, %c0_i32, %c0_i32_0 : i32, i32, i32
  }
  func.func @transform_1(%arg0: i32, %arg1: i32) -> (i32, i32, i32) {
    %c0_i32 = arith.constant 0 : i32
    %c0_i32_0 = arith.constant 0 : i32
    %c0_i32_1 = arith.constant 0 : i32
    %c0_i32_2 = arith.constant 0 : i32
    return %c0_i32, %c0_i32_0, %c0_i32_1 : i32, i32, i32
  }
  func.func @transform_2(%arg0: i32, %arg1: i32) -> (i32, i32) {
    %c0_i32 = arith.constant 0 : i32
    %c0_i32_0 = arith.constant 0 : i32
    %c0_i32_1 = arith.constant 0 : i32
    return %c0_i32, %c0_i32_0 : i32, i32
  }
  func.func @transform_3(%arg0: i32, %arg1: i32) -> (i32, i32) {
    %c0_i32 = arith.constant 0 : i32
    %c0_i32_0 = arith.constant 0 : i32
    %c0_i32_1 = arith.constant 0 : i32
    return %c0_i32, %c0_i32_0 : i32, i32
  }
  func.func @transform_4(%arg0: i32, %arg1: i32) -> (i32, i32) {
    %c0_i32 = arith.constant 0 : i32
    %c0_i32_0 = arith.constant 0 : i32
    %c0_i32_1 = arith.constant 0 : i32
    return %c0_i32, %c0_i32_0 : i32, i32
  }
  func.func @transform_5(%arg0: i32, %arg1: i32) -> (i32, i32, i32) {
    %c0_i32 = arith.constant 0 : i32
    %c0_i32_0 = arith.constant 0 : i32
    %c0_i32_1 = arith.constant 0 : i32
    %c0_i32_2 = arith.constant 0 : i32
    return %c0_i32, %c0_i32_0, %c0_i32_1 : i32, i32, i32
  }
  func.func @transform_6(%arg0: i32, %arg1: i32) -> (i32, i32) {
    %c0_i32 = arith.constant 0 : i32
    %c0_i32_0 = arith.constant 0 : i32
    %c0_i32_1 = arith.constant 0 : i32
    return %c0_i32, %c0_i32_0 : i32, i32
  }
  func.func @transform_7(%arg0: i32, %arg1: i32) -> (i32, i32) {
    %c0_i32 = arith.constant 0 : i32
    %c0_i32_0 = arith.constant 0 : i32
    %c0_i32_1 = arith.constant 0 : i32
    return %c0_i32, %c0_i32_0 : i32, i32
  }
  func.func @transform_8(%arg0: i32, %arg1: i32) -> (i32, i32) {
    %c0_i32 = arith.constant 0 : i32
    %c0_i32_0 = arith.constant 0 : i32
    %c0_i32_1 = arith.constant 0 : i32
    return %c0_i32, %c0_i32_0 : i32, i32
  }
  func.func @transform_9(%arg0: i32, %arg1: i32) -> (i32, i32, i32) {
    %c0_i32 = arith.constant 0 : i32
    %c0_i32_0 = arith.constant 0 : i32
    %c0_i32_1 = arith.constant 0 : i32
    return %arg1, %c0_i32, %c0_i32_0 : i32, i32, i32
  }
  func.func @transform_10(%arg0: i32, %arg1: i32) -> (i32, i32, i32) {
    %c0_i32 = arith.constant 0 : i32
    %c0_i32_0 = arith.constant 0 : i32
    %c0_i32_1 = arith.constant 0 : i32
    return %arg1, %c0_i32, %c0_i32_0 : i32, i32, i32
  }
  func.func @transform_11(%arg0: i32, %arg1: i32) -> (i32, i32, i32) {
    %c0_i32 = arith.constant 0 : i32
    %c0_i32_0 = arith.constant 0 : i32
    %c0_i32_1 = arith.constant 0 : i32
    return %arg1, %c0_i32, %c0_i32_0 : i32, i32, i32
  }
  func.func @transform_12(%arg0: i32, %arg1: i32) -> (i32, i32, i32) {
    %c0_i32 = arith.constant 0 : i32
    %c0_i32_0 = arith.constant 0 : i32
    %c0_i32_1 = arith.constant 0 : i32
    return %arg1, %c0_i32, %c0_i32_0 : i32, i32, i32
  }
  func.func @transform_13(%arg0: i32, %arg1: i32) -> (i32, i32, i32) {
    %c0_i32 = arith.constant 0 : i32
    %c0_i32_0 = arith.constant 0 : i32
    %c0_i32_1 = arith.constant 0 : i32
    return %arg1, %c0_i32, %c0_i32_0 : i32, i32, i32
  }
  func.func @transform_14(%arg0: i32, %arg1: i32) -> (i32, i32, i32) {
    %c0_i32 = arith.constant 0 : i32
    %c0_i32_0 = arith.constant 0 : i32
    %c0_i32_1 = arith.constant 0 : i32
    return %arg1, %c0_i32, %c0_i32_0 : i32, i32, i32
  }
  func.func @transform_15(%arg0: i32, %arg1: i32) -> (i32, i32, i32) {
    %c0_i32 = arith.constant 0 : i32
    %c0_i32_0 = arith.constant 0 : i32
    %c0_i32_1 = arith.constant 0 : i32
    return %arg1, %c0_i32, %c0_i32_0 : i32, i32, i32
  }
  func.func @transform_16(%arg0: i32, %arg1: i32) -> (i32, i32, i32) {
    %c0_i32 = arith.constant 0 : i32
    %c0_i32_0 = arith.constant 0 : i32
    %c0_i32_1 = arith.constant 0 : i32
    return %arg1, %c0_i32, %c0_i32_0 : i32, i32, i32
  }
  func.func @transform_17(%arg0: i32, %arg1: i32) -> (i32, i32, i32) {
    %c0_i32 = arith.constant 0 : i32
    %c0_i32_0 = arith.constant 0 : i32
    %c0_i32_1 = arith.constant 0 : i32
    return %arg1, %c0_i32, %c0_i32_0 : i32, i32, i32
  }
  func.func @transform_18(%arg0: i32, %arg1: i32) -> (i32, i32, i32) {
    %c0_i32 = arith.constant 0 : i32
    %c0_i32_0 = arith.constant 0 : i32
    %c0_i32_1 = arith.constant 0 : i32
    return %arg1, %c0_i32, %c0_i32_0 : i32, i32, i32
  }
  func.func @transform_19(%arg0: i32, %arg1: i32) -> (i32, i32, i32) {
    %c0_i32 = arith.constant 0 : i32
    %c0_i32_0 = arith.constant 0 : i32
    %c0_i32_1 = arith.constant 0 : i32
    return %arg1, %c0_i32, %c0_i32_0 : i32, i32, i32
  }
  func.func @transform_20(%arg0: i32, %arg1: i32) -> (i32, i32, i32) {
    %c0_i32 = arith.constant 0 : i32
    %c0_i32_0 = arith.constant 0 : i32
    %c0_i32_1 = arith.constant 0 : i32
    return %arg1, %c0_i32, %c0_i32_0 : i32, i32, i32
  }
  func.func @transform_21(%arg0: i32, %arg1: i32) -> (i32, i32) {
    %c0_i32 = arith.constant 0 : i32
    %c0_i32_0 = arith.constant 0 : i32
    %c0_i32_1 = arith.constant 0 : i32
    return %c0_i32, %c0_i32_0 : i32, i32
  }
  func.func @transform_22(%arg0: i32, %arg1: i32) -> (i32, i32) {
    %c0_i32 = arith.constant 0 : i32
    %c0_i32_0 = arith.constant 0 : i32
    %c0_i32_1 = arith.constant 0 : i32
    return %c0_i32, %c0_i32_0 : i32, i32
  }
  func.func @transform_23(%arg0: i32, %arg1: i32) -> (i32, i32, i32) {
    %c0_i32 = arith.constant 0 : i32
    %c0_i32_0 = arith.constant 0 : i32
    %c0_i32_1 = arith.constant 0 : i32
    return %arg0, %c0_i32, %c0_i32_0 : i32, i32, i32
  }
}

</mosaic_0001>

<bundles_post_ra>
// kernel: net_mamba_forward.1
= control target key start
LH: loop header
LB: loop body
LE: loop exit
PB: predicated region body
PF: predicated region fallthrough
CT: control target
= control target key end

     0   :  { %s6212_s0 = inlined_call_operand.vmem [shape: f32[2,16,10], index: 0, kind: input, shape index: {}]   ;;  %s6213_s1 = inlined_call_operand.vmem [shape: bf16[3,10,64], index: 1, kind: input, shape index: {}]   ;;  %s6214_s2 = inlined_call_operand.vmem [shape: f32[1,64], index: 2, kind: input, shape index: {}]   ;;  %s6215_s3 = inlined_call_operand.vmem [shape: f32[1,64], index: 3, kind: input, shape index: {}]   ;;  %s6216_s4 = inlined_call_operand.vmem [shape: f32[1,64], index: 4, kind: input, shape index: {}]   ;;  %s6217_s5 = inlined_call_operand.vmem [shape: bf16[3,64,64], index: 5, kind: input, shape index: {}]   ;;  %s6218_s6 = inlined_call_operand.vmem [shape: f32[1,64], index: 6, kind: input, shape index: {}]   ;;  %s6219_s7 = inlined_call_operand.vmem [shape: f32[1,64], index: 7, kind: input, shape index: {}]   ;;  %s6220_s8 = inlined_call_operand.vmem [shape: f32[1,64], index: 8, kind: input, shape index: {}]   ;;  %s6221_s9 = inlined_call_operand.vmem [shape: f32[12,1,64], index: 9, kind: input, shape index: {}]   ;;  %s6222_s10 = inlined_call_operand.vmem [shape: f32[12,1,64], index: 10, kind: input, shape index: {}]   ;;  %s6223_s11 = inlined_call_operand.vmem [shape: bf16[12,64,256], index: 11, kind: input, shape index: {}]   ;;  %s6224_s12 = inlined_call_operand.vmem [shape: f32[12,4,128], index: 12, kind: input, shape index: {}]   ;;  %s6225_s13 = inlined_call_operand.vmem [shape: f32[12,1,128], index: 13, kind: input, shape index: {}]   ;;  %s6226_s14 = inlined_call_operand.hbm [shape: bf16[12,128,256], index: 14, kind: input, shape index: {}]   ;;  %s6227_s15 = inlined_call_operand.vmem [shape: f32[12,1,128], index: 15, kind: input, shape index: {}]   ;;  %s6228_s16 = inlined_call_operand.hbm [shape: f32[12,64,128], index: 16, kind: input, shape index: {}]   ;;  %s6229_s17 = inlined_call_operand.vmem [shape: f32[12,1,128], index: 17, kind: input, shape index: {}]   ;;  %s6230_s18 = inlined_call_operand.vmem [shape: bf16[12,128,64], index: 18, kind: input, shape index: {}]   ;;  %s6231_s19 = inlined_call_operand.vmem [shape: f32[12,1,64], index: 19, kind: input, shape index: {}]   ;;  %s6232_s20 = inlined_call_operand.vmem [shape: f32[12,1,64], index: 20, kind: input, shape index: {}]   ;;  %s6233_s21 = inlined_call_operand.vmem [shape: bf16[64,8], index: 21, kind: input, shape index: {}]   ;;  %s6234_s22 = inlined_call_operand.vmem [shape: f32[1,8], index: 22, kind: input, shape index: {}]   ;;  %s6235_s23 = inlined_call_operand.vmem [shape: f32[2,16,8], index: 23, kind: output, shape index: {}]  }
   0x1   :  { %6299 = sst [smem:[#allocation53_spill]] %s6212_s0 }
   0x2   :  { %6300 = sst [smem:[#allocation54_spill]] %s6213_s1 }
   0x3   :  { %6301 = sst [smem:[#allocation55_spill]] %s6214_s2 }
   0x4   :  { %6302 = sst [smem:[#allocation56_spill]] %s6215_s3 }
   0x5   :  { %6303 = sst [smem:[#allocation57_spill]] %s6216_s4 }
   0x6   :  { %6304 = sst [smem:[#allocation58_spill]] %s6217_s5 }
   0x7   :  { %6305 = sst [smem:[#allocation59_spill]] %s6218_s6 }
   0x8   :  { %6306 = sst [smem:[#allocation60_spill]] %s6219_s7 }
   0x9   :  { %6307 = sst [smem:[#allocation61_spill]] %s6220_s8 }
   0xa   :  { %6308 = sst [smem:[#allocation62_spill]] %s6223_s11 }
   0xb   :  { %6309 = sst [smem:[#allocation63_spill]] %s6224_s12 }
   0xc   :  { %6310 = sst [smem:[#allocation64_spill]] %s6225_s13 }
   0xd   :  { %6311 = sst [smem:[#allocation65_spill]] %s6226_s14 }
   0xe   :  { %6312 = sst [smem:[#allocation66_spill]] %s6228_s16 }
   0xf   :  { %6313 = sst [smem:[#allocation67_spill]] %s6232_s20 }
  0x10   :  { %6314 = sst [smem:[#allocation68_spill]] %s6233_s21 }
  0x11   :  { %6315 = sst [smem:[#allocation69_spill]] %s6234_s22 }
  0x12   :  { %6316 = sst [smem:[#allocation70_spill]] %s6235_s23 }
  0x13   :  { %28 = vsyncpa [#allocation8], 0 }
  0x14   :  { %30 = vsyncpa [#allocation8 + $0x1], 0 }
  0x15   :  { %31 = vsyncpa [#allocation10], 0 }
  0x16   :  { %33 = vsyncpa [#allocation10 + $0x1], 0  ;;  %s4713_s4 = smov 0   ;;  %s4715_s30 = smov 0  }
  0x17   :  { %s4717_s24 = smov 0   ;;  %s4719_s25 = smov 0  }
  0x18   :  { %s4721_s5 = smov 0   ;;  %s4723_s1 = smov 0  }
  0x19   :  { %s4725_s26 = smov 0   ;;  %s4727_s2 = smov 0  }
  0x1a LB: > { %6317 = sst [smem:[#allocation13_spill]] %s4512_s30  ;;  %s3653_s6 = sadd.s32 4294967295, %s4536_s2   ;;  %s4536_s2 = sphi %s4727_s2, %s39_s2   ;;  %s4532_s26 = sphi %s4725_s26, %s6447_s26   ;;  %s4528_s1 = sphi %s4723_s1, %s6446_s1   ;;  %s4524_s5 = sphi %s4721_s5, %s6445_s5   ;;  %s4520_s25 = sphi %s4719_s25, %s6444_s25   ;;  %s4516_s24 = sphi %s4717_s24, %s6443_s24   ;;  %s4512_s30 = sphi %s4715_s30, %s6442_s30   ;;  %s4508_s4 = sphi %s4713_s4, %s6441_s4  }
  0x1b   : > { %6318 = sst [smem:[#allocation14_spill]] %s4516_s24  ;;  %s48_s27 = sadd.s32 1, %s4528_s1 }
  0x1c   : > { %6319 = sst [smem:[#allocation15_spill]] %s4528_s1  ;;  %p49_p0 = scmp.ge.s32.totalorder %s48_s27, 12 }
  0x1d   : > { %6320 = sst [smem:[#allocation16_spill]] %s4532_s26  ;;  %s51_s7 = sadd.s32 1, %s4532_s26 }
  0x1e   : > { %6321 = sst [smem:[#allocation17_spill]] %s4536_s2  ;;  %s382_s28 = sadd.s32 1, %s4516_s24 }
  0x1f   : > { %p389_p1 = scmp.ne.s32.totalorder %s4516_s24, %s4512_s30  ;;  %s6449_s27 = smov (%p49_p0, %s48_s27), 0 }
  0x20   : > { %6322 = sst [smem:[#allocation18_spill]] %s6449_s27  ;;  %s6451_s7 = smov (!%p49_p0, %s51_s7), %s4532_s26 }
  0x21   : > { %s379_s29 = ssub.s32 %s4528_s1, %s6449_s27  ;;  %p390_p2 = scmp.eq.s32.totalorder %s4536_s2, 0 }
  0x22   : > { %p53_p3 = scmp.ge.s32.totalorder %s6451_s7, 2  ;;  %p380_p4 = scmp.eq.s32.totalorder %s379_s29, 0 }
  0x23   : > { %p4763_p5 = por %p390_p2, %p389_p1  ;;  %p395_p6 = scmp.ne.s32.totalorder %s4512_s30, %s4508_s4 }
  0x24   : > { %s6453_s7 = smov (%p53_p3, %s6451_s7), 0  ;;  %p396_p7 = scmp.eq.s32.totalorder %s3653_s6, 0 }
  0x25   : > { %6324 = sst [smem:[#allocation19_spill]] %s6453_s7  ;;  %p3911_p8 = scmp.lt.s32.totalorder %s4536_s2, 24 }
  0x26   : > { %s4771_s0 = scalar_select %p380_p4, %s4516_s24, %s382_s28  }
  0x27   : > { %s4775_s22 = sand.u32 1, %s4516_s24   ;;  %p4777_p9 = por %p396_p7, %p395_p6 }
  0x28   : > { %6325 = sst [smem:[#allocation20_spill]] %s4771_s0  ;;  %s3657_s29 = sshll.u32 %s4775_s22, 7 }
  0x29   : > { %s6326_s27 = scalar_select %p4777_p9, 1, 0 }
  0x2a   : > { %s3773_s26 = sshll.u32 %s4528_s1, 11  ;;  %s6327_s14 = sld [smem:[#allocation65_spill]] }
  0x2b   : > { %s718_s6 = scalar_lea.vmem [#allocation7], %s3657_s29  ;;  %p4790_p10 = pnand %p3911_p8, %p4763_p5 }
  0x2c   : > { %s725_s28 = sshll.u32 %s718_s6, 4  ;;  %s715_s0 = scalar_lea.sflag [#allocation8], %s4775_s22  ;;  %s4794_s28 = int_to_ptr.vmem [resolvable:$true] %s725_s28 }
  0x2d   : > { %p4372_p12 = pneg %p4790_p10 }
  0x30   : > { %s4786_s4 = scalar_lea.hbm %s6327_s14, %s3773_s26  ;;  %s4375_s26 = scalar_lea.hbm %s6327_s14, 24576 }
  0x31   : > { %s4370_s24 = scalar_lea.hbm %s4786_s4, 2048  ;;  %p4376_p1 = scmp.lt.u32.totalorder %s4786_s4, %s6327_s14 }
  0x32   : > { %p4371_p11 = scmp.ne.s32.totalorder %s4786_s4, %s4370_s24  ;;  %p4377_p2 = scmp.lt.u32.totalorder %s4375_s26, %s4370_s24 }
  0x33   : > { %p4379_p4 = scmp.lt.u32.totalorder %s4370_s24, %s4786_s4 }
  0x34   : > { %p4373_p13 = pnand %p4372_p12, %p4371_p11  ;;  %p4378_p3 = por %p4377_p2, %p4376_p1 }
  0x36   : > { %p4374_p0 = pneg %p4373_p13  ;;  %p4380_p5 = por %p4379_p4, %p4378_p3 }
  0x38   : > { %p4381_p6 = pnand %p4380_p5, %p4374_p0 }
  0x3a   : > { %4384 = shalt.err (!%p4381_p6)
}
  0x3b   : > { %s4385_s6 = scalar_lea.vmem %s4794_s28, 2048  ;;  %s4574_s8 = smov [#allocation7]  }
  0x3c   : > { %p4386_p7 = scmp.ne.s32.totalorder %s4794_s28, %s4385_s6  ;;  %s4390_s21 = sshll.u32 %s4574_s8, 4  ;;  %s4391_s21 = int_to_ptr.vmem [resolvable:$false] %s4390_s21 }
  0x3d   : > { %s4392_s3 = scalar_lea.vmem %s4391_s21, 4096  ;;  %p4393_p13 = scmp.lt.s32.totalorder %s4794_s28, %s4391_s21 }
  0x3e   : > { %p4388_p8 = pnand %p4386_p7, %p4372_p12  ;;  %p4394_p1 = scmp.lt.s32.totalorder %s4392_s3, %s4385_s6 }
  0x40   : > { %p4389_p11 = pneg %p4388_p8  ;;  %p4395_p2 = por %p4394_p1, %p4393_p13 }
  0x42   : > { %p4396_p3 = pnand %p4395_p2, %p4389_p11 }
  0x44   : > { %4399 = shalt.err (!%p4396_p3)
}
  0x45   : > { %s4575_s24 = smov 128   ;;  %s4576_s26 = smov 8  }
  0x46   : > { %3907 = dma.hbm_to_vmem [thread:$0]  (!%p4790_p10), %s4786_s4, 2048, %s4794_s28, %s715_s0, %s4575_s24, %s4575_s24, %s4576_s26  }
  0x47   : > { %p3663_p0 = scmp.ge.s32.totalorder %s4536_s2, 1  ;;  %p786_p4 = scmp.lt.s32.totalorder %s4536_s2, 25 }
  0x48   : > { %s3660_s29 = sshll.u32 %s4775_s22, 6  ;;  %s3774_s8 = sshll.u32 %s4528_s1, 10 }
  0x49   : > { %p4830_p5 = pnand %p3663_p0, %p786_p4  ;;  %s745_s21 = scalar_lea.vmem [#allocation9], %s3660_s29 }
  0x4a   : > { %s752_s3 = sshll.u32 %s745_s21, 4  ;;  %s6330_s16 = sld [smem:[#allocation66_spill]]  ;;  %s4840_s3 = int_to_ptr.vmem [resolvable:$true] %s752_s3 }
  0x4b   : > { %s742_s0 = scalar_lea.sflag [#allocation10], %s4775_s22 }
  0x50   : > { %s4838_s20 = scalar_lea.hbm %s6330_s16, %s3774_s8  ;;  %s4405_s21 = scalar_lea.hbm %s6330_s16, 12288 }
  0x51   : > { %s4400_s4 = scalar_lea.hbm %s4838_s20, 1024  ;;  %p4406_p11 = scmp.lt.u32.totalorder %s4838_s20, %s6330_s16 }
  0x52   : > { %p4401_p6 = scmp.ne.s32.totalorder %s4838_s20, %s4400_s4  ;;  %p4407_p13 = scmp.lt.u32.totalorder %s4405_s21, %s4400_s4 }
  0x53   : > { %p4409_p2 = scmp.lt.u32.totalorder %s4400_s4, %s4838_s20 }
  0x54   : > { %p4403_p7 = pnand %p4401_p6, %p4372_p12  ;;  %p4408_p1 = por %p4407_p13, %p4406_p11 }
  0x56   : > { %p4404_p8 = pneg %p4403_p7  ;;  %p4410_p3 = por %p4409_p2, %p4408_p1 }
  0x58   : > { %p4411_p0 = pnand %p4410_p3, %p4404_p8 }
  0x5a   : > { %4414 = shalt.err (!%p4411_p0)
}
  0x5b   : > { %s4415_s8 = scalar_lea.vmem %s4840_s3, 1024  ;;  %s4577_s28 = smov [#allocation9]  }
  0x5c   : > { %p4416_p4 = scmp.ne.s32.totalorder %s4840_s3, %s4415_s8  ;;  %s4420_s29 = sshll.u32 %s4577_s28, 4  ;;  %s4421_s29 = int_to_ptr.vmem [resolvable:$false] %s4420_s29 }
  0x5d   : > { %s4422_s14 = scalar_lea.vmem %s4421_s29, 2048  ;;  %p4423_p9 = scmp.lt.s32.totalorder %s4840_s3, %s4421_s29 }
  0x5e   : > { %p4418_p6 = pnand %p4416_p4, %p4372_p12  ;;  %p4424_p11 = scmp.lt.s32.totalorder %s4422_s14, %s4415_s8 }
  0x60   : > { %p4419_p7 = pneg %p4418_p6  ;;  %p4425_p13 = por %p4424_p11, %p4423_p9 }
  0x62   : > { %p4426_p1 = pnand %p4425_p13, %p4419_p7 }
  0x64   : > { %4429 = shalt.err (!%p4426_p1)
}
  0x65   : > { %3910 = dma.hbm_to_vmem [thread:$0]  (!%p4790_p10), %s4838_s20, 1024, %s4840_s3, %s742_s0, %s4575_s24, %s4575_s24, %s4576_s26  }
  0x66   : > { %790 = sbr.rel (%p4830_p5) target bundleno = 2908 (0xb5c), region = 112 }
  0x6d   : > { %s792_s4 = sand.u32 1, %s4512_s30   ;;  %p6331_p9 = scmp.ne.s32.totalorder %s6326_s27, 0 }
  0x6e   : > { %s3664_s21 = sshll.u32 %s792_s4, 7  ;;  %s793_s23 = scalar_lea.sflag [#allocation8], %s792_s4 }
  0x6f   : > { %s4874_s8 = scalar_lea.vmem [#allocation7], %s3664_s21 }
  0x70   : > { %4499 = dma.done.wait (%p6331_p9), %s793_s23, 2048  }
  0x71   : > { %4501 = vsyncadd (%p6331_p9), %s793_s23, 4294965248  ;;  %s3665_s22 = sshll.u32 %s792_s4, 6  ;;  %s802_s7 = scalar_lea.sflag [#allocation10], %s792_s4 }
  0x72   : > { %s4880_s28 = scalar_lea.vmem [#allocation9], %s3665_s22 }
  0x73   : > { %6332 = sst [smem:[#allocation21_spill]] %s4880_s28 }
  0x74   : > { %4503 = dma.done.wait (%p6331_p9), %s802_s7, 1024  }
  0x75   : > { %4505 = vsyncadd (%p6331_p9), %s802_s7, 4294966272  ;;  %p913_p10 = scmp.lt.s32.totalorder %s4524_s5, 1  ;;  %p918_p12 = scmp.lt.s32.totalorder %s4520_s25, 11 }
  0x76   : > { %s6333_s6 = sld [smem:[#allocation53_spill]]  ;;  %s6334_s11 = sld [smem:[#allocation62_spill]] }
  0x77   : > { %s6455_s5 = smov (!%p913_p10, %s4524_s5), 1  ;;  %s6335_s12 = sld [smem:[#allocation63_spill]] }
  0x78   : > { %s4890_s20 = scalar_select %p918_p12, %s4520_s25, 11 }
  0x79   : > { %s3775_s27 = sshll.u32 %s6455_s5, 4  ;;  %s6338_s29 = sld [smem:[#allocation70_spill]] }
  0x7a   : > { %s3776_s22 = sshll.u32 %s4890_s20, 6  ;;  %s3670_s30 = sshll.u32 %s4890_s20, 2 }
  0x7b   : > { %s941_s16 = scalar_lea.vmem %s6229_s17, %s4890_s20  ;;  %s4930_s28 = scalar_lea.vmem %s6230_s18, %s3776_s22 }
  0x7c   : > { %s917_s3 = scalar_lea.vmem %s6333_s6, %s3775_s27  ;;  %s4907_s1 = scalar_lea.vmem %s6334_s11, %s3776_s22 }
  0x7d   : > { %s4913_s24 = scalar_lea.vmem %s6335_s12, %s3670_s30  ;;  %s949_s5 = scalar_lea.vmem %s6231_s19, %s4890_s20 }
  0x7e   : > { %s6337_s6 = sld [smem:[#allocation67_spill]]  ;;  %p3675_p5 = scmp.ne.s32.totalorder %s4520_s25, 0 }
  0x7f   : > { %s4943_s4 = scalar_lea.vmem %s6338_s29, %s3775_s27  ;;  %vm993_vm0 = vcmask (!%p3675_p5), 1044480   ;;  %v967_v0 = vlaneseq (!%p3675_p5)  ;;  %v4578_v1 = vmov (!%p3675_p5), 0.0   ;;  %s6339_s22 = sld [smem:[#allocation54_spill]] (!%p3675_p5)  ;;  %v963_v3 = vld [vmem:[%s917_s3] sm:$0xff] (!%p3675_p5)  ;;  %vm4579_vm1 = vmmov (!%p3675_p5), 0   ;;  %v964_v5 = vld [vmem:[%s917_s3 + $0x8] sm:$0xff] (!%p3675_p5) }
  0x80   : > { %962 = sbr.rel (%p3675_p5) target bundleno = 613 (0x265), region = 124  ;;  %3814 = vmatprep.subr.bf16.mxu0 (!%p3675_p5), %v4578_v1  ;;  %3820 = vmatprep.subr.bf16.mxu1 (!%p3675_p5), %v4578_v1  ;;  %v965_v6 = vrot.slane (!%p3675_p5), %v963_v3, 7  ;;  %v966_v8 = vrot.slane (!%p3675_p5), %v964_v5, 7  ;;  %v983_v9 = vpack.c.bf16 (!%p3675_p5), %v964_v5, %v963_v3  ;;  %vm989_vm2 = vcmask (!%p3675_p5), 80896   ;;  %s6340_s2 = sld [smem:[#allocation58_spill]] (!%p3675_p5) }
  0x81   : > { %3816 = vmatprep.mubr.msk.bf16.mxu0 (!%p3675_p5), %vm4579_vm1, %v4578_v1  ;;  %3822 = vmatprep.mubr.msk.bf16.mxu1 (!%p3675_p5), %vm4579_vm1, %v4578_v1  ;;  %v1090_v11 = vrot.slane (!%p3675_p5), %v963_v3, 1  ;;  %v1091_v12 = vrot.slane (!%p3675_p5), %v964_v5, 1  ;;  %v4960_v13 = vshrl.u32 (!%p3675_p5), %v967_v0, 7  ;;  %s6342_s29 = sld [smem:[#allocation55_spill]] (!%p3675_p5)  ;;  %s6343_s12 = sld [smem:[#allocation56_spill]] (!%p3675_p5)  ;;  %vm1235_vm7 = vcmask (!%p3675_p5), 523264  }
  0x82   : > { %s6344_s3 = sld [smem:[#allocation57_spill]] (!%p3675_p5)  ;;  %s6345_s13 = sld [smem:[#allocation59_spill]] (!%p3675_p5) }
  0x83   : > { %vm969_vm3 = vcmp.lt.s32.totalorder (!%p3675_p5), %v4960_v13, 1  ;;  %vm973_vm4 = vcmp.ge.s32.totalorder (!%p3675_p5), %v4960_v13, 1  ;;  %v4969_v15 = vadd.s32 (!%p3675_p5), 8, %v4960_v13  ;;  %vm1092_vm5 = vcmp.lt.s32.totalorder (!%p3675_p5), %v4960_v13, 7  ;;  %s6346_s21 = sld [smem:[#allocation60_spill]] (!%p3675_p5)  ;;  %s6347_s30 = sld [smem:[#allocation61_spill]] (!%p3675_p5) }
  0x84   : > { %s952_s0 = scalar_lea.vmem %s6337_s6, %s4890_s20  ;;  %v970_v17 = vsel (!%p3675_p5), %vm969_vm3, %v965_v6, %v966_v8  ;;  %v971_v18 = vsel (!%p3675_p5), %vm969_vm3, %v966_v8, %v965_v6  ;;  %v1093_v20 = vsel (!%p3675_p5), %vm1092_vm5, %v1090_v11, %v1091_v12  ;;  %v1094_v21 = vsel (!%p3675_p5), %vm1092_vm5, %v1091_v12, %v1090_v11 }
  0x85   : > { %v4066_v2 = vld [vmem:[%s6339_s22 + $0x8] sm:$0x1f] (!%p3675_p5)   ;;  %v4067_v4 = vld [vmem:[%s6339_s22] sm:$0x1f] (!%p3675_p5)   ;;  %v4068_v14 = vld [vmem:[%s6339_s22 + $0x10] sm:$0x1f] (!%p3675_p5)  }
  0x86   : > { %v995_v7 = vsel (!%p3675_p5), %vm993_vm0, %v4066_v2, 0  ;;  %v1047_v10 = vsel (!%p3675_p5), %vm993_vm0, %v4067_v4, 0  ;;  %v1112_v16 = vsel (!%p3675_p5), %vm993_vm0, %v4068_v14, 0  ;;  %v975_v19 = vsel (!%p3675_p5), %vm973_vm4, %v971_v18, 0.0  ;;  %s6341_s6 = smov (!%p3675_p5), %s6340_s2  ;;  %v4069_v25 = vld [vmem:[%s6340_s2 + $0x20] sm:$0xff] (!%p3675_p5)  }
  0x87   : > { %3815 = vmatpush3.bf16.msra.mxu0 %v995_v7  ;;  %3821 = vmatpush3.bf16.msra.mxu1 %v1047_v10  ;;  %vm1096_vm6 = vcmp.lt.s32.totalorder %v4969_v15, 15  ;;  %v979_v22 = vpack.c.bf16 %v970_v17, %v975_v19  ;;  %v4070_v26 = vld [vmem:[%s6341_s6 + $0x28] sm:$0xff]   ;;  %v4071_v27 = vld [vmem:[%s6341_s6] sm:$0xff]   ;;  %v4072_v28 = vld [vmem:[%s6341_s6 + $0x30] sm:$0xff]  }
  0x88   : > { %3826 = vmatprep.subr.bf16.mxu0 %v4578_v1  ;;  %3832 = vmatprep.subr.bf16.mxu1 %v4578_v1  ;;  %v1098_v23 = vsel %vm1096_vm6, %v1094_v21, 0.0  ;;  %v4073_v29 = vld [vmem:[%s6341_s6 + $0x8] sm:$0xff]   ;;  %v4074_v30 = vld [vmem:[%s6341_s6 + $0x38] sm:$0xff]   ;;  %v4075_v31 = vld [vmem:[%s6341_s6 + $0x10] sm:$0xff]  }
  0x89   : > { %v1102_v24 = vpack.c.bf16 %v1098_v23, %v1093_v20  ;;  %v4077_v32 = vld [vmem:[%s6341_s6 + $0x18] sm:$0xff]   ;;  %v3686_v44 = vld [vmem:[%s6342_s29] ss:$0 sm:$0xff]  ;;  %v4078_v8 = vld [vmem:[%s6341_s6 + $0x48] sm:$0xff]  }
  0x8a   : > { %3817 = vmatmul.mubr.msk.bf16.vlgmr.msra.gmra.mrb[0].mxu0 %vm989_vm2, %v983_v9  ;;  %3823 = vmatmul.mubr.msk.bf16.vlgmr.msra.gmra.mrb[0].mxu1 %vm989_vm2, %v979_v22  ;;  %v3687_v47 = vld [vmem:[%s6343_s12] ss:$0 sm:$0xff]  ;;  %v4079_v12 = vld [vmem:[%s6341_s6 + $0x50] sm:$0xff]   ;;  %v4080_v13 = vld [vmem:[%s6341_s6 + $0x58] sm:$0xff]  }
  0x8b   : > { %3827 = vmatpush3.bf16.msra.mxu0 %v1112_v16  ;;  %3828 = vmatprep.mubr.msk.bf16.mxu0 %vm4579_vm1, %v4578_v1  ;;  %v3688_v52 = vld [vmem:[%s6344_s3] ss:$0 sm:$0xff] }
  0x8c   : > { %3844 = vmatprep.subr.bf16.mxu0 %v4578_v1  ;;  %3840 = vmatprep.mubr.msk.bf16.mxu1 %vm4579_vm1, %v4578_v1  ;;  %v4076_v61 = vld [vmem:[%s6341_s6 + $0x40] sm:$0xff]  }
  0x8d   : > { %3833 = vmatpush3.bf16.msra.mxu1 %v4069_v25  ;;  %v3720_v25 = vld [vmem:[%s6345_s13] ss:$0 sm:$0xff] }
  0x8e   : > { %3834 = vmatprep.subr.bf16.mxu1 %v4578_v1 }
  0x91   : > { %3835 = vmatpush3.bf16.msra.mxu1 %v4070_v26 }
  0x92   : > { %3829 = vmatmul.mubr.msk.bf16.vlgmr.msra.gmra.mrb[4].mxu0 %vm989_vm2, %v1102_v24  ;;  %3836 = vmatprep.subr.bf16.mxu1 %v4578_v1 }
  0x93   : > { %3852 = vmatprep.mubr.msk.bf16.mxu0 %vm4579_vm1, %v4578_v1  ;;  %3845 = vmatpush3.bf16.msra.mxu0 %v4071_v27  ;;  %v3721_v27 = vld [vmem:[%s6346_s21] ss:$0 sm:$0xff] }
  0x94   : > { %3846 = vmatprep.subr.bf16.mxu0 %v4578_v1 }
  0x95   : > { %3837 = vmatpush3.bf16.msra.mxu1 %v4072_v28 }
  0x96   : > { %3838 = vmatprep.subr.bf16.mxu1 %v4578_v1 }
  0x97   : > { %3847 = vmatpush3.bf16.msra.mxu0 %v4073_v29 }
  0x98   : > { %3848 = vmatprep.subr.bf16.mxu0 %v4578_v1 }
  0x99   : > { %3839 = vmatpush3.bf16.msra.mxu1 %v4074_v30 }
  0x9a   : > { %3856 = vmatprep.subr.bf16.mxu1 %v4578_v1 }
  0x9b   : > { %3849 = vmatpush3.bf16.msra.mxu0 %v4075_v31 }
  0x9c   : > { %3850 = vmatprep.subr.bf16.mxu0 %v4578_v1 }
  0x9f   : > { %3851 = vmatpush3.bf16.msra.mxu0 %v4077_v32  ;;  %v3722_v32 = vld [vmem:[%s6347_s30] ss:$0 sm:$0xff] }
 0x15d   : > { %v1031_v33 = vpop.f32.mrb[0].mxu0  ;;  %v1083_v37 = vpop.f32.mrb[0].mxu1 }
 0x15e   : > { %v3818_v34 = vpop.f32.mrb[1].mxu0  ;;  %v1084_v38 = vadd.f32 %v1083_v37, %v1031_v33  ;;  %v3824_v39 = vpop.f32.mrb[1].mxu1 }
 0x15f   : > { %v1034_v35 = vpop.f32.mrb[2].mxu0  ;;  %v1086_v40 = vpop.f32.mrb[2].mxu1 }
 0x160   : > { %v3819_v36 = vpop.f32.mrb[3].mxu0  ;;  %v1087_v41 = vadd.f32 %v1086_v40, %v1034_v35  ;;  %v3825_v42 = vpop.f32.mrb[3].mxu1 }
 0x165   : > { %v1148_v43 = vpop.f32.mrb[4].mxu0 }
 0x166   : > { %v1155_v45 = vadd.f32 %v1148_v43, %v1084_v38  ;;  %v3830_v46 = vpop.f32.mrb[5].mxu0 }
 0x167   : > { %v1151_v48 = vpop.f32.mrb[6].mxu0 }
 0x168   : > { %v1164_v49 = vadd.f32 %v3686_v44, %v1155_v45  ;;  %v1156_v50 = vadd.f32 %v1151_v48, %v1087_v41  ;;  %v3831_v51 = vpop.f32.mrb[7].mxu0 }
 0x16a   : > { %v1173_v53 = vmul.f32 %v3687_v47, %v1164_v49  ;;  %v1165_v54 = vadd.f32 %v3686_v44, %v1156_v50 }
 0x16c   : > { %v1182_v55 = vadd.f32 %v3688_v52, %v1173_v53  ;;  %v1174_v56 = vmul.f32 %v3687_v47, %v1165_v54 }
 0x16e   : > { %v1184_v57 = vmax.f32 %v1182_v55, 0.0  ;;  %v1183_v58 = vadd.f32 %v3688_v52, %v1174_v56 }
 0x170   : > { %v1185_v59 = vmax.f32 %v1183_v58, 0.0  ;;  %v1186_v60 = vrot.slane %v1184_v57, 7  ;;  %v1348_v62 = vrot.slane %v1184_v57, 1 }
 0x172   : > { %v1187_v63 = vrot.slane %v1185_v59, 7  ;;  %v1210_v0 = vpack.c.bf16 %v1185_v59, %v1184_v57  ;;  %v1349_v2 = vrot.slane %v1185_v59, 1 }
 0x174   : > { %3841 = vmatmul.mubr.msk.bf16.vlgmr.msra.gmra.mrb[4].mxu1 %vm1235_vm7, %v1210_v0  ;;  %v1188_v3 = vsel %vm969_vm3, %v1186_v60, %v1187_v63  ;;  %v1189_v4 = vsel %vm969_vm3, %v1187_v63, %v1186_v60  ;;  %v1350_v5 = vsel %vm1092_vm5, %v1348_v62, %v1349_v2  ;;  %v1351_v6 = vsel %vm1092_vm5, %v1349_v2, %v1348_v62 }
 0x175   : > { %3857 = vmatpush3.bf16.msra.mxu1 %v4076_v61  ;;  %v1190_v7 = vsel %vm973_vm4, %v1189_v4, 0.0  ;;  %3864 = vmatprep.mubr.msk.bf16.mxu1 %vm4579_vm1, %v4578_v1  ;;  %v1353_v9 = vsel %vm1096_vm6, %v1351_v6, 0.0 }
 0x176   : > { %3858 = vmatprep.subr.bf16.mxu1 %v4578_v1  ;;  %v1200_v10 = vpack.c.bf16 %v1188_v3, %v1190_v7  ;;  %v1363_v11 = vpack.c.bf16 %v1353_v9, %v1350_v5 }
 0x178   : > { %3853 = vmatmul.mubr.msk.bf16.vlgmr.msra.gmra.mrb[8].mxu0 %vm1235_vm7, %v1200_v10 }
 0x179   : > { %3859 = vmatpush3.bf16.msra.mxu1 %v4078_v8 }
 0x17a   : > { %3860 = vmatprep.subr.bf16.mxu1 %v4578_v1 }
 0x17d   : > { %3861 = vmatpush3.bf16.msra.mxu1 %v4079_v12 }
 0x17e   : > { %3862 = vmatprep.subr.bf16.mxu1 %v4578_v1 }
 0x181   : > { %3863 = vmatpush3.bf16.msra.mxu1 %v4080_v13 }
 0x184   : > { %3865 = vmatmul.mubr.msk.bf16.vlgmr.msra.gmra.mrb[8].mxu1 %vm1235_vm7, %v1363_v11 }
 0x247   : > { %v1273_v14 = vpop.f32.mrb[4].mxu1 }
 0x248   : > { %v3842_v15 = vpop.f32.mrb[5].mxu1 }
 0x249   : > { %v1276_v16 = vpop.f32.mrb[6].mxu1 }
 0x24a   : > { %v3843_v17 = vpop.f32.mrb[7].mxu1 }
 0x24b   : > { %v1341_v18 = vpop.f32.mrb[8].mxu0 }
 0x24c   : > { %v1342_v19 = vadd.f32 %v1341_v18, %v1273_v14  ;;  %v3854_v20 = vpop.f32.mrb[9].mxu0 }
 0x24d   : > { %v1344_v21 = vpop.f32.mrb[10].mxu0 }
 0x24e   : > { %v1345_v22 = vadd.f32 %v1344_v21, %v1276_v16  ;;  %v3855_v23 = vpop.f32.mrb[11].mxu0 }
 0x257   : > { %v1425_v24 = vpop.f32.mrb[8].mxu1 }
 0x258   : > { %v1432_v26 = vadd.f32 %v1425_v24, %v1342_v19  ;;  %v3866_v1 = vpop.f32.mrb[9].mxu1 }
 0x259   : > { %v1428_v28 = vpop.f32.mrb[10].mxu1 }
 0x25a   : > { %v1441_v29 = vadd.f32 %v3720_v25, %v1432_v26  ;;  %v1433_v30 = vadd.f32 %v1428_v28, %v1345_v22  ;;  %v3867_v31 = vpop.f32.mrb[11].mxu1 }
 0x25c   : > { %v1450_v33 = vmul.f32 %v3721_v27, %v1441_v29  ;;  %v1442_v34 = vadd.f32 %v3720_v25, %v1433_v30 }
 0x25e   : > { %v1459_v35 = vadd.f32 %v3722_v32, %v1450_v33  ;;  %v1451_v36 = vmul.f32 %v3721_v27, %v1442_v34 }
 0x260   : > { %v1461_v37 = vmax.f32 %v1459_v35, 0.0  ;;  %v1460_v38 = vadd.f32 %v3722_v32, %v1451_v36 }
 0x262   : > { %1463 = vst.msk [vmem:[#allocation2] sm:$0xff] %vm1235_vm7, %v1461_v37  ;;  %v1462_v39 = vmax.f32 %v1460_v38, 0.0 }
 0x264   : > { %1464 = vst.msk [vmem:[#allocation2 + $0x8] sm:$0xff] %vm1235_vm7, %v1462_v39 }
 0x265 PF: > { %vm1469_vm8 = vcmask 523264   ;;  %v4081_v54 = vld [vmem:[%s4907_s1 + $0x4] ss:$8 sps:$4 sm:$0xff]   ;;  %v4083_v55 = vld [vmem:[%s4907_s1] ss:$8 sps:$4 sm:$0xff]   ;;  %v4580_v62 = vmov 0   ;;  %s6350_s14 = scalar_lea.vmem %s6221_s9, %s4890_s20  ;;  %s6351_s23 = scalar_lea.vmem %s6222_s10, %s4890_s20  ;;  %v6247_v32 = vlaneseq }
 0x266   : > { %1565 = vmatprep.subr.bf16.mxu0 %v4081_v54  ;;  %v4084_v56 = vld [vmem:[%s4907_s1 + $0x14] ss:$8 sps:$4 sm:$0xff]   ;;  %v4086_v57 = vld [vmem:[%s4907_s1 + $0x10] ss:$8 sps:$4 sm:$0xff]   ;;  %v4087_v58 = vld [vmem:[%s4907_s1 + $0x24] ss:$8 sps:$4 sm:$0xff]   ;;  %1597 = vmatprep.mubr.bf16.mxu0 %v4580_v62  ;;  %s6369_s7 = scalar_lea.vmem %s6227_s15, %s4890_s20 }
 0x267   : > { %1566 = vmatpush1.bf16.msra.mxu0 %v4083_v55  ;;  %v4089_v59 = vld [vmem:[%s4907_s1 + $0x20] ss:$8 sps:$4 sm:$0xff]   ;;  %v4090_v60 = vld [vmem:[%s4907_s1 + $0x34] ss:$8 sps:$4 sm:$0xff]   ;;  %v4092_v61 = vld [vmem:[%s4907_s1 + $0x30] ss:$8 sps:$4 sm:$0xff]   ;;  %1822 = vmatprep.mubr.bf16.mxu1 %v4580_v62 }
 0x268   : > { %1567 = vmatprep.subr.bf16.mxu0 %v4084_v56  ;;  %v3723_v8 = vld [vmem:[%s6350_s14] ss:$0 sm:$0xff]  ;;  %v4093_v17 = vld [vmem:[%s4874_s8 + $0x4] ss:$8 sps:$4 sm:$0xff]   ;;  %v4095_v18 = vld [vmem:[%s4874_s8] ss:$8 sps:$4 sm:$0xff]  }
 0x269   : > { %v5080_v40 = vld [vmem:[#allocation2] sm:$0xff]  ;;  %1790 = vmatprep.subr.bf16.mxu1 %v4093_v17  ;;  %v4099_v21 = vld [vmem:[%s4874_s8 + $0x24] ss:$8 sps:$4 sm:$0xff]   ;;  %v4101_v22 = vld [vmem:[%s4874_s8 + $0x20] ss:$8 sps:$4 sm:$0xff]   ;;  %v5128_v33 = vshrl.u32 %v6247_v32, 7 }
 0x26a   : > { %6348 = vst [vmem:[#allocation22_spill] sm:$0xff] %v5080_v40  ;;  %v1470_v42 = vsel %vm1469_vm8, %v5080_v40, 0.0  ;;  %v3724_v12 = vld [vmem:[%s6351_s23] ss:$0 sm:$0xff]  ;;  %1791 = vmatpush1.bf16.msra.mxu1 %v4095_v18  ;;  %v4096_v19 = vld [vmem:[%s4874_s8 + $0x14] ss:$8 sps:$4 sm:$0xff]  }
 0x26b   : > { %v5082_v41 = vld [vmem:[#allocation2 + $0x8] sm:$0xff]  ;;  %1471 = vadd.xlane.f32.xlu0 %v1470_v42  ;;  %1568 = vmatpush1.bf16.msra.mxu0 %v4086_v57  ;;  %v4105_v25 = vld [vmem:[%s4874_s8 + $0x44] ss:$8 sps:$4 sm:$0xff]   ;;  %v4107_v26 = vld [vmem:[%s4874_s8 + $0x40] ss:$8 sps:$4 sm:$0xff]   ;;  %v5131_v34 = vsub.s32 0, %v5128_v33 }
 0x26c   : > { %6349 = vst [vmem:[#allocation23_spill] sm:$0xff] %v5082_v41  ;;  %v1473_v43 = vsel %vm1469_vm8, %v5082_v41, 0.0  ;;  %1569 = vmatprep.subr.bf16.mxu0 %v4087_v58  ;;  %v4098_v20 = vld [vmem:[%s4874_s8 + $0x10] ss:$8 sps:$4 sm:$0xff]   ;;  %1792 = vmatprep.subr.bf16.mxu1 %v4096_v19  ;;  %v4102_v23 = vld [vmem:[%s4874_s8 + $0x34] ss:$8 sps:$4 sm:$0xff]  }
 0x26d   : > { %v4104_v24 = vld [vmem:[%s4874_s8 + $0x30] ss:$8 sps:$4 sm:$0xff]   ;;  %v4108_v1 = vld [vmem:[%s4874_s8 + $0x54] ss:$8 sps:$4 sm:$0xff]   ;;  %v4111_v28 = vld [vmem:[%s4874_s8 + $0x64] ss:$8 sps:$4 sm:$0xff]  }
 0x26e   : > { %1793 = vmatpush1.bf16.msra.mxu1 %v4098_v20  ;;  %v4110_v27 = vld [vmem:[%s4874_s8 + $0x50] ss:$8 sps:$4 sm:$0xff]   ;;  %v4113_v29 = vld [vmem:[%s4874_s8 + $0x60] ss:$8 sps:$4 sm:$0xff]   ;;  %v4114_v30 = vld [vmem:[%s4874_s8 + $0x74] ss:$8 sps:$4 sm:$0xff]  }
 0x26f   : > { %1474 = vadd.xlane.f32.xlu0 %v1473_v43  ;;  %1570 = vmatpush1.bf16.msra.mxu0 %v4089_v59  ;;  %v4116_v31 = vld [vmem:[%s4874_s8 + $0x70] ss:$8 sps:$4 sm:$0xff]   ;;  %6352 = vst [vmem:[#allocation24_spill] sm:$0xff] %v5131_v34  ;;  %v5135_v37 = vsub.s32 1, %v5128_v33  ;;  %v5138_v38 = vsub.s32 3, %v5128_v33  ;;  %vm1621_vm9 = vcmp.lt.s32.totalorder %v5128_v33, 3 }
 0x270   : > { %1571 = vmatprep.subr.bf16.mxu0 %v4090_v60  ;;  %1794 = vmatprep.subr.bf16.mxu1 %v4099_v21  ;;  %v1616_v36 = vld [vmem:[%s4913_s24] sm:$0xf]  ;;  %vm1639_vm10 = vcmp.lt.s32.totalorder %v5128_v33, 2  ;;  %vm1625_vm11 = vcmp.ge.s32.totalorder %v5128_v33, 3  ;;  %vm1642_vm12 = vcmp.ge.s32.totalorder %v5128_v33, 2  ;;  %vm1656_vm13 = vcmp.lt.s32.totalorder %v5128_v33, 1 }
 0x271   : > { %6353 = vst [vmem:[#allocation25_spill] sm:$0xff] %v5135_v37  ;;  %6354 = vst [vmem:[#allocation26_spill] sm:$0xff] %v5138_v38  ;;  %v1632_v42 = vrot.slane %v1616_v36, %v5131_v34  ;;  %vm1659_vm14 = vcmp.ge.s32.totalorder %v5128_v33, 1  ;;  %s6358_s12 = sld [smem:[#allocation64_spill]]  ;;  %s6360_s27 = sld [smem:[#allocation21_spill]] }
 0x272   : > { %1795 = vmatpush1.bf16.msra.mxu1 %v4101_v22  ;;  %s5227_s2 = smov 0  }
 0x273   : > { %1572 = vmatpush1.bf16.msra.mxu0 %v4092_v61  ;;  %1796 = vmatprep.subr.bf16.mxu1 %v4102_v23 }
 0x276   : > { %1797 = vmatpush1.bf16.msra.mxu1 %v4104_v24 }
 0x277   : > { %1798 = vmatprep.subr.bf16.mxu1 %v4105_v25  ;;  %s6359_s13 = scalar_lea.vmem %s6358_s12, %s4890_s20 }
 0x27a   : > { %1799 = vmatpush1.bf16.msra.mxu1 %v4107_v26 }
 0x27b   : > { %1800 = vmatprep.subr.bf16.mxu1 %v4108_v1 }
 0x27e   : > { %1801 = vmatpush1.bf16.msra.mxu1 %v4110_v27 }
 0x27f   : > { %1802 = vmatprep.subr.bf16.mxu1 %v4111_v28 }
 0x282   : > { %1803 = vmatpush1.bf16.msra.mxu1 %v4113_v29 }
 0x283   : > { %1804 = vmatprep.subr.bf16.mxu1 %v4114_v30  ;;  %v1860_v30 = vld [vmem:[%s6360_s27] sm:$0xff] }
 0x286   : > { %1805 = vmatpush1.bf16.msra.mxu1 %v4116_v31  ;;  %v1861_v31 = vld [vmem:[%s6360_s27 + $0x8] sm:$0xff] }
 0x2f8   : > { %v1472_v44 = vpop.xlane.xlu0 %1471 }
 0x2f9   : > { %v1477_v45 = vmul.f32 0.015625, %v1472_v44 }
 0x2fb   : > { %v1479_v46 = vsub.f32 %v5080_v40, %v1477_v45  ;;  %v5148_v45 = vsub.s32 2, %v5128_v33 }
 0x2fc   : > { %v1475_v47 = vpop.xlane.xlu0 %1474 }
 0x2fd   : > { %v1478_v48 = vmul.f32 0.015625, %v1475_v47  ;;  %v1481_v49 = vmul.f32 %v1479_v46, %v1479_v46  ;;  %6356 = vst [vmem:[#allocation28_spill] sm:$0xff] %v5148_v45  ;;  %v1666_v61 = vrot.slane %v1616_v36, %v5148_v45 }
 0x2ff   : > { %v1480_v50 = vsub.f32 %v5082_v41, %v1478_v48  ;;  %v1483_v51 = vsel %vm1469_vm8, %v1481_v49, 0.0 }
 0x300   : > { %1484 = vadd.xlane.f32.xlu1 %v1483_v51 }
 0x301   : > { %v1482_v52 = vmul.f32 %v1480_v50, %v1480_v50 }
 0x303   : > { %v1486_v53 = vsel %vm1469_vm8, %v1482_v52, 0.0  ;;  %v1649_v52 = vrot.slane %v1616_v36, %v5135_v37 }
 0x304   : > { %1487 = vadd.xlane.f32.xlu1 %v1486_v53  ;;  %v3734_v53 = vld [vmem:[%s6359_s13] ss:$0 sm:$0xff] }
 0x38d   : > { %v1485_v63 = vpop.xlane.xlu1 %1484 }
 0x38e   : > { %v1489_v0 = vmul.f32 0.015625, %v1485_v63 }
 0x390   : > { %v1491_v2 = vadd.f32 1e-05, %v1489_v0 }
 0x391   : > { %v1488_v3 = vpop.xlane.xlu1 %1487 }
 0x392   : > { %4117 = vrsqrt.f32 %v1491_v2  ;;  %v1490_v4 = vmul.f32 0.015625, %v1488_v3 }
 0x394   : > { %v1492_v5 = vadd.f32 1e-05, %v1490_v4 }
 0x396   : > { %4119 = vrsqrt.f32 %v1492_v5  ;;  %v1674_v5 = vrot.slane %v1616_v36, %v5138_v38  ;;  %v1863_v36 = vld [vmem:[%s6360_s27 + $0x18] sm:$0xff] }
 0x39c   : > { %v4118_v6 = vpop.eup %4117 }
 0x39d   : > { %v1495_v7 = vmul.f32 %v4118_v6, %v1479_v46 }
 0x39f   : > { %v1503_v11 = vmul.f32 %v3723_v8, %v1495_v7 }
 0x3a0   : > { %v4120_v9 = vpop.eup %4119 }
 0x3a1   : > { %v1496_v10 = vmul.f32 %v4120_v9, %v1480_v50  ;;  %v1511_v14 = vadd.f32 %v3724_v12, %v1503_v11 }
 0x3a3   : > { %v1504_v13 = vmul.f32 %v3723_v8, %v1496_v10 }
 0x3a5   : > { %v1512_v15 = vadd.f32 %v3724_v12, %v1504_v13 }
 0x3a7   : > { %v1521_v16 = vpack.c.bf16 %v1512_v15, %v1511_v14 }
 0x3a9   : > { %3733 = vmatmul.mubr.msk.bf16.vlgmr.msra.gmra.mrb[0].mxu0 %vm1469_vm8, %v1521_v16 }
 0x47c   : > { %v1599_v35 = vpop.f32.mrb[0].mxu0 }
 0x47d   : > { %v5140_v39 = vpop.f32.mrb[1].mxu0  ;;  %v1617_v43 = vrot.slane %v1599_v35, 5  ;;  %v1637_v46 = vrot.slane %v1599_v35, 6  ;;  %v1654_v51 = vrot.slane %v1599_v35, 7  ;;  %v1675_v14 = vmul.f32 %v1674_v5, %v1599_v35  ;;  %v1862_v35 = vld [vmem:[%s6360_s27 + $0x10] sm:$0xff] }
 0x47e   : > { %6355 = vst [vmem:[#allocation27_spill] sm:$0xff] %v5140_v39  ;;  %v1603_v44 = vpop.f32.mrb[2].mxu0 }
 0x47f   : > { %v1618_v47 = vrot.slane %v1603_v44, 5  ;;  %v1638_v48 = vrot.slane %v1603_v44, 6  ;;  %v1655_v49 = vrot.slane %v1603_v44, 7  ;;  %v5150_v50 = vpop.f32.mrb[3].mxu0  ;;  %v1676_v13 = vmul.f32 %v1674_v5, %v1603_v44 }
 0x480   : > { %6357 = vst [vmem:[#allocation29_spill] sm:$0xff] %v5150_v50  ;;  %v1868_v44 = vmul.f32 1.442695, %v1860_v30 }
 0x481   : > { %v1622_v54 = vsel %vm1621_vm9, %v1617_v43, %v1618_v47  ;;  %v1623_v55 = vsel %vm1621_vm9, %v1618_v47, %v1617_v43  ;;  %v1640_v56 = vsel %vm1639_vm10, %v1637_v46, %v1638_v48  ;;  %v1641_v57 = vsel %vm1639_vm10, %v1638_v48, %v1637_v46  ;;  %v1865_v43 = vld [vmem:[%s6360_s27 + $0x28] sm:$0xff]  ;;  %v1866_v46 = vld [vmem:[%s6360_s27 + $0x30] sm:$0xff] }
 0x482   : > { %v1627_v58 = vsel %vm1625_vm11, %v1623_v55, 0.0  ;;  %v1634_v59 = vmul.f32 %v1632_v42, %v1622_v54  ;;  %v1644_v60 = vsel %vm1642_vm12, %v1641_v57, 0.0  ;;  %v1657_v63 = vsel %vm1656_vm13, %v1654_v51, %v1655_v49 }
 0x483   : > { %v1633_v62 = vmul.f32 %v1632_v42, %v1627_v58  ;;  %v1658_v0 = vsel %vm1656_vm13, %v1655_v49, %v1654_v51  ;;  %v1651_v3 = vmul.f32 %v1649_v52, %v1640_v56  ;;  %v1650_v6 = vmul.f32 %v1649_v52, %v1644_v60  ;;  %v1864_v42 = vld [vmem:[%s6360_s27 + $0x20] sm:$0xff]  ;;  %v1867_v49 = vld [vmem:[%s6360_s27 + $0x38] sm:$0xff] }
 0x484   : > { %v1636_v2 = vadd.f32 %v3734_v53, %v1634_v59  ;;  %v1661_v4 = vsel %vm1659_vm14, %v1658_v0, 0.0  ;;  %v1668_v9 = vmul.f32 %v1666_v61, %v1657_v63  ;;  %v1870_v47 = vmul.f32 1.442695, %v1861_v31 }
 0x485   : > { %v1635_v7 = vadd.f32 %v3734_v53, %v1633_v62  ;;  %v1667_v11 = vmul.f32 %v1666_v61, %v1661_v4  ;;  %v1872_v48 = vmul.f32 1.442695, %v1862_v35  ;;  %v1874_v51 = vmul.f32 1.442695, %v1863_v36 }
 0x486   : > { %v1653_v8 = vadd.f32 %v1651_v3, %v1636_v2  ;;  %v1876_v52 = vmul.f32 1.442695, %v1864_v42  ;;  %v1878_v53 = vmul.f32 1.442695, %v1865_v43  ;;  %v1880_v54 = vmul.f32 1.442695, %v1866_v46 }
 0x487   : > { %v1652_v10 = vadd.f32 %v1650_v6, %v1635_v7  ;;  %v1882_v55 = vmul.f32 1.442695, %v1867_v49  ;;  %v5211_v46 = vmov 0.0   ;;  %v5217_v49 = vmov 0.0  }
 0x488   : > { %v1670_v12 = vadd.f32 %v1668_v9, %v1653_v8  ;;  %v3751_v9 = vld [vmem:[%s6369_s7] ss:$0 sm:$0xff] }
 0x489   : > { %v1669_v15 = vadd.f32 %v1667_v11, %v1652_v10 }
 0x48a   : > { %v1678_v16 = vadd.f32 %v1676_v13, %v1670_v12 }
 0x48b   : > { %v1677_v17 = vadd.f32 %v1675_v14, %v1669_v15 }
 0x48c   : > { %v1680_v18 = vsub.f32 0.0, %v1678_v16 }
 0x48d   : > { %v1679_v19 = vsub.f32 0.0, %v1677_v17 }
 0x48e   : > { %v1683_v20 = vmul.f32 1.442695, %v1680_v18 }
 0x48f   : > { %v1681_v21 = vmul.f32 1.442695, %v1679_v19 }
 0x490   : > { %4121 = vpow2.f32 %v1683_v20 }
 0x491   : > { %4123 = vpow2.f32 %v1681_v21 }
 0x49a   : > { %v4122_v22 = vpop.eup %4121 }
 0x49b   : > { %v4124_v23 = vpop.eup %4123  ;;  %v1686_v24 = vadd.f32 1.0, %v4122_v22 }
 0x49c   : > { %v1685_v25 = vadd.f32 1.0, %v4124_v23 }
 0x49d   : > { %4125 = vrcp.f32 %v1686_v24 }
 0x49e   : > { %4127 = vrcp.f32 %v1685_v25 }
 0x49f   : > { %4129 = vpow2.f32 %v1868_v44 }
 0x4a0   : > { %4131 = vpow2.f32 %v1870_v47  ;;  %v5213_v47 = vmov 0.0  }
 0x4a1   : > { %4133 = vpow2.f32 %v1872_v48  ;;  %v5215_v48 = vmov 0.0  }
 0x4a2   : > { %4135 = vpow2.f32 %v1874_v51  ;;  %v5219_v51 = vmov 0.0  }
 0x4a3   : > { %4137 = vpow2.f32 %v1876_v52  ;;  %v5221_v52 = vmov 0.0  }
 0x4a4   : > { %4139 = vpow2.f32 %v1878_v53  ;;  %v5223_v53 = vmov 0.0  }
 0x4a5   : > { %4141 = vpow2.f32 %v1880_v54  ;;  %v5225_v54 = vmov 0.0  }
 0x4a6   : > { %4143 = vpow2.f32 %v1882_v55 }
 0x4a7   : > { %v4126_v26 = vpop.eup %4125 }
 0x4a8   : > { %v4128_v1 = vpop.eup %4127  ;;  %v5174_v27 = vmul.f32 %v4126_v26, %v1678_v16 }
 0x4a9   : > { %v5176_v28 = vmul.f32 %v4128_v1, %v1677_v17  ;;  %v4130_v56 = vpop.eup %4129 }
 0x4aa   : > { %6361 = vst [vmem:[#allocation30_spill] sm:$0xff] %v5174_v27  ;;  %v4132_v57 = vpop.eup %4131  ;;  %v5188_v58 = vsub.f32 0.0, %v4130_v56 }
 0x4ab   : > { %6362 = vst [vmem:[#allocation31_spill] sm:$0xff] %v5176_v28  ;;  %v1709_v29 = vpack.c.bf16 %v5174_v27, %v5176_v28  ;;  %v4134_v59 = vpop.eup %4133  ;;  %v5190_v60 = vsub.f32 0.0, %v4132_v57 }
 0x4ac   : > { %6363 = vst [vmem:[#allocation32_spill] sm:$0xff] %v5188_v58  ;;  %v4136_v61 = vpop.eup %4135  ;;  %v5192_v62 = vsub.f32 0.0, %v4134_v59 }
 0x4ad   : > { %1823 = vmatmul.mubr.bf16.vlgmr.msra.gmra.mrb[0].mxu1 %v1709_v29  ;;  %6364 = vst [vmem:[#allocation33_spill] sm:$0xff] %v5190_v60  ;;  %v4138_v63 = vpop.eup %4137  ;;  %v5194_v0 = vsub.f32 0.0, %v4136_v61 }
 0x4ae   : > { %6365 = vst [vmem:[#allocation34_spill] sm:$0xff] %v5192_v62  ;;  %v4140_v2 = vpop.eup %4139  ;;  %v5196_v3 = vsub.f32 0.0, %v4138_v63 }
 0x4af   : > { %6366 = vst [vmem:[#allocation35_spill] sm:$0xff] %v5194_v0  ;;  %v4142_v4 = vpop.eup %4141  ;;  %v5198_v5 = vsub.f32 0.0, %v4140_v2 }
 0x4b0   : > { %6367 = vst [vmem:[#allocation36_spill] sm:$0xff] %v5196_v3  ;;  %v4144_v6 = vpop.eup %4143  ;;  %v5200_v7 = vsub.f32 0.0, %v4142_v4 }
 0x4b1   : > { %v5202_v8 = vsub.f32 0.0, %v4144_v6 }
 0x4b3   : > { %6368 = vst [vmem:[#allocation37_spill] sm:$0xff] %v5202_v8 }
 0x580   : > { %v1824_v10 = vpop.f32.mrb[0].mxu1 }
 0x581   : > { %v1840_v11 = vadd.f32 %v3751_v9, %v1824_v10  ;;  %v1826_v12 = vpop.f32.mrb[1].mxu1 }
 0x582   : > { %1898 = vst [vmem:[#allocation5] sm:$0xff] %v1826_v12  ;;  %v1828_v13 = vpop.f32.mrb[2].mxu1 }
 0x583   : > { %v1844_v14 = vand.u32 2147483647, %v1840_v11  ;;  %v1841_v15 = vadd.f32 %v3751_v9, %v1828_v13  ;;  %v1830_v16 = vpop.f32.mrb[3].mxu1  ;;  %v1842_v1 = vmax.f32 %v1840_v11, 0.0 }
 0x584   : > { %1899 = vst [vmem:[#allocation5 + $0x8] sm:$0xff] %v1830_v16 }
 0x585   : > { %v1846_v17 = vsub.f32 0.0, %v1844_v14  ;;  %v1845_v18 = vand.u32 2147483647, %v1841_v15  ;;  %v1843_v35 = vmax.f32 %v1841_v15, 0.0 }
 0x587   : > { %v1848_v19 = vmul.f32 1.442695, %v1846_v17  ;;  %v1847_v20 = vsub.f32 0.0, %v1845_v18 }
 0x589   : > { %4145 = vpow2.f32 %v1848_v19  ;;  %v1850_v21 = vmul.f32 1.442695, %v1847_v20 }
 0x58b   : > { %4147 = vpow2.f32 %v1850_v21 }
 0x593   : > { %v4146_v22 = vpop.eup %4145 }
 0x594   : > { %v1852_v23 = vadd.f32 1.0, %v4146_v22 }
 0x595   : > { %v4148_v24 = vpop.eup %4147 }
 0x596   : > { %4149 = vlog2.f32 %v1852_v23  ;;  %v1853_v25 = vadd.f32 1.0, %v4148_v24 }
 0x598   : > { %4151 = vlog2.f32 %v1853_v25 }
 0x5a0   : > { %v4150_v26 = vpop.eup %4149 }
 0x5a1   : > { %v1855_v29 = vmul.f32 0.6931472, %v4150_v26 }
 0x5a2   : > { %v4152_v30 = vpop.eup %4151 }
 0x5a3   : > { %v1858_v31 = vadd.f32 %v1855_v29, %v1842_v1  ;;  %v1857_v36 = vmul.f32 0.6931472, %v4152_v30 }
 0x5a5   : > { %1892 = vst [vmem:[#allocation3] sm:$0xff] %v1858_v31  ;;  %v1894_v42 = vmul.f32 %v1858_v31, %v5176_v28  ;;  %v1859_v43 = vadd.f32 %v1857_v36, %v1843_v35 }
 0x5a7   : > { %1896 = vst [vmem:[#allocation4] sm:$0xff] %v1894_v42  ;;  %1893 = vst [vmem:[#allocation3 + $0x8] sm:$0xff] %v1859_v43  ;;  %v1895_v44 = vmul.f32 %v1859_v43, %v5174_v27 }
 0x5a9   : > { %1897 = vst [vmem:[#allocation4 + $0x8] sm:$0xff] %v1895_v44 }
 0x5aa LB: >> { %v6370_v8 = vld [vmem:[#allocation37_spill] sm:$0xff]  ;;  %v6371_v38 = vld [vmem:[#allocation26_spill] sm:$0xff]  ;;  %v6372_v58 = vld [vmem:[#allocation32_spill] sm:$0xff]  ;;  %v6253_v55 = vmov 1   ;;  %s5258_s30 = sshll.u32 %s4572_s2, 3  ;;  %v6251_v57 = vmov 0   ;;  %v4540_v46 = vphi %v5211_v46, %v3043_v46   ;;  %s4572_s2 = sphi %s5227_s2, %s1905_s2   ;;  %v4568_v54 = vphi %v5225_v54, %v6067_v54   ;;  %v4564_v53 = vphi %v5223_v53, %v6081_v53   ;;  %v4560_v52 = vphi %v5221_v52, %v6429_v52   ;;  %v4556_v51 = vphi %v5219_v51, %v6089_v51   ;;  %v4552_v49 = vphi %v5217_v49, %v6041_v49   ;;  %v4548_v48 = vphi %v5215_v48, %v3041_v48   ;;  %v4544_v47 = vphi %v5213_v47, %v6428_v47  }
 0x5ab   : >> { %v6373_v0 = vld [vmem:[#allocation35_spill] sm:$0xff]  ;;  %v6374_v3 = vld [vmem:[#allocation36_spill] sm:$0xff]  ;;  %v6375_v62 = vld [vmem:[#allocation34_spill] sm:$0xff]  ;;  %4154 = vset.pattern.permute.xlu1 %v6253_v55  ;;  %s1919_s1 = scalar_lea.vmem [#allocation5], %s5258_s30  ;;  %v6250_v63 = vmov 2   ;;  %v6249_v20 = vmov 3  }
 0x5ac   : >> { %v6376_v60 = vld [vmem:[#allocation33_spill] sm:$0xff]  ;;  %v6377_v45 = vld [vmem:[#allocation28_spill] sm:$0xff]  ;;  %s1915_s26 = scalar_lea.vmem [#allocation3], %s5258_s30  ;;  %v6248_v26 = vmov 4   ;;  %s1917_s14 = scalar_lea.vmem [#allocation4], %s5258_s30  ;;  %vm3097_vm15 = vcmask 1040384  }
 0x5ad   : >> { %v6378_v37 = vld [vmem:[#allocation25_spill] sm:$0xff]  ;;  %v6379_v34 = vld [vmem:[#allocation24_spill] sm:$0xff]  ;;  %vm3099_vm0 = vcmask 1041408   ;;  %vm3101_vm1 = vcmask 1042432   ;;  %vm3103_vm2 = vcmask 1043456   ;;  %vm3105_vm3 = vcmask 1044480  }
 0x5ae   : >> { %v1920_v56 = vld [vmem:[%s1919_s1] sm:$0xff]  ;;  %vm3107_vm4 = vcmask 1045504   ;;  %vm3109_vm5 = vcmask 1046528   ;;  %s3111_s29 = scalar_lea.vmem [#allocation6], %s5258_s30  ;;  %s1905_s2 = sadd.s32 1, %s4572_s2  }
 0x5af   : >> { %1921 = vxpose.xlu0.b32.start.end [1/1] (short) %v1920_v56, 128  ;;  %v5355_v21 = vld [vmem:[%s1915_s26] sm:$0xff]  ;;  %p1902_p8 = scmp.ge.s32.totalorder %s1905_s2, 2  }
 0x5b0   : >> { %6382 = vst [vmem:[#allocation40_spill] sm:$0xff] %v5355_v21  ;;  %v5362_v22 = vrot.slane %v5355_v21, %v6379_v34  ;;  %v5372_v24 = vrot.slane %v5355_v21, %v6378_v37  ;;  %v5379_v1 = vrot.slane %v5355_v21, %v6377_v45  ;;  %v5391_v35 = vrot.slane %v5355_v21, %v6371_v38  ;;  %v5403_v56 = vld [vmem:[%s1917_s14] sm:$0xff]  ;;  %p3764_p2 = scmp.ne.s32.totalorder (%p1902_p8), %s4520_s25, 11 }
 0x5b1   : > { %vm4590_vm6 = vmmov (%p1902_p8), 0  }
 0x5b2   : >> { %v1957_v23 = vmul.f32 %v5362_v22, %v6372_v58  ;;  %v2114_v29 = vmul.f32 %v5372_v24, %v6372_v58  ;;  %v2255_v30 = vmul.f32 %v5379_v1, %v6372_v58  ;;  %v1958_v36 = vmul.f32 %v5362_v22, %v6376_v60 }
 0x5b3   : >> { %v2396_v44 = vmul.f32 %v5391_v35, %v6372_v58  ;;  %v2256_v32 = vmul.f32 %v5379_v1, %v6376_v60  ;;  %v2118_v50 = vmul.f32 %v5372_v24, %v6374_v3 }
 0x5b4   : >> { %v1965_v25 = vmul.f32 1.442695, %v1957_v23  ;;  %v2122_v31 = vmul.f32 1.442695, %v2114_v29  ;;  %v2263_v42 = vmul.f32 1.442695, %v2255_v30  ;;  %v2115_v23 = vmul.f32 %v5372_v24, %v6376_v60 }
 0x5b5   : >> { %v1967_v43 = vmul.f32 1.442695, %v1958_v36  ;;  %v2404_v29 = vmul.f32 1.442695, %v2396_v44  ;;  %v5411_v30 = vrot.slane %v5403_v56, %v6379_v34 }
 0x5b6   : >> { %4208 = vpow2.f32 %v1965_v25 }
 0x5b7   : >> { %4210 = vpow2.f32 %v2122_v31  ;;  %v2124_v31 = vmul.f32 1.442695, %v2115_v23 }
 0x5b8   : >> { %4212 = vpow2.f32 %v2263_v42 }
 0x5b9   : >> { %4214 = vpow2.f32 %v1967_v43  ;;  %v5420_v43 = vrot.slane %v5403_v56, %v6378_v37 }
 0x5ba   : >> { %4216 = vpow2.f32 %v2404_v29  ;;  %v5432_v29 = vrot.slane %v5403_v56, %v6377_v45 }
 0x5bb   : >> { %4218 = vpow2.f32 %v2124_v31 }
 0x5c0   : >> { %v4209_v25 = vpop.eup %4208 }
 0x5c1   : >> { %v1981_v36 = vmul.f32 %v4568_v54, %v4209_v25  ;;  %v2265_v54 = vmul.f32 1.442695, %v2256_v32  ;;  %v2397_v25 = vmul.f32 %v5391_v35, %v6376_v60  ;;  %v6383_v32 = vmov 1  }
 0x5c3   : >> { %4220 = vpow2.f32 %v2265_v54  ;;  %v2406_v37 = vmul.f32 1.442695, %v2397_v25  ;;  %v6264_v54 = vmov 5  }
 0x5c5   : >> { %4222 = vpow2.f32 %v2406_v37 }
 0x5d8   : >> { %4153 = vset.pattern.permute.xlu0 %v6251_v57 }
 0x62f   : >> { %v5262_v59 = vpop.trf.xlu0 }
 0x630   : >> { %2147 = vperm.xlu1 %4154, %v5262_v59   ;;  %1991 = vperm.xlu0 %4153, %v5262_v59  }
 0x633   : >> { %v5266_v61 = vpop.trf.xlu0 }
 0x634   : >> { %6380 = vst [vmem:[#allocation38_spill] sm:$0xff] %v5266_v61  ;;  %4155 = vset.pattern.permute.xlu1 %v6250_v63  ;;  %4158 = vset.pattern.permute.xlu0 %v6250_v63 }
 0x635   : >> { %2288 = vperm.xlu1 %4155, %v5262_v59   ;;  %2292 = vperm.xlu0 %4158, %v5266_v61  }
 0x637   : >> { %v5272_v2 = vpop.trf.xlu0 }
 0x639   : >> { %4156 = vset.pattern.permute.xlu1 %v6251_v57 }
 0x63a   : >> { %1996 = vperm.xlu1 %4156, %v5266_v61  }
 0x63b   : >> { %v5276_v4 = vpop.trf.xlu0 }
 0x63e   : >> { %4157 = vset.pattern.permute.xlu1 %v6253_v55 }
 0x63f   : >> { %2151 = vperm.xlu1 %4157, %v5266_v61   ;;  %v5280_v6 = vpop.trf.xlu0 }
 0x640   : >> { %2304 = vperm.xlu0 %4158, %v5280_v6  }
 0x643   : >> { %4159 = vset.pattern.permute.xlu1 %v6251_v57  ;;  %v5284_v9 = vpop.trf.xlu0 }
 0x644   : >> { %2001 = vperm.xlu1 %4159, %v5272_v2  }
 0x647   : >> { %v5287_v10 = vpop.trf.xlu0 }
 0x648   : >> { %4160 = vset.pattern.permute.xlu1 %v6253_v55  ;;  %2312 = vperm.xlu0 %4158, %v5287_v10  }
 0x649   : >> { %2155 = vperm.xlu1 %4160, %v5272_v2  }
 0x64b   : >> { %v5292_v11 = vpop.trf.xlu0 }
 0x64d   : >> { %4161 = vset.pattern.permute.xlu1 %v6250_v63 }
 0x64e   : >> { %2296 = vperm.xlu1 %4161, %v5272_v2  }
 0x64f   : >> { %v5296_v12 = vpop.trf.xlu0 }
 0x650   : >> { %2340 = vperm.xlu0 %4158, %v5296_v12  }
 0x652   : >> { %4162 = vset.pattern.permute.xlu1 %v6251_v57 }
 0x653   : >> { %2006 = vperm.xlu1 %4162, %v5276_v4   ;;  %v5301_v13 = vpop.trf.xlu0 }
 0x654   : >> { %6381 = vst [vmem:[#allocation39_spill] sm:$0xff] %v5301_v13  ;;  %4184 = vset.pattern.permute.xlu0 %v6253_v55 }
 0x657   : >> { %4163 = vset.pattern.permute.xlu1 %v6253_v55  ;;  %v5305_v14 = vpop.trf.xlu0 }
 0x658   : >> { %2159 = vperm.xlu1 %4163, %v5276_v4  }
 0x65b   : >> { %v5308_v15 = vpop.trf.xlu0 }
 0x65c   : >> { %4164 = vset.pattern.permute.xlu1 %v6250_v63 }
 0x65d   : >> { %2300 = vperm.xlu1 %4164, %v5276_v4  }
 0x65f   : >> { %v5312_v16 = vpop.trf.xlu0 }
 0x660   : >> { %2215 = vperm.xlu0 %4184, %v5312_v16  }
 0x661   : >> { %4165 = vset.pattern.permute.xlu1 %v6251_v57 }
 0x662   : >> { %2011 = vperm.xlu1 %4165, %v5280_v6  }
 0x663   : >> { %v5317_v17 = vpop.trf.xlu0 }
 0x666   : >> { %4166 = vset.pattern.permute.xlu1 %v6253_v55 }
 0x667   : >> { %2163 = vperm.xlu1 %4166, %v5280_v6   ;;  %v5321_v18 = vpop.trf.xlu0 }
 0x66b   : >> { %4167 = vset.pattern.permute.xlu1 %v6251_v57  ;;  %v5324_v19 = vpop.trf.xlu0 }
 0x66c   : >> { %2016 = vperm.xlu1 %4167, %v5284_v9   ;;  %2227 = vperm.xlu0 %4184, %v5324_v19  }
 0x670   : >> { %4168 = vset.pattern.permute.xlu1 %v6253_v55  ;;  %4190 = vset.pattern.permute.xlu0 %v6250_v63 }
 0x671   : >> { %2167 = vperm.xlu1 %4168, %v5284_v9   ;;  %2348 = vperm.xlu0 %4190, %v5305_v14  }
 0x675   : >> { %4169 = vset.pattern.permute.xlu1 %v6250_v63  ;;  %2356 = vperm.xlu0 %4190, %v5312_v16  }
 0x676   : >> { %2308 = vperm.xlu1 %4169, %v5284_v9  }
 0x679   : >> { %2364 = vperm.xlu0 %4190, %v5321_v18  }
 0x67a   : >> { %4170 = vset.pattern.permute.xlu1 %v6251_v57 }
 0x67b   : >> { %2021 = vperm.xlu1 %4170, %v5287_v10  }
 0x67d   : >> { %4191 = vset.pattern.permute.xlu0 %v6249_v20  ;;  %v4211_v20 = vpop.eup %4210 }
 0x67e   : >> { %2429 = vperm.xlu0 %4191, %v5262_v59  }
 0x67f   : >> { %4171 = vset.pattern.permute.xlu1 %v6253_v55 }
 0x680   : >> { %2171 = vperm.xlu1 %4171, %v5287_v10  }
 0x682   : >> { %2441 = vperm.xlu0 %4191, %v5276_v4  }
 0x684   : >> { %4172 = vset.pattern.permute.xlu1 %v6251_v57 }
 0x685   : >> { %2026 = vperm.xlu1 %4172, %v5292_v11  }
 0x686   : >> { %2449 = vperm.xlu0 %4191, %v5284_v9  }
 0x689   : >> { %4173 = vset.pattern.permute.xlu1 %v6253_v55 }
 0x68a   : >> { %2175 = vperm.xlu1 %4173, %v5292_v11   ;;  %2457 = vperm.xlu0 %4191, %v5292_v11  }
 0x68e   : >> { %4174 = vset.pattern.permute.xlu1 %v6250_v63  ;;  %2485 = vperm.xlu0 %4191, %v5301_v13   ;;  %v4213_v63 = vpop.eup %4212 }
 0x68f   : >> { %2316 = vperm.xlu1 %4174, %v5292_v11  }
 0x692   : >> { %2493 = vperm.xlu0 %4191, %v5308_v15  }
 0x693   : >> { %4175 = vset.pattern.permute.xlu1 %v6251_v57 }
 0x694   : >> { %2051 = vperm.xlu1 %4175, %v5296_v12  }
 0x696   : >> { %2501 = vperm.xlu0 %4191, %v5317_v17  }
 0x698   : >> { %4176 = vset.pattern.permute.xlu1 %v6253_v55 }
 0x699   : >> { %2199 = vperm.xlu1 %4176, %v5296_v12  }
 0x69a   : >> { %2509 = vperm.xlu0 %4191, %v5324_v19  }
 0x69d   : >> { %4177 = vset.pattern.permute.xlu1 %v6251_v57 }
 0x69e   : >> { %2056 = vperm.xlu1 %4177, %v5301_v13   ;;  %4194 = vset.pattern.permute.xlu0 %v6248_v26 }
 0x69f   : >> { %2574 = vperm.xlu0 %4194, %v5266_v61  }
 0x6a2   : >> { %4178 = vset.pattern.permute.xlu1 %v6253_v55 }
 0x6a3   : >> { %2203 = vperm.xlu1 %4178, %v5301_v13   ;;  %2586 = vperm.xlu0 %4194, %v5280_v6  }
 0x6a7   : >> { %4179 = vset.pattern.permute.xlu1 %v6251_v57  ;;  %2594 = vperm.xlu0 %4194, %v5287_v10  }
 0x6a8   : >> { %2061 = vperm.xlu1 %4179, %v5305_v14  }
 0x6ab   : >> { %2622 = vperm.xlu0 %4194, %v5296_v12  }
 0x6ac   : >> { %4180 = vset.pattern.permute.xlu1 %v6253_v55 }
 0x6ad   : >> { %2207 = vperm.xlu1 %4180, %v5305_v14  }
 0x6af   : >> { %v2148_v42 = vpop.permute.xlu1 %2147  ;;  %2630 = vperm.xlu0 %4194, %v5305_v14   ;;  %v1992_v26 = vpop.permute.xlu0 %1991 }
 0x6b0   : >> { %v2033_v44 = vmul.f32 %v5411_v30, %v1992_v26  ;;  %v2182_v26 = vmul.f32 %v5420_v43, %v2148_v42 }
 0x6b1   : >> { %4181 = vset.pattern.permute.xlu1 %v6251_v57 }
 0x6b2   : >> { %v5424_v23 = vadd.f32 %v2033_v44, %v1981_v36  ;;  %2066 = vperm.xlu1 %4181, %v5308_v15   ;;  %v4215_v44 = vpop.eup %4214 }
 0x6b3   : >> { %2638 = vperm.xlu0 %4194, %v5312_v16   ;;  %v4217_v41 = vpop.eup %4216 }
 0x6b4   : >> { %v2138_v57 = vmul.f32 %v4211_v20, %v5424_v23  ;;  %v2289_v31 = vpop.permute.xlu1 %2288  ;;  %v2293_v36 = vpop.permute.xlu0 %2292  ;;  %v1982_v20 = vmul.f32 %v4564_v53, %v4215_v44 }
 0x6b5   : >> { %v2324_v55 = vmul.f32 %v5432_v29, %v2293_v36  ;;  %v2323_v45 = vmul.f32 %v5432_v29, %v2289_v31 }
 0x6b6   : >> { %4182 = vset.pattern.permute.xlu1 %v6383_v32  ;;  %v5438_v34 = vadd.f32 %v2182_v26, %v2138_v57  ;;  %v4219_v57 = vpop.eup %4218  ;;  %v6385_v26 = vmov 0  }
 0x6b7   : >> { %2211 = vperm.xlu1 %4182, %v5308_v15   ;;  %2646 = vperm.xlu0 %4194, %v5321_v18  }
 0x6b8   : >> { %6384 = vst [vmem:[#allocation41_spill] sm:$0xff] %v5438_v34  ;;  %v2279_v42 = vmul.f32 %v4213_v63, %v5438_v34 }
 0x6b9   : >> { %v1997_v40 = vpop.permute.xlu1 %1996 }
 0x6ba   : >> { %v2034_v36 = vmul.f32 %v5411_v30, %v1997_v40  ;;  %v2331_v27 = vadd.f32 %v2323_v45, %v2279_v42  ;;  %v4221_v45 = vpop.eup %4220 }
 0x6bb   : >> { %4183 = vset.pattern.permute.xlu1 %v6385_v26  ;;  %4195 = vset.pattern.permute.xlu0 %v6264_v54 }
 0x6bc   : >> { %2071 = vperm.xlu1 %4183, %v5312_v16   ;;  %2711 = vperm.xlu0 %4195, %v5262_v59   ;;  %v5450_v25 = vadd.f32 %v2034_v36, %v1982_v20  ;;  %v5452_v63 = vmul.f32 %v4217_v41, %v2331_v27  ;;  %v4223_v36 = vpop.eup %4222 }
 0x6be   : >> { %6386 = vst [vmem:[#allocation42_spill] sm:$0xff] %v5450_v25  ;;  %v2152_v53 = vpop.permute.xlu1 %2151  ;;  %v2139_v31 = vmul.f32 %v4219_v57, %v5450_v25 }
 0x6bf   : >> { %v2183_v40 = vmul.f32 %v5420_v43, %v2152_v53  ;;  %v2305_v37 = vpop.permute.xlu0 %2304  ;;  %v1959_v53 = vmul.f32 %v5362_v22, %v6375_v62 }
 0x6c0   : >> { %2076 = vperm.xlu1 %4183, %v5317_v17   ;;  %2723 = vperm.xlu0 %4195, %v5276_v4   ;;  %v5459_v44 = vmul.f32 %v5432_v29, %v2305_v37 }
 0x6c1   : >> { %v5461_v42 = vadd.f32 %v2183_v40, %v2139_v31 }
 0x6c3   : >> { %6387 = vst [vmem:[#allocation43_spill] sm:$0xff] %v5461_v42  ;;  %v2002_v20 = vpop.permute.xlu1 %2001  ;;  %v2280_v41 = vmul.f32 %v4221_v45, %v5461_v42  ;;  %v1969_v45 = vmul.f32 1.442695, %v1959_v53  ;;  %v6275_v42 = vmov 6  }
 0x6c4   : >> { %4185 = vset.pattern.permute.xlu1 %v6383_v32  ;;  %2731 = vperm.xlu0 %4195, %v5284_v9  }
 0x6c5   : >> { %2219 = vperm.xlu1 %4185, %v5317_v17   ;;  %v5467_v57 = vadd.f32 %v2324_v55, %v2280_v41  ;;  %v1961_v55 = vmul.f32 %v5362_v22, %v6374_v3  ;;  %4224 = vpow2.f32 %v1969_v45  ;;  %v2257_v45 = vmul.f32 %v5379_v1, %v6375_v62 }
 0x6c7   : >> { %6388 = vst [vmem:[#allocation44_spill] sm:$0xff] %v5467_v57  ;;  %v2313_v54 = vpop.permute.xlu0 %2312  ;;  %v5472_v37 = vmul.f32 %v4223_v36, %v5467_v57  ;;  %v2116_v36 = vmul.f32 %v5372_v24, %v6375_v62  ;;  %v1973_v28 = vmul.f32 1.442695, %v1961_v55  ;;  %v2259_v55 = vmul.f32 %v5379_v1, %v6374_v3 }
 0x6c8   : >> { %v5474_v31 = vpop.permute.xlu1 %2155  ;;  %2739 = vperm.xlu0 %4195, %v5292_v11   ;;  %v5478_v40 = vmul.f32 %v5432_v29, %v2313_v54  ;;  %v2035_v62 = vmul.f32 %v5411_v30, %v2002_v20 }
 0x6c9   : >> { %6389 = vst [vmem:[#allocation45_spill] sm:$0xff] %v5472_v37  ;;  %4186 = vset.pattern.permute.xlu1 %v6385_v26  ;;  %v2126_v39 = vmul.f32 1.442695, %v2116_v36  ;;  %4226 = vpow2.f32 %v1973_v28  ;;  %v6391_v28 = vmov 2   ;;  %v2271_v60 = vmul.f32 1.442695, %v2259_v55 }
 0x6ca   : >> { %2081 = vperm.xlu1 %4186, %v5321_v18  }
 0x6cb   : >> { %4228 = vpow2.f32 %v2126_v39  ;;  %v2400_v39 = vmul.f32 %v5391_v35, %v6374_v3 }
 0x6cc   : >> { %2767 = vperm.xlu0 %4195, %v5301_v13  }
 0x6cd   : >> { %v5485_v41 = vpop.permute.xlu1 %2296 }
 0x6ce   : >> { %4187 = vset.pattern.permute.xlu1 %v6383_v32  ;;  %v1960_v32 = vmul.f32 %v5362_v22, %v6373_v0 }
 0x6cf   : >> { %2223 = vperm.xlu1 %4187, %v5321_v18   ;;  %v2341_v54 = vpop.permute.xlu0 %2340 }
 0x6d0   : >> { %v5491_v53 = vmul.f32 %v2341_v54, %v2331_v27  ;;  %2775 = vperm.xlu0 %4195, %v5308_v15   ;;  %v2130_v27 = vmul.f32 1.442695, %v2118_v50  ;;  %v4225_v54 = vpop.eup %4224  ;;  %v2267_v50 = vmul.f32 1.442695, %v2257_v45 }
 0x6d1   : >> { %v1983_v57 = vmul.f32 %v4560_v52, %v4225_v54  ;;  %v2412_v52 = vmul.f32 1.442695, %v2400_v39 }
 0x6d2   : >> { %6390 = vst [vmem:[#allocation46_spill] sm:$0xff] %v5491_v53  ;;  %v5496_v37 = vpop.permute.xlu1 %2006  ;;  %v1962_v53 = vmul.f32 %v5362_v22, %v5198_v5  ;;  %4230 = vpow2.f32 %v2130_v27 }
 0x6d3   : >> { %4188 = vset.pattern.permute.xlu1 %v6385_v26  ;;  %v1971_v26 = vmul.f32 1.442695, %v1960_v32  ;;  %v2117_v32 = vmul.f32 %v5372_v24, %v6373_v0  ;;  %v4227_v27 = vpop.eup %4226  ;;  %v5525_v45 = vadd.f32 %v2035_v62, %v1983_v57 }
 0x6d4   : >> { %2783 = vperm.xlu0 %4195, %v5317_v17   ;;  %2086 = vperm.xlu1 %4188, %v5324_v19   ;;  %v1975_v34 = vmul.f32 1.442695, %v1962_v53  ;;  %v1985_v54 = vmul.f32 %v4552_v49, %v4227_v27  ;;  %v2258_v49 = vmul.f32 %v5379_v1, %v6373_v0 }
 0x6d5   : >> { %4232 = vpow2.f32 %v1971_v26  ;;  %6392 = vst [vmem:[#allocation47_spill] sm:$0xff] %v5525_v45  ;;  %v2128_v20 = vmul.f32 1.442695, %v2117_v32  ;;  %v4229_v55 = vpop.eup %4228  ;;  %v2119_v26 = vmul.f32 %v5372_v24, %v5198_v5  ;;  %v6283_v32 = vsub.s32 4, %v5128_v33 }
 0x6d6   : >> { %4234 = vpow2.f32 %v2267_v50  ;;  %v2140_v57 = vmul.f32 %v4229_v55, %v5525_v45 }
 0x6d7   : >> { %v5507_v36 = vpop.permute.xlu1 %2159  ;;  %4236 = vpow2.f32 %v2271_v60  ;;  %v1963_v60 = vmul.f32 %v5362_v22, %v5200_v7  ;;  %v2132_v39 = vmul.f32 1.442695, %v2119_v26  ;;  %v2260_v26 = vmul.f32 %v5379_v1, %v5198_v5 }
 0x6d8   : >> { %2791 = vperm.xlu0 %4195, %v5324_v19   ;;  %4189 = vset.pattern.permute.xlu1 %v6391_v28  ;;  %4238 = vpow2.f32 %v1975_v34  ;;  %v2184_v34 = vmul.f32 %v5420_v43, %v5474_v31 }
 0x6d9   : >> { %2344 = vperm.xlu1 %4189, %v5301_v13   ;;  %4240 = vpow2.f32 %v2412_v52  ;;  %v1977_v3 = vmul.f32 1.442695, %v1963_v60  ;;  %v5554_v13 = vrot.slane %v5355_v21, %v6283_v32  ;;  %v2036_v60 = vmul.f32 %v5411_v30, %v5496_v37 }
 0x6da   : >> { %4242 = vpow2.f32 %v2128_v20  ;;  %v5546_v20 = vadd.f32 %v2184_v34, %v2140_v57  ;;  %v6394_v57 = vmov 3   ;;  %v2273_v32 = vmul.f32 1.442695, %v2260_v26 }
 0x6db   : >> { %4244 = vpow2.f32 %v2132_v39  ;;  %v2120_v39 = vmul.f32 %v5372_v24, %v5200_v7 }
 0x6dc   : >> { %v5520_v28 = vpop.permute.xlu1 %2300  ;;  %4198 = vset.pattern.permute.xlu0 %v6275_v42  ;;  %v4231_v62 = vpop.eup %4230  ;;  %4246 = vpow2.f32 %v1977_v3  ;;  %v2537_v3 = vmul.f32 %v5554_v13, %v6372_v58 }
 0x6dd   : >> { %2856 = vperm.xlu0 %4198, %v5266_v61   ;;  %2352 = vperm.xlu1 %4189, %v5308_v15  }
 0x6df   : >> { %v4233_v27 = vpop.eup %4232 }
 0x6e0   : >> { %v4235_v31 = vpop.eup %4234  ;;  %v1984_v25 = vmul.f32 %v4556_v51, %v4233_v27  ;;  %v2325_v51 = vmul.f32 %v5432_v29, %v5485_v41 }
 0x6e1   : >> { %v2012_v42 = vpop.permute.xlu1 %2011  ;;  %2868 = vperm.xlu0 %4198, %v5280_v6   ;;  %2360 = vperm.xlu1 %4189, %v5317_v17  }
 0x6e2   : >> { %v2037_v53 = vmul.f32 %v5411_v30, %v2012_v42  ;;  %v2216_v42 = vpop.permute.xlu0 %2215 }
 0x6e4   : >> { %v5540_v50 = vadd.f32 %v2037_v53, %v1985_v54  ;;  %v4237_v54 = vpop.eup %4236  ;;  %v2269_v53 = vmul.f32 1.442695, %v2258_v49  ;;  %v2399_v49 = vmul.f32 %v5391_v35, %v6373_v0 }
 0x6e5   : >> { %2876 = vperm.xlu0 %4198, %v5287_v10   ;;  %2368 = vperm.xlu1 %4189, %v5324_v19   ;;  %v4239_v34 = vpop.eup %4238 }
 0x6e6   : >> { %6393 = vst [vmem:[#allocation48_spill] sm:$0xff] %v5540_v50  ;;  %v2164_v52 = vpop.permute.xlu1 %2163  ;;  %v2142_v55 = vmul.f32 %v4231_v62, %v5540_v50  ;;  %4248 = vpow2.f32 %v2269_v53  ;;  %v5575_v50 = vadd.f32 %v2036_v60, %v1984_v25  ;;  %v2134_v53 = vmul.f32 1.442695, %v2120_v39 }
 0x6e7   : >> { %v2186_v45 = vmul.f32 %v5420_v43, %v2164_v52  ;;  %v2281_v52 = vmul.f32 %v4235_v31, %v5546_v20  ;;  %v1964_v31 = vmul.f32 %v5362_v22, %v6370_v8  ;;  %v2401_v25 = vmul.f32 %v5391_v35, %v5198_v5 }
 0x6e8   : >> { %4250 = vpow2.f32 %v2273_v32 }
 0x6e9   : >> { %v2194_v62 = vadd.f32 %v2186_v45, %v2142_v55  ;;  %2904 = vperm.xlu0 %4198, %v5296_v12   ;;  %4192 = vset.pattern.permute.xlu1 %v6394_v57  ;;  %v4241_v57 = vpop.eup %4240  ;;  %v5584_v26 = vadd.f32 %v2325_v51, %v2281_v52  ;;  %v1979_v32 = vmul.f32 1.442695, %v1964_v31  ;;  %4252 = vpow2.f32 %v2134_v53 }
 0x6ea   : >> { %2433 = vperm.xlu1 %4192, %v5266_v61   ;;  %v4243_v21 = vpop.eup %4242  ;;  %v1986_v61 = vmul.f32 %v4548_v48, %v4239_v34  ;;  %v2261_v48 = vmul.f32 %v5379_v1, %v5200_v7 }
 0x6eb   : >> { %v5568_v27 = vmul.f32 %v2216_v42, %v2194_v62  ;;  %v2017_v37 = vpop.permute.xlu1 %2016  ;;  %v5570_v45 = vpop.permute.xlu0 %2227  ;;  %v2283_v55 = vmul.f32 %v4237_v54, %v2194_v62  ;;  %v2410_v54 = vmul.f32 1.442695, %v2399_v49  ;;  %v2141_v22 = vmul.f32 %v4243_v21, %v5575_v50 }
 0x6ec   : >> { %v2038_v41 = vmul.f32 %v5411_v30, %v2017_v37  ;;  %v2540_v37 = vmul.f32 %v5554_v13, %v6373_v0  ;;  %v2185_v49 = vmul.f32 %v5420_v43, %v5507_v36  ;;  %v4245_v52 = vpop.eup %4244  ;;  %v2121_v21 = vmul.f32 %v5372_v24, %v6370_v8 }
 0x6ed   : >> { %2916 = vperm.xlu0 %4198, %v5308_v15   ;;  %v2335_v42 = vadd.f32 %v5459_v44, %v2283_v55  ;;  %v2545_v44 = vmul.f32 1.442695, %v2537_v3  ;;  %v2402_v55 = vmul.f32 %v5391_v35, %v5200_v7  ;;  %4254 = vpow2.f32 %v2410_v54 }
 0x6ee   : >> { %2437 = vperm.xlu1 %4192, %v5272_v2   ;;  %v5597_v39 = vadd.f32 %v2038_v41, %v1986_v61  ;;  %v2414_v36 = vmul.f32 1.442695, %v2401_v25  ;;  %v2275_v61 = vmul.f32 1.442695, %v2261_v48  ;;  %v2551_v41 = vmul.f32 1.442695, %v2540_v37 }
 0x6ef   : >> { %v5590_v60 = vmul.f32 %v4241_v57, %v2335_v42  ;;  %v4247_v57 = vpop.eup %4246  ;;  %4256 = vpow2.f32 %v2545_v44  ;;  %v5610_v0 = vadd.f32 %v2185_v49, %v2141_v22  ;;  %v6292_v24 = vmov 7  }
 0x6f0   : >> { %v2168_v62 = vpop.permute.xlu1 %2167  ;;  %v2349_v34 = vpop.permute.xlu0 %2348  ;;  %v2143_v31 = vmul.f32 %v4245_v52, %v5597_v39  ;;  %4258 = vpow2.f32 %v1979_v32  ;;  %v2416_v25 = vmul.f32 1.442695, %v2402_v55  ;;  %v2136_v48 = vmul.f32 1.442695, %v2121_v21 }
 0x6f1   : >> { %6395 = vst [vmem:[#allocation49_spill] sm:$0xff] %v5590_v60  ;;  %v5600_v51 = vmul.f32 %v2349_v34, %v5584_v26  ;;  %2920 = vperm.xlu0 %4198, %v5312_v16   ;;  %v2542_v34 = vmul.f32 %v5554_v13, %v5198_v5  ;;  %v2187_v53 = vmul.f32 %v5420_v43, %v2168_v62  ;;  %v4249_v54 = vpop.eup %4248  ;;  %4260 = vpow2.f32 %v2275_v61 }
 0x6f2   : >> { %2445 = vperm.xlu1 %4192, %v5280_v6   ;;  %v2262_v62 = vmul.f32 %v5379_v1, %v6370_v8  ;;  %4262 = vpow2.f32 %v2414_v36  ;;  %v2282_v22 = vmul.f32 %v4249_v54, %v5610_v0  ;;  %v2326_v49 = vmul.f32 %v5432_v29, %v5520_v28  ;;  %v4251_v32 = vpop.eup %4250 }
 0x6f3   : >> { %v2555_v37 = vmul.f32 1.442695, %v2542_v34  ;;  %v5627_v52 = vadd.f32 %v2187_v53, %v2143_v31  ;;  %4264 = vpow2.f32 %v2551_v41  ;;  %v5633_v1 = vrot.slane %v5403_v56, %v6371_v38  ;;  %v4253_v21 = vpop.eup %4252 }
 0x6f4   : >> { %v2357_v3 = vpop.permute.xlu0 %2356  ;;  %4266 = vpow2.f32 %v2416_v25  ;;  %v2277_v36 = vmul.f32 1.442695, %v2262_v62  ;;  %v2403_v28 = vmul.f32 %v5391_v35, %v6370_v8 }
 0x6f5   : >> { %v5614_v58 = vmul.f32 %v2357_v3, %v2335_v42  ;;  %v2309_v60 = vpop.permute.xlu1 %2308  ;;  %4204 = vset.pattern.permute.xlu0 %v6292_v24  ;;  %v1987_v42 = vmul.f32 %v4544_v47, %v4247_v57  ;;  %4268 = vpow2.f32 %v2136_v48  ;;  %v5638_v57 = vadd.f32 %v2326_v49, %v2282_v22 }
 0x6f6   : >> { %2993 = vperm.xlu0 %4204, %v5262_v59   ;;  %2453 = vperm.xlu1 %4192, %v5287_v10   ;;  %4270 = vpow2.f32 %v2555_v37  ;;  %v2284_v3 = vmul.f32 %v4251_v32, %v5627_v52  ;;  %v2328_v41 = vmul.f32 %v5432_v29, %v2309_v60 }
 0x6f7   : >> { %v4255_v61 = vpop.eup %4254  ;;  %4272 = vpow2.f32 %v2277_v36 }
 0x6f8   : >> { %v5619_v44 = vpop.permute.xlu0 %2364  ;;  %v2423_v32 = vmul.f32 %v4255_v61, %v5638_v57 }
 0x6f9   : >> { %v4257_v53 = vpop.eup %4256 }
 0x6fa   : >> { %v2022_v55 = vpop.permute.xlu1 %2021  ;;  %3045 = vperm.xlu0 %4204, %v5296_v12   ;;  %2481 = vperm.xlu1 %4192, %v5296_v12   ;;  %v4259_v62 = vpop.eup %4258 }
 0x6fb   : >> { %v2039_v47 = vmul.f32 %v5411_v30, %v2022_v55  ;;  %v4261_v60 = vpop.eup %4260  ;;  %v2418_v55 = vmul.f32 1.442695, %v2403_v28 }
 0x6fd   : >> { %v2430_v34 = vpop.permute.xlu0 %2429  ;;  %v5642_v31 = vadd.f32 %v2039_v47, %v1987_v42  ;;  %v5652_v42 = vadd.f32 %v2328_v41, %v2284_v3  ;;  %v2544_v47 = vmul.f32 %v5554_v13, %v6370_v8  ;;  %v1988_v41 = vmul.f32 %v4540_v46, %v4259_v62 }
 0x6fe   : >> { %v2464_v54 = vmul.f32 %v5633_v1, %v2430_v34  ;;  %3009 = vperm.xlu0 %4204, %v5280_v6   ;;  %2489 = vperm.xlu1 %4192, %v5305_v14   ;;  %v4263_v34 = vpop.eup %4262  ;;  %4274 = vpow2.f32 %v2418_v55 }
 0x6ff   : >> { %v2172_v25 = vpop.permute.xlu1 %2171  ;;  %v2144_v48 = vmul.f32 %v4253_v21, %v5642_v31  ;;  %v4265_v3 = vpop.eup %4264  ;;  %v2425_v8 = vmul.f32 %v4263_v34, %v5652_v42  ;;  %v2559_v62 = vmul.f32 1.442695, %v2544_v47  ;;  %v6397_v47 = vmov 4  }
 0x700   : >> { %v2188_v37 = vmul.f32 %v5420_v43, %v2172_v25  ;;  %v5650_v22 = vadd.f32 %v2464_v54, %v5452_v63  ;;  %v4267_v61 = vpop.eup %4266 }
 0x701   : >> { %v2442_v49 = vpop.permute.xlu0 %2441  ;;  %v4269_v24 = vpop.eup %4268  ;;  %4276 = vpow2.f32 %v2559_v62 }
 0x702   : >> { %v2467_v21 = vmul.f32 %v5633_v1, %v2442_v49  ;;  %3061 = vperm.xlu0 %4204, %v5312_v16   ;;  %2497 = vperm.xlu1 %4192, %v5312_v16   ;;  %v5660_v36 = vadd.f32 %v2188_v37, %v2144_v48  ;;  %v5663_v63 = vmul.f32 %v4257_v53, %v5650_v22  ;;  %v4271_v48 = vpop.eup %4270 }
 0x704   : >> { %6396 = vst [vmem:[#allocation50_spill] sm:$0xff] %v5663_v63  ;;  %v2027_v28 = vpop.permute.xlu1 %2026  ;;  %v2475_v54 = vadd.f32 %v2467_v21, %v2423_v32  ;;  %v2285_v25 = vmul.f32 %v4261_v60, %v5660_v36 }
 0x705   : >> { %v2040_v49 = vmul.f32 %v5411_v30, %v2027_v28  ;;  %v2450_v38 = vpop.permute.xlu0 %2449  ;;  %v4273_v28 = vpop.eup %4272 }
 0x706   : >> { %v2469_v37 = vmul.f32 %v5633_v1, %v2450_v38  ;;  %3065 = vperm.xlu0 %4204, %v5317_v17   ;;  %2505 = vperm.xlu1 %4192, %v5321_v18   ;;  %v2337_v46 = vadd.f32 %v5478_v40, %v2285_v25  ;;  %v5673_v53 = vmul.f32 %v4265_v3, %v2475_v54 }
 0x707   : >> { %v5675_v60 = vadd.f32 %v2040_v49, %v1988_v41 }
 0x708   : >> { %v2477_v32 = vadd.f32 %v2469_v37, %v2425_v8  ;;  %v5678_v30 = vmul.f32 %v5619_v44, %v2337_v46  ;;  %v5680_v34 = vmul.f32 %v4267_v61, %v2337_v46 }
 0x709   : >> { %v2176_v55 = vpop.permute.xlu1 %2175  ;;  %v2145_v38 = vmul.f32 %v4269_v24, %v5675_v60  ;;  %v2458_v21 = vpop.permute.xlu0 %2457 }
 0x70a   : >> { %v2189_v63 = vmul.f32 %v5420_v43, %v2176_v55  ;;  %v2471_v40 = vmul.f32 %v5633_v1, %v2458_v21  ;;  %3069 = vperm.xlu0 %4204, %v5321_v18   ;;  %4193 = vset.pattern.permute.xlu1 %v6397_v47  ;;  %v5687_v3 = vmul.f32 %v4271_v48, %v2477_v32  ;;  %v4275_v43 = vpop.eup %4274 }
 0x70b   : >> { %2570 = vperm.xlu1 %4193, %v5262_v59   ;;  %v4277_v46 = vpop.eup %4276 }
 0x70c   : >> { %6398 = vst [vmem:[#allocation51_spill] sm:$0xff] %v5687_v3  ;;  %v2197_v8 = vadd.f32 %v2189_v63, %v2145_v38 }
 0x70d   : >> { %v5690_v44 = vpop.permute.xlu0 %2485 }
 0x70e   : >> { %v5693_v24 = vmul.f32 %v5570_v45, %v2197_v8  ;;  %v2317_v41 = vpop.permute.xlu1 %2316  ;;  %v2286_v61 = vmul.f32 %v4273_v28, %v2197_v8  ;;  %3073 = vperm.xlu0 %4204, %v5324_v19  }
 0x70f   : >> { %v2330_v25 = vmul.f32 %v5432_v29, %v2317_v41  ;;  %2578 = vperm.xlu1 %4193, %v5272_v2  }
 0x711   : >> { %v5698_v49 = vadd.f32 %v2330_v25, %v2286_v61  ;;  %v2494_v48 = vpop.permute.xlu0 %2493 }
 0x712   : >> { %v5700_v37 = vmul.f32 %v2494_v48, %v2475_v54  ;;  %v6400_v54 = vsub.s32 4, %v5128_v33  ;;  %v6402_v48 = vld [vmem:[#allocation39_spill] sm:$0xff] }
 0x713   : >> { %v2052_v63 = vpop.permute.xlu1 %2051  ;;  %2582 = vperm.xlu1 %4193, %v5276_v4   ;;  %v2427_v45 = vmul.f32 %v4275_v43, %v5698_v49 }
 0x714   : >> { %v5715_v8 = vrot.slane %v5403_v56, %v6400_v54 }
 0x715   : >> { %v2502_v62 = vpop.permute.xlu0 %2501  ;;  %v2479_v55 = vadd.f32 %v2471_v40, %v2427_v45  ;;  %v2089_v40 = vmul.f32 %v2052_v63, %v5424_v23 }
 0x716   : >> { %v5704_v38 = vmul.f32 %v2502_v62, %v2477_v32  ;;  %v6401_v32 = vld [vmem:[#allocation42_spill] sm:$0xff] }
 0x717   : >> { %2590 = vperm.xlu1 %4193, %v5284_v9   ;;  %v5707_v29 = vmul.f32 %v4277_v46, %v2479_v55 }
 0x718   : >> { %v2200_v21 = vpop.permute.xlu1 %2199 }
 0x719   : >> { %6399 = vst [vmem:[#allocation52_spill] sm:$0xff] %v5707_v29  ;;  %v2510_v28 = vpop.permute.xlu0 %2509  ;;  %v6404_v29 = vld [vmem:[#allocation43_spill] sm:$0xff] }
 0x71a   : >> { %v5709_v47 = vmul.f32 %v2510_v28, %v2479_v55  ;;  %v6403_v55 = vld [vmem:[#allocation41_spill] sm:$0xff] }
 0x71b   : >> { %2598 = vperm.xlu1 %4193, %v5292_v11   ;;  %v2230_v28 = vmul.f32 %v2200_v21, %v6403_v55 }
 0x71d   : >> { %v2057_v41 = vpop.permute.xlu1 %2056 }
 0x71e   : >> { %v2090_v61 = vmul.f32 %v2057_v41, %v6401_v32  ;;  %v2575_v43 = vpop.permute.xlu0 %2574 }
 0x71f   : >> { %v5720_v25 = vmul.f32 %v5715_v8, %v2575_v43  ;;  %2626 = vperm.xlu1 %4193, %v6402_v48  }
 0x720   : >> { %v2097_v45 = vadd.f32 %v2090_v61, %v2089_v40  ;;  %v6405_v40 = vld [vmem:[#allocation47_spill] sm:$0xff] }
 0x722   : >> { %v2204_v46 = vpop.permute.xlu1 %2203  ;;  %v2587_v62 = vpop.permute.xlu0 %2586 }
 0x723   : >> { %v2231_v3 = vmul.f32 %v2204_v46, %v6404_v29  ;;  %v5726_v56 = vmul.f32 %v5715_v8, %v2587_v62  ;;  %2634 = vperm.xlu1 %4193, %v5308_v15   ;;  %v6406_v46 = vmov 5   ;;  %v6407_v62 = vld [vmem:[#allocation38_spill] sm:$0xff] }
 0x725   : >> { %v2238_v23 = vadd.f32 %v2231_v3, %v2230_v28 }
 0x726   : >> { %v2595_v63 = vpop.permute.xlu0 %2594 }
 0x727   : >> { %v5730_v54 = vmul.f32 %v5715_v8, %v2595_v63  ;;  %v2062_v41 = vpop.permute.xlu1 %2061  ;;  %2642 = vperm.xlu1 %4193, %v5317_v17  }
 0x728   : >> { %v2091_v32 = vmul.f32 %v2062_v41, %v6405_v40 }
 0x72a   : >> { %v2098_v61 = vadd.f32 %v2097_v45, %v2091_v32 }
 0x72b   : >> { %2650 = vperm.xlu1 %4193, %v5324_v19  }
 0x72c   : >> { %v2208_v21 = vpop.permute.xlu1 %2207 }
 0x72d   : >> { %v2232_v29 = vmul.f32 %v2208_v21, %v5546_v20 }
 0x72f   : >> { %v2239_v43 = vadd.f32 %v2238_v23, %v2232_v29  ;;  %4196 = vset.pattern.permute.xlu1 %v6406_v46  ;;  %v6408_v23 = vld [vmem:[#allocation48_spill] sm:$0xff]  ;;  %v5747_v46 = vpop.permute.xlu0 %2622 }
 0x730   : >> { %2715 = vperm.xlu1 %4196, %v6407_v62  }
 0x731   : >> { %v2067_v3 = vpop.permute.xlu1 %2066 }
 0x732   : >> { %v2092_v55 = vmul.f32 %v2067_v3, %v5575_v50 }
 0x733   : >> { %v5752_v3 = vpop.permute.xlu0 %2630 }
 0x734   : >> { %v2099_v28 = vadd.f32 %v2098_v61, %v2092_v55  ;;  %2719 = vperm.xlu1 %4196, %v5272_v2  }
 0x736   : >> { %v2212_v63 = vpop.permute.xlu1 %2211 }
 0x737   : >> { %v2233_v41 = vmul.f32 %v2212_v63, %v5610_v0  ;;  %v5757_v63 = vpop.permute.xlu0 %2638 }
 0x738   : >> { %2727 = vperm.xlu1 %4196, %v5280_v6  }
 0x739   : >> { %v2240_v45 = vadd.f32 %v2239_v43, %v2233_v41  ;;  %v6409_v41 = vmov 6  }
 0x73b   : >> { %v2072_v40 = vpop.permute.xlu1 %2071  ;;  %v2241_v20 = vadd.f32 %v2240_v45, %v5568_v27 }
 0x73c   : >> { %v2093_v32 = vmul.f32 %v2072_v40, %v6408_v23  ;;  %2735 = vperm.xlu1 %4196, %v5287_v10   ;;  %v6298_v23 = vsub.s32 5, %v5128_v33 }
 0x73e   : >> { %v2100_v21 = vadd.f32 %v2099_v28, %v2093_v32 }
 0x73f   : >> { %v2077_v29 = vpop.permute.xlu1 %2076 }
 0x740   : >> { %v2094_v50 = vmul.f32 %v2077_v29, %v5597_v39  ;;  %2763 = vperm.xlu1 %4196, %v5296_v12  }
 0x742   : >> { %v2101_v61 = vadd.f32 %v2100_v21, %v2094_v50  ;;  %v6411_v21 = vld [vmem:[#allocation40_spill] sm:$0xff] }
 0x743   : >> { %v5770_v29 = vrot.slane %v6411_v21, %v6298_v23 }
 0x744   : >> { %v2220_v0 = vpop.permute.xlu1 %2219  ;;  %2771 = vperm.xlu1 %4196, %v5305_v14  }
 0x745   : >> { %v2235_v6 = vmul.f32 %v2220_v0, %v5627_v52  ;;  %v6413_v0 = vld [vmem:[#allocation44_spill] sm:$0xff] }
 0x747   : >> { %v2242_v43 = vadd.f32 %v2241_v20, %v2235_v6 }
 0x748   : >> { %2779 = vperm.xlu1 %4196, %v5312_v16  }
 0x749   : >> { %v2082_v27 = vpop.permute.xlu1 %2081 }
 0x74a   : >> { %v2095_v55 = vmul.f32 %v2082_v27, %v5642_v31  ;;  %v5764_v31 = vpop.permute.xlu0 %2646 }
 0x74b   : >> { %6410 = vst [vmem:[#allocation42_spill] sm:$0xff] %v5764_v31 }
 0x74c   : >> { %v2102_v28 = vadd.f32 %v2101_v61, %v2095_v55  ;;  %2787 = vperm.xlu1 %4196, %v5321_v18  }
 0x74e   : >> { %v2224_v12 = vpop.permute.xlu1 %2223 }
 0x74f   : >> { %v2236_v39 = vmul.f32 %v2224_v12, %v5660_v36  ;;  %v6415_v12 = vld [vmem:[#allocation46_spill] sm:$0xff] }
 0x750   : >> { %4197 = vset.pattern.permute.xlu1 %v6409_v41 }
 0x751   : >> { %v2243_v45 = vadd.f32 %v2242_v43, %v2236_v39  ;;  %2852 = vperm.xlu1 %4197, %v5262_v59   ;;  %v6414_v43 = vld [vmem:[#allocation33_spill] sm:$0xff] }
 0x752   : >> { %v2538_v27 = vmul.f32 %v5554_v13, %v6414_v43 }
 0x753   : >> { %v2244_v16 = vadd.f32 %v2243_v45, %v5693_v24  ;;  %v2087_v52 = vpop.permute.xlu1 %2086  ;;  %v6412_v24 = vld [vmem:[#allocation34_spill] sm:$0xff] }
 0x754   : >> { %v2096_v40 = vmul.f32 %v2087_v52, %v5675_v60  ;;  %v2398_v61 = vmul.f32 %v5391_v35, %v6412_v24  ;;  %v2539_v45 = vmul.f32 %v5554_v13, %v6412_v24 }
 0x755   : >> { %v2245_v20 = vrot.slane %v2244_v16, 4  ;;  %2860 = vperm.xlu1 %4197, %v5272_v2  }
 0x756   : >> { %v2103_v36 = vadd.f32 %v2102_v28, %v2096_v40  ;;  %v2408_v35 = vmul.f32 1.442695, %v2398_v61 }
 0x757   : >> { %v2246_v32 = vadd.f32 %v2245_v20, %v2244_v16  ;;  %v5781_v16 = vpop.permute.xlu0 %2711  ;;  %v2679_v20 = vmul.f32 %v5770_v29, %v6414_v43 }
 0x758   : >> { %v2104_v59 = vrot.slane %v2103_v36, 4  ;;  %v2345_v50 = vpop.permute.xlu1 %2344  ;;  %4278 = vpow2.f32 %v2408_v35  ;;  %v2543_v35 = vmul.f32 %v5554_v13, %v5200_v7 }
 0x759   : >> { %v2247_v60 = vrot.slane %v2246_v32, 2  ;;  %v2372_v6 = vmul.f32 %v2345_v50, %v6413_v0  ;;  %2864 = vperm.xlu1 %4197, %v5276_v4   ;;  %v2549_v0 = vmul.f32 1.442695, %v2539_v45  ;;  %v2688_v23 = vmul.f32 1.442695, %v2679_v20 }
 0x75a   : >> { %v2105_v55 = vadd.f32 %v2104_v59, %v2103_v36  ;;  %v2547_v36 = vmul.f32 1.442695, %v2538_v27  ;;  %v6417_v20 = vmov 7  }
 0x75b   : >> { %v2248_v28 = vadd.f32 %v2247_v60, %v2246_v32  ;;  %v2379_v39 = vadd.f32 %v2372_v6, %v6415_v12  ;;  %v5793_v27 = vpop.permute.xlu0 %2723 }
 0x75c   : >> { %v2106_v52 = vrot.slane %v2105_v55, 2  ;;  %v2353_v40 = vpop.permute.xlu1 %2352  ;;  %4280 = vpow2.f32 %v2547_v36  ;;  %v2557_v36 = vmul.f32 1.442695, %v2543_v35 }
 0x75d   : >> { %v2374_v21 = vmul.f32 %v2353_v40, %v5638_v57  ;;  %v2380_v50 = vadd.f32 %v2379_v39, %v5600_v51  ;;  %2872 = vperm.xlu1 %4197, %v5284_v9   ;;  %v2249_v32 = vrot.slane %v2248_v28, 1  ;;  %v6416_v57 = vld [vmem:[#allocation36_spill] sm:$0xff]  ;;  %4282 = vpow2.f32 %v2549_v0 }
 0x75e   : >> { %v2107_v59 = vadd.f32 %v2106_v52, %v2105_v55  ;;  %v2541_v51 = vmul.f32 %v5554_v13, %v6416_v57  ;;  %4284 = vpow2.f32 %v2688_v23 }
 0x75f   : >> { %v2381_v60 = vadd.f32 %v2380_v50, %v2374_v21  ;;  %v2250_v55 = vadd.f32 %v2249_v32, %v2248_v28  ;;  %v2682_v50 = vmul.f32 %v5770_v29, %v6416_v57  ;;  %v5803_v28 = vpop.permute.xlu0 %2731 }
 0x760   : >> { %v2108_v6 = vrot.slane %v2107_v59, 1  ;;  %v2361_v12 = vpop.permute.xlu1 %2360  ;;  %v2553_v21 = vmul.f32 1.442695, %v2541_v51 }
 0x761   : >> { %v2376_v61 = vmul.f32 %v2361_v12, %v5652_v42  ;;  %v2382_v31 = vadd.f32 %v2381_v60, %v5614_v58  ;;  %2880 = vperm.xlu1 %4197, %v5292_v11   ;;  %v2694_v13 = vmul.f32 1.442695, %v2682_v50 }
 0x762   : >> { %v2109_v39 = vadd.f32 %v2108_v6, %v2107_v59  ;;  %4286 = vpow2.f32 %v2553_v21  ;;  %v6418_v6 = vld [vmem:[#allocation45_spill] sm:$0xff] }
 0x763   : >> { %v2383_v45 = vadd.f32 %v2382_v31, %v2376_v61  ;;  %4288 = vpow2.f32 %v2557_v36 }
 0x764   : >> { %v3098_v52 = vsel %vm3097_vm15, %v2109_v39, %v2250_v55  ;;  %v2369_v40 = vpop.permute.xlu1 %2368  ;;  %4290 = vpow2.f32 %v2694_v13 }
 0x765   : >> { %v2378_v58 = vmul.f32 %v2369_v40, %v5698_v49  ;;  %v2384_v42 = vadd.f32 %v2383_v45, %v5678_v30  ;;  %4199 = vset.pattern.permute.xlu1 %v6417_v20  ;;  %v2684_v49 = vmul.f32 %v5770_v29, %v5200_v7  ;;  %v4279_v30 = vpop.eup %4278  ;;  %v5810_v45 = vpop.permute.xlu0 %2739 }
 0x766   : >> { %2997 = vperm.xlu1 %4199, %v6407_v62   ;;  %v4281_v60 = vpop.eup %4280  ;;  %v2422_v35 = vmul.f32 %v4279_v30, %v5584_v26 }
 0x767   : >> { %v2385_v31 = vadd.f32 %v2384_v42, %v2378_v58  ;;  %v4283_v12 = vpop.eup %4282  ;;  %v2698_v55 = vmul.f32 1.442695, %v2684_v49 }
 0x768   : >> { %v4285_v39 = vpop.eup %4284 }
 0x769   : >> { %v2386_v32 = vrot.slane %v2385_v31, 4  ;;  %v2434_v59 = vpop.permute.xlu1 %2433  ;;  %4292 = vpow2.f32 %v2698_v55  ;;  %v5826_v49 = vpop.permute.xlu0 %2767 }
 0x76a   : >> { %v2465_v23 = vmul.f32 %v5633_v1, %v2434_v59  ;;  %3001 = vperm.xlu1 %4199, %v5272_v2  }
 0x76b   : >> { %v2387_v0 = vadd.f32 %v2386_v32, %v2385_v31 }
 0x76c   : >> { %v2473_v62 = vadd.f32 %v2465_v23, %v6418_v6  ;;  %v4287_v26 = vpop.eup %4286 }
 0x76d   : >> { %v2388_v61 = vrot.slane %v2387_v0, 2  ;;  %v2438_v51 = vpop.permute.xlu1 %2437 }
 0x76e   : >> { %v2466_v40 = vmul.f32 %v5633_v1, %v2438_v51  ;;  %4200 = vset.pattern.permute.xlu1 %v6409_v41  ;;  %v2562_v2 = vmul.f32 %v4281_v60, %v2473_v62  ;;  %v2817_v51 = vsub.s32 6, %v5128_v33 }
 0x76f   : >> { %v2389_v58 = vadd.f32 %v2388_v61, %v2387_v0  ;;  %2908 = vperm.xlu1 %4200, %v6402_v48   ;;  %v4289_v0 = vpop.eup %4288 }
 0x770   : >> { %v2474_v42 = vadd.f32 %v2466_v40, %v2422_v35  ;;  %v5817_v21 = vadd.f32 %v5720_v25, %v2562_v2  ;;  %v6419_v25 = vld [vmem:[#allocation49_spill] sm:$0xff]  ;;  %v4291_v61 = vpop.eup %4290  ;;  %v6420_v40 = vld [vmem:[#allocation32_spill] sm:$0xff]  ;;  %v5850_v2 = vpop.permute.xlu0 %2775 }
 0x771   : >> { %v2390_v50 = vrot.slane %v2389_v58, 1  ;;  %v2446_v31 = vpop.permute.xlu1 %2445  ;;  %v2678_v35 = vmul.f32 %v5770_v29, %v6420_v40 }
 0x772   : >> { %v2468_v36 = vmul.f32 %v5633_v1, %v2446_v31  ;;  %v5820_v32 = vmul.f32 %v4283_v12, %v2474_v42  ;;  %v5823_v59 = vmul.f32 %v4285_v39, %v5817_v21 }
 0x773   : >> { %v2391_v13 = vadd.f32 %v2390_v50, %v2389_v58  ;;  %4201 = vset.pattern.permute.xlu1 %v6417_v20  ;;  %v4293_v50 = vpop.eup %4292 }
 0x774   : >> { %3005 = vperm.xlu1 %4201, %v5276_v4   ;;  %v2476_v30 = vadd.f32 %v2468_v36, %v6419_v25  ;;  %v5841_v4 = vld [vmem:[%s1915_s26] sm:$0xff]  ;;  %v2686_v25 = vmul.f32 1.442695, %v2678_v35 }
 0x775   : >> { %v5830_v23 = vsel %vm3099_vm0, %v3098_v52, %v2391_v13  ;;  %v2454_v60 = vpop.permute.xlu1 %2453  ;;  %v5846_v52 = vrot.slane %v5841_v4, %v2817_v51  ;;  %v2680_v13 = vmul.f32 %v5770_v29, %v6412_v24 }
 0x776   : >> { %v2470_v6 = vmul.f32 %v5633_v1, %v2454_v60  ;;  %v2565_v12 = vmul.f32 %v4287_v26, %v2476_v30  ;;  %v5869_v60 = vpop.permute.xlu0 %2783  ;;  %4294 = vpow2.f32 %v2686_v25 }
 0x778   : >> { %3049 = vperm.xlu1 %4201, %v6402_v48   ;;  %v5836_v55 = vadd.f32 %v5726_v56, %v2565_v12  ;;  %v2478_v39 = vadd.f32 %v2470_v6, %v5680_v34  ;;  %v2513_v56 = vmul.f32 %v5690_v44, %v2473_v62  ;;  %v2819_v62 = vmul.f32 %v5846_v52, %v6420_v40  ;;  %v6421_v6 = vld [vmem:[#allocation35_spill] sm:$0xff] }
 0x779   : >> { %v2482_v1 = vpop.permute.xlu1 %2481  ;;  %v2681_v12 = vmul.f32 %v5770_v29, %v6421_v6 }
 0x77a   : >> { %v2512_v48 = vmul.f32 %v2482_v1, %v5650_v22  ;;  %v2567_v58 = vmul.f32 %v4289_v0, %v2478_v39  ;;  %v5855_v34 = vmul.f32 %v4291_v61, %v5836_v55  ;;  %v2690_v61 = vmul.f32 1.442695, %v2680_v13 }
 0x77b   : >> { %v2827_v35 = vmul.f32 1.442695, %v2819_v62 }
 0x77c   : >> { %v2520_v31 = vadd.f32 %v2513_v56, %v2512_v48  ;;  %4202 = vset.pattern.permute.xlu1 %v6409_v41  ;;  %v5859_v36 = vadd.f32 %v5730_v54, %v2567_v58  ;;  %v2692_v58 = vmul.f32 1.442695, %v2681_v12  ;;  %4296 = vpow2.f32 %v2690_v61 }
 0x77d   : >> { %2912 = vperm.xlu1 %4202, %v5305_v14   ;;  %v2490_v26 = vpop.permute.xlu1 %2489  ;;  %4298 = vpow2.f32 %v2827_v35 }
 0x77e   : >> { %v2514_v22 = vmul.f32 %v2490_v26, %v2474_v42  ;;  %v5865_v44 = vmul.f32 %v4293_v50, %v5859_v36  ;;  %v2683_v50 = vmul.f32 %v5770_v29, %v5198_v5  ;;  %4300 = vpow2.f32 %v2692_v58 }
 0x780   : >> { %v2521_v0 = vadd.f32 %v2520_v31, %v2514_v22  ;;  %v5878_v31 = vpop.permute.xlu0 %2791  ;;  %v6422_v22 = vld [vmem:[#allocation37_spill] sm:$0xff]  ;;  %v4295_v61 = vpop.eup %4294 }
 0x781   : >> { %4203 = vset.pattern.permute.xlu1 %v6417_v20  ;;  %v2498_v54 = vpop.permute.xlu1 %2497  ;;  %v2685_v25 = vmul.f32 %v5770_v29, %v6422_v22 }
 0x782   : >> { %v2516_v1 = vmul.f32 %v2498_v54, %v2476_v30  ;;  %v2522_v42 = vadd.f32 %v2521_v0, %v5700_v37  ;;  %3053 = vperm.xlu1 %4203, %v5305_v14   ;;  %v2822_v14 = vmul.f32 %v5846_v52, %v6421_v6  ;;  %v2696_v30 = vmul.f32 1.442695, %v2683_v50 }
 0x783   : >> { %v6423_v54 = vsub.s32 5, %v5128_v33  ;;  %v2700_v35 = vmul.f32 1.442695, %v2685_v25  ;;  %v2826_v50 = vmul.f32 %v5846_v52, %v6422_v22 }
 0x784   : >> { %v2523_v48 = vadd.f32 %v2522_v42, %v2516_v1  ;;  %v6424_v1 = vld [vmem:[#allocation50_spill] sm:$0xff]  ;;  %4302 = vpow2.f32 %v2696_v30 }
 0x785   : >> { %v2506_v56 = vpop.permute.xlu1 %2505 }
 0x786   : >> { %v2518_v26 = vmul.f32 %v2506_v56, %v2478_v39  ;;  %v2524_v13 = vadd.f32 %v2523_v48, %v5704_v38  ;;  %3013 = vperm.xlu1 %4203, %v5284_v9   ;;  %v2833_v39 = vmul.f32 1.442695, %v2822_v14  ;;  %v2824_v38 = vmul.f32 %v5846_v52, %v5198_v5  ;;  %v5892_v9 = vld [vmem:[%s1917_s14] sm:$0xff] }
 0x787   : >> { %v5897_v12 = vrot.slane %v5892_v9, %v6423_v54  ;;  %v2841_v54 = vmul.f32 1.442695, %v2826_v50 }
 0x788   : >> { %v2525_v37 = vadd.f32 %v2524_v13, %v2518_v26  ;;  %4304 = vpow2.f32 %v2833_v39  ;;  %v2837_v58 = vmul.f32 1.442695, %v2824_v38  ;;  %v4297_v26 = vpop.eup %4296 }
 0x789   : >> { %v2746_v13 = vmul.f32 %v5897_v12, %v5781_v16  ;;  %4306 = vpow2.f32 %v2700_v35 }
 0x78a   : >> { %v2526_v62 = vadd.f32 %v2525_v37, %v5709_v47  ;;  %3057 = vperm.xlu1 %4203, %v5308_v15   ;;  %v2571_v0 = vpop.permute.xlu1 %2570  ;;  %v5900_v47 = vpop.permute.xlu0 %2856  ;;  %4308 = vpow2.f32 %v2837_v58  ;;  %v2749_v58 = vmul.f32 %v5897_v12, %v5793_v27 }
 0x78b   : >> { %v2605_v29 = vmul.f32 %v5715_v8, %v2571_v0  ;;  %v4299_v0 = vpop.eup %4298  ;;  %4310 = vpow2.f32 %v2841_v54 }
 0x78c   : >> { %v2527_v15 = vrot.slane %v2526_v62, 4 }
 0x78d   : >> { %v5903_v42 = vadd.f32 %v2605_v29, %v6424_v1 }
 0x78e   : >> { %v2528_v48 = vadd.f32 %v2527_v15, %v2526_v62  ;;  %3017 = vperm.xlu1 %4203, %v5287_v10   ;;  %v2579_v56 = vpop.permute.xlu1 %2578  ;;  %v5915_v62 = vpop.permute.xlu0 %2868 }
 0x78f   : >> { %v2607_v14 = vmul.f32 %v5715_v8, %v2579_v56  ;;  %v2702_v37 = vmul.f32 %v4295_v61, %v5903_v42 }
 0x790   : >> { %v2529_v30 = vrot.slane %v2528_v48, 2 }
 0x791   : >> { %v2615_v25 = vadd.f32 %v2607_v14, %v5820_v32  ;;  %v5913_v10 = vadd.f32 %v2746_v13, %v2702_v37  ;;  %v4301_v32 = vpop.eup %4300  ;;  %v6425_v37 = vld [vmem:[#allocation51_spill] sm:$0xff] }
 0x792   : >> { %v2530_v39 = vadd.f32 %v2529_v30, %v2528_v48  ;;  %4205 = vset.pattern.permute.xlu1 %v6409_v41  ;;  %v2583_v38 = vpop.permute.xlu1 %2582  ;;  %v4303_v56 = vpop.eup %4302  ;;  %v2958_v30 = vsub.s32 7, %v5128_v33 }
 0x793   : >> { %v2608_v16 = vmul.f32 %v5715_v8, %v2583_v38  ;;  %2924 = vperm.xlu1 %4205, %v5317_v17   ;;  %v5920_v29 = vmul.f32 %v4297_v26, %v2615_v25  ;;  %v5923_v61 = vmul.f32 %v4299_v0, %v5913_v10  ;;  %v4305_v26 = vpop.eup %4304  ;;  %v5930_v13 = vpop.permute.xlu0 %2876 }
 0x794   : >> { %v2531_v15 = vrot.slane %v2530_v39, 1 }
 0x795   : >> { %v2616_v1 = vadd.f32 %v2608_v16, %v5673_v53 }
 0x796   : >> { %v2532_v35 = vadd.f32 %v2531_v15, %v2530_v39  ;;  %v2591_v48 = vpop.permute.xlu1 %2590  ;;  %v4307_v39 = vpop.eup %4306  ;;  %v6426_v15 = vld [vmem:[#allocation52_spill] sm:$0xff] }
 0x797   : >> { %v2610_v50 = vmul.f32 %v5715_v8, %v2591_v48  ;;  %4206 = vset.pattern.permute.xlu1 %v6417_v20  ;;  %v2705_v17 = vmul.f32 %v4301_v32, %v2616_v1  ;;  %v2751_v20 = vmul.f32 %v5897_v12, %v5803_v28 }
 0x798   : >> { %v5933_v14 = vsel %vm3101_vm1, %v5830_v23, %v2532_v35  ;;  %3021 = vperm.xlu1 %4206, %v5292_v11   ;;  %v4309_v23 = vpop.eup %4308  ;;  %v5950_v11 = vrot.slane %v5841_v4, %v2958_v30  ;;  %v5958_v35 = vpop.permute.xlu0 %2904 }
 0x799   : >> { %v5936_v53 = vadd.f32 %v2749_v58, %v2705_v17  ;;  %v2618_v0 = vadd.f32 %v2610_v50, %v6425_v37  ;;  %v4311_v50 = vpop.eup %4310  ;;  %v2655_v17 = vmul.f32 %v5752_v3, %v2615_v25 }
 0x79a   : >> { %v2599_v27 = vpop.permute.xlu1 %2598  ;;  %v2961_v37 = vmul.f32 %v5950_v11, %v6414_v43 }
 0x79b   : >> { %v2612_v38 = vmul.f32 %v5715_v8, %v2599_v27  ;;  %v2707_v54 = vmul.f32 %v4303_v56, %v2618_v0  ;;  %v5944_v16 = vmul.f32 %v4305_v26, %v5936_v53  ;;  %v2753_v8 = vmul.f32 %v5897_v12, %v5810_v45 }
 0x79c   : >> { %4207 = vset.pattern.permute.xlu1 %v6409_v41  ;;  %v2820_v41 = vmul.f32 %v5846_v52, %v6414_v43  ;;  %v2653_v56 = vmul.f32 %v5747_v46, %v5903_v42  ;;  %v2821_v46 = vmul.f32 %v5846_v52, %v6412_v24  ;;  %v2970_v25 = vmul.f32 1.442695, %v2961_v37 }
 0x79d   : >> { %2928 = vperm.xlu1 %4207, %v5321_v18   ;;  %v5953_v32 = vadd.f32 %v2751_v20, %v2707_v54  ;;  %v2620_v28 = vadd.f32 %v2612_v38, %v6426_v15  ;;  %v5979_v38 = vpop.permute.xlu0 %2916 }
 0x79e   : >> { %v2627_v48 = vpop.permute.xlu1 %2626  ;;  %v2829_v20 = vmul.f32 1.442695, %v2820_v41 }
 0x79f   : >> { %v2654_v4 = vmul.f32 %v2627_v48, %v5817_v21  ;;  %v2709_v58 = vmul.f32 %v4307_v39, %v2620_v28  ;;  %v5966_v18 = vmul.f32 %v4309_v23, %v5953_v32  ;;  %v2831_v23 = vmul.f32 1.442695, %v2821_v46  ;;  %v6427_v48 = vld [vmem:[#allocation42_spill] sm:$0xff] }
 0x7a0   : >> { %4312 = vpow2.f32 %v2829_v20  ;;  %v2966_v46 = vmul.f32 %v5950_v11, %v5200_v7 }
 0x7a1   : >> { %v2661_v26 = vadd.f32 %v2654_v4, %v2653_v56  ;;  %2932 = vperm.xlu1 %4207, %v5324_v19   ;;  %v5970_v45 = vadd.f32 %v2753_v8, %v2709_v58  ;;  %v2657_v19 = vmul.f32 %v5757_v63, %v5836_v55  ;;  %v2823_v8 = vmul.f32 %v5846_v52, %v6416_v57  ;;  %v5987_v41 = vpop.permute.xlu0 %2920 }
 0x7a2   : >> { %v2635_v27 = vpop.permute.xlu1 %2634  ;;  %v2659_v56 = vmul.f32 %v6427_v48, %v5859_v36  ;;  %4314 = vpow2.f32 %v2970_v25  ;;  %v2964_v63 = vmul.f32 %v5950_v11, %v6416_v57  ;;  %v5998_v57 = vrot.slane %v5892_v9, %v2817_v51 }
 0x7a3   : >> { %v2656_v21 = vmul.f32 %v2635_v27, %v2616_v1  ;;  %v2662_v42 = vadd.f32 %v2661_v26, %v2655_v17  ;;  %v5977_v39 = vmul.f32 %v4311_v50, %v5970_v45  ;;  %4316 = vpow2.f32 %v2831_v23 }
 0x7a4   : >> { %v2825_v50 = vmul.f32 %v5846_v52, %v5200_v7  ;;  %v2976_v26 = vmul.f32 1.442695, %v2964_v63  ;;  %v4341_v7 = vld [vmem:[%s4930_s28 + $0x18] sm:$0xff] (%p1902_p8)  }
 0x7a5   : >> { %v2663_v3 = vadd.f32 %v2662_v42, %v2656_v21 }
 0x7a6   : >> { %v2643_v54 = vpop.permute.xlu1 %2642  ;;  %v2839_v36 = vmul.f32 1.442695, %v2825_v50 }
 0x7a7   : >> { %v2658_v43 = vmul.f32 %v2643_v54, %v2618_v0  ;;  %v2664_v15 = vadd.f32 %v2663_v3, %v2657_v19  ;;  %v2835_v0 = vmul.f32 1.442695, %v2823_v8  ;;  %v2980_v54 = vmul.f32 1.442695, %v2966_v46 }
 0x7a9   : >> { %v2665_v1 = vadd.f32 %v2664_v15, %v2658_v43  ;;  %4318 = vpow2.f32 %v2835_v0  ;;  %v2888_v43 = vmul.f32 %v5998_v57, %v5900_v47 }
 0x7aa   : >> { %v2651_v4 = vpop.permute.xlu1 %2650  ;;  %v4313_v42 = vpop.eup %4312  ;;  %4320 = vpow2.f32 %v2976_v26 }
 0x7ab   : >> { %v2660_v55 = vmul.f32 %v2651_v4, %v2620_v28  ;;  %v2666_v58 = vadd.f32 %v2665_v1, %v2659_v56  ;;  %v6000_v28 = vpop.permute.xlu0 %2993  ;;  %4322 = vpow2.f32 %v2839_v36 }
 0x7ac   : >> { %v4315_v3 = vpop.eup %4314  ;;  %4324 = vpow2.f32 %v2980_v54 }
 0x7ad   : >> { %v2667_v17 = vadd.f32 %v2666_v58, %v2660_v55  ;;  %v4317_v23 = vpop.eup %4316 }
 0x7af   : >> { %v2668_v37 = vrot.slane %v2667_v17, 4  ;;  %v2716_v27 = vpop.permute.xlu1 %2715  ;;  %v6007_v1 = vpop.permute.xlu0 %3045 }
 0x7b0   : >> { %v2747_v21 = vmul.f32 %v5897_v12, %v2716_v27 }
 0x7b1   : >> { %v2669_v52 = vadd.f32 %v2668_v37, %v2667_v17  ;;  %v2891_v37 = vmul.f32 %v5998_v57, %v5915_v62 }
 0x7b2   : >> { %v2755_v20 = vadd.f32 %v2747_v21, %v5823_v59 }
 0x7b3   : >> { %v2670_v19 = vrot.slane %v2669_v52, 2  ;;  %v2720_v25 = vpop.permute.xlu1 %2719  ;;  %v4319_v58 = vpop.eup %4318 }
 0x7b4   : >> { %v2748_v51 = vmul.f32 %v5897_v12, %v2720_v25  ;;  %v2844_v15 = vmul.f32 %v4313_v42, %v2755_v20  ;;  %v4321_v26 = vpop.eup %4320  ;;  %v3010_v27 = vpop.permute.xlu0 %3009  ;;  %v6028_v42 = vrot.slane %v5892_v9, %v2958_v30  ;;  %v2795_v25 = vmul.f32 %v5826_v49, %v2755_v20 }
 0x7b5   : >> { %v2671_v8 = vadd.f32 %v2670_v19, %v2669_v52  ;;  %v4323_v21 = vpop.eup %4322  ;;  %v2797_v20 = vmul.f32 %v5850_v2, %v5936_v53  ;;  %v2801_v53 = vmul.f32 %v5878_v31, %v5970_v45 }
 0x7b6   : >> { %v2756_v48 = vadd.f32 %v2748_v51, %v5920_v29  ;;  %v6010_v56 = vadd.f32 %v2888_v43, %v2844_v15  ;;  %v4325_v54 = vpop.eup %4324  ;;  %v2962_v43 = vmul.f32 %v5950_v11, %v6412_v24  ;;  %v2799_v24 = vmul.f32 %v5869_v60, %v5953_v32 }
 0x7b7   : >> { %v2672_v59 = vrot.slane %v2671_v8, 1  ;;  %v2728_v4 = vpop.permute.xlu1 %2727  ;;  %v3028_v31 = vmul.f32 %v6028_v42, %v6000_v28 }
 0x7b8   : >> { %v2750_v63 = vmul.f32 %v5897_v12, %v2728_v4  ;;  %v6014_v55 = vmul.f32 %v4315_v3, %v6010_v56  ;;  %v6016_v47 = vmul.f32 %v4317_v23, %v2756_v48  ;;  %v3032_v3 = vmul.f32 %v6028_v42, %v3010_v27 }
 0x7b9   : >> { %v2673_v0 = vadd.f32 %v2672_v59, %v2671_v8  ;;  %v2972_v59 = vmul.f32 1.442695, %v2962_v43 }
 0x7ba   : >> { %v2758_v50 = vadd.f32 %v2750_v63, %v5855_v34 }
 0x7bb   : >> { %v6020_v17 = vsel %vm3103_vm2, %v5933_v14, %v2673_v0  ;;  %v2736_v29 = vpop.permute.xlu1 %2735  ;;  %v2893_v14 = vmul.f32 %v5998_v57, %v5930_v13 }
 0x7bc   : >> { %v2752_v36 = vmul.f32 %v5897_v12, %v2736_v29  ;;  %v2847_v46 = vmul.f32 %v4319_v58, %v2758_v50  ;;  %v2960_v12 = vmul.f32 %v5950_v11, %v6420_v40  ;;  %v2963_v58 = vmul.f32 %v5950_v11, %v6421_v6 }
 0x7bd   : >> { %v2967_v6 = vmul.f32 %v5950_v11, %v6422_v22 }
 0x7be   : >> { %v6030_v52 = vadd.f32 %v2891_v37, %v2847_v46  ;;  %v2760_v34 = vadd.f32 %v2752_v36, %v5865_v44  ;;  %v2968_v15 = vmul.f32 1.442695, %v2960_v12  ;;  %v2965_v37 = vmul.f32 %v5950_v11, %v5198_v5 }
 0x7bf   : >> { %v2764_v62 = vpop.permute.xlu1 %2763  ;;  %v2974_v2 = vmul.f32 1.442695, %v2963_v58 }
 0x7c0   : >> { %v2794_v19 = vmul.f32 %v2764_v62, %v5913_v10  ;;  %v2988_v9 = vmul.f32 %v4321_v26, %v6030_v52  ;;  %v2849_v30 = vmul.f32 %v4323_v21, %v2760_v34  ;;  %4326 = vpow2.f32 %v2968_v15 }
 0x7c1   : >> { %4328 = vpow2.f32 %v2972_v59  ;;  %v2978_v46 = vmul.f32 1.442695, %v2965_v37  ;;  %v2982_v62 = vmul.f32 1.442695, %v2967_v6 }
 0x7c2   : >> { %v2802_v23 = vadd.f32 %v2795_v25, %v2794_v19  ;;  %v6041_v49 = vadd.f32 %v3032_v3, %v2988_v9   ;;  %v6043_v44 = vadd.f32 %v2893_v14, %v2849_v30  ;;  %4330 = vpow2.f32 %v2974_v2 }
 0x7c3   : >> { %v2772_v13 = vpop.permute.xlu1 %2771  ;;  %4332 = vpow2.f32 %v2978_v46 }
 0x7c4   : >> { %v2796_v51 = vmul.f32 %v2772_v13, %v2756_v48  ;;  %v6048_v40 = vmul.f32 %v4325_v54, %v6043_v44  ;;  %4334 = vpow2.f32 %v2982_v62 }
 0x7c6   : >> { %v2803_v10 = vadd.f32 %v2802_v23, %v2796_v51 }
 0x7c7   : >> { %v2780_v8 = vpop.permute.xlu1 %2779 }
 0x7c8   : >> { %v2798_v4 = vmul.f32 %v2780_v8, %v2758_v50  ;;  %v2804_v63 = vadd.f32 %v2803_v10, %v2797_v20 }
 0x7ca   : >> { %v2805_v0 = vadd.f32 %v2804_v63, %v2798_v4  ;;  %v4327_v32 = vpop.eup %4326 }
 0x7cb   : >> { %v2788_v48 = vpop.permute.xlu1 %2787  ;;  %v4329_v12 = vpop.eup %4328 }
 0x7cc   : >> { %v2800_v29 = vmul.f32 %v2788_v48, %v2760_v34  ;;  %v2806_v26 = vadd.f32 %v2805_v0, %v2799_v24  ;;  %v4331_v23 = vpop.eup %4330 }
 0x7cd   : >> { %v4333_v20 = vpop.eup %4332 }
 0x7ce   : >> { %v2807_v50 = vadd.f32 %v2806_v26, %v2800_v29  ;;  %v4335_v58 = vpop.eup %4334 }
 0x7d0   : >> { %v2808_v27 = vadd.f32 %v2807_v50, %v2801_v53  ;;  %v2853_v36 = vpop.permute.xlu1 %2852 }
 0x7d1   : >> { %v2887_v60 = vmul.f32 %v5998_v57, %v2853_v36 }
 0x7d2   : >> { %v2809_v21 = vrot.slane %v2808_v27, 4 }
 0x7d3   : >> { %v2895_v34 = vadd.f32 %v2887_v60, %v5923_v61 }
 0x7d4   : >> { %v2810_v14 = vadd.f32 %v2809_v21, %v2808_v27  ;;  %v2861_v3 = vpop.permute.xlu1 %2860 }
 0x7d5   : >> { %v2984_v45 = vmul.f32 %v4327_v32, %v2895_v34  ;;  %v2889_v19 = vmul.f32 %v5998_v57, %v2861_v3  ;;  %v2935_v37 = vmul.f32 %v5958_v35, %v2895_v34  ;;  %v2939_v34 = vmul.f32 %v5987_v41, %v6030_v52 }
 0x7d6   : >> { %v2811_v25 = vrot.slane %v2810_v14, 2 }
 0x7d7   : >> { %v6067_v54 = vadd.f32 %v3028_v31, %v2984_v45   ;;  %v2897_v22 = vadd.f32 %v2889_v19, %v6016_v47 }
 0x7d8   : >> { %v2812_v11 = vadd.f32 %v2811_v25, %v2810_v14  ;;  %v2865_v9 = vpop.permute.xlu1 %2864 }
 0x7d9   : >> { %v2890_v61 = vmul.f32 %v5998_v57, %v2865_v9  ;;  %v2986_v30 = vmul.f32 %v4329_v12, %v2897_v22  ;;  %v3062_v12 = vpop.permute.xlu0 %3061 }
 0x7da   : >> { %v2813_v13 = vrot.slane %v2812_v11, 1 }
 0x7db   : >> { %v2898_v43 = vadd.f32 %v2890_v61, %v5944_v16 }
 0x7dc   : >> { %v2814_v28 = vadd.f32 %v2813_v13, %v2812_v11  ;;  %v2873_v51 = vpop.permute.xlu1 %2872 }
 0x7dd   : >> { %v2892_v15 = vmul.f32 %v5998_v57, %v2873_v51  ;;  %v2987_v10 = vmul.f32 %v4331_v23, %v2898_v43  ;;  %v2938_v32 = vmul.f32 %v5979_v38, %v2898_v43  ;;  %v3066_v25 = vpop.permute.xlu0 %3065  ;;  %v3080_v38 = vmul.f32 %v3062_v12, %v6041_v49  ;;  %v4342_v49 = vld [vmem:[%s4930_s28 + $0x20] sm:$0xff] (%p1902_p8)   ;;  %v4345_v12 = vld [vmem:[%s4930_s28 + $0x38] sm:$0xff] (%p1902_p8)  }
 0x7de   : >> { %v6074_v8 = vsel %vm3105_vm3, %v6020_v17, %v2814_v28 }
 0x7df   : >> { %v2900_v47 = vadd.f32 %v2892_v15, %v5966_v18 }
 0x7e0   : >> { %v2881_v59 = vpop.permute.xlu1 %2880 }
 0x7e1   : >> { %v2894_v4 = vmul.f32 %v5998_v57, %v2881_v59  ;;  %v2989_v63 = vmul.f32 %v4333_v20, %v2900_v47  ;;  %v3070_v23 = vpop.permute.xlu0 %3069 }
 0x7e3   : >> { %v2902_v0 = vadd.f32 %v2894_v4, %v5977_v39 }
 0x7e5   : >> { %v2998_v24 = vpop.permute.xlu1 %2997  ;;  %v2991_v16 = vmul.f32 %v4335_v58, %v2902_v0  ;;  %v3074_v4 = vpop.permute.xlu0 %3073 }
 0x7e6   : >> { %v3029_v48 = vmul.f32 %v6028_v42, %v2998_v24 }
 0x7e8   : >> { %v6081_v53 = vadd.f32 %v3029_v48, %v6014_v55   ;;  %v3076_v55 = vmul.f32 %v6007_v1, %v6067_v54 }
 0x7e9   : >> { %v3002_v29 = vpop.permute.xlu1 %3001 }
 0x7ea   : >> { %v3030_v17 = vmul.f32 %v6028_v42, %v3002_v29 }
 0x7ec   : >> { %v6084_v26 = vadd.f32 %v3030_v17, %v2986_v30  }
 0x7ee   : >> { %v2909_v18 = vpop.permute.xlu1 %2908 }
 0x7ef   : >> { %v2936_v57 = vmul.f32 %v2909_v18, %v6010_v56 }
 0x7f1   : >> { %v2943_v2 = vadd.f32 %v2936_v57, %v2935_v37 }
 0x7f3   : >> { %v3006_v50 = vpop.permute.xlu1 %3005 }
 0x7f4   : >> { %v3031_v39 = vmul.f32 %v6028_v42, %v3006_v50 }
 0x7f6   : >> { %v6089_v51 = vadd.f32 %v3031_v39, %v2987_v10  }
 0x7f7   : >> { %v3050_v27 = vpop.permute.xlu1 %3049 }
 0x7f8   : >> { %v3077_v36 = vmul.f32 %v3050_v27, %v6081_v53  ;;  %v4343_v53 = vld [vmem:[%s4930_s28 + $0x28] sm:$0xff] (%p1902_p8)  }
 0x7fa   : >> { %v3084_v46 = vadd.f32 %v3077_v36, %v3076_v55 }
 0x7fc   : >> { %v2913_v6 = vpop.permute.xlu1 %2912 }
 0x7fd   : >> { %v2937_v60 = vmul.f32 %v2913_v6, %v2897_v22 }
 0x7ff   : >> { %v2944_v35 = vadd.f32 %v2943_v2, %v2937_v60 }
 0x801   : >> { %v2945_v21 = vadd.f32 %v2944_v35, %v2938_v32  ;;  %v3054_v56 = vpop.permute.xlu1 %3053  ;;  %v4339_v35 = vld [vmem:[%s4930_s28 + $0x8] sm:$0xff] (%p1902_p8)  }
 0x802   : >> { %v3078_v14 = vmul.f32 %v3054_v56, %v6084_v26  ;;  %v6431_v56 = vld [vmem:[#allocation29_spill] sm:$0xff] (%p1902_p8) }
 0x803   : >> { %v2946_v3 = vadd.f32 %v2945_v21, %v2939_v34  ;;  %v3127_v54 = vsub.f32 (%p1902_p8), 0.0, %v6431_v56  ;;  %v4340_v34 = vld [vmem:[%s4930_s28 + $0x10] sm:$0xff] (%p1902_p8)  }
 0x804   : >> { %v3085_v62 = vadd.f32 %v3084_v46, %v3078_v14  ;;  %v4344_v14 = vld [vmem:[%s4930_s28 + $0x30] sm:$0xff] (%p1902_p8)  }
 0x805   : >> { %v3014_v31 = vpop.permute.xlu1 %3013  ;;  %v3130_v5 = vmul.f32 (%p1902_p8), 1.442695, %v3127_v54 }
 0x806   : >> { %v3033_v1 = vmul.f32 %v6028_v42, %v3014_v31  ;;  %v6432_v31 = vld [vmem:[#allocation31_spill] sm:$0xff] (%p1902_p8) }
 0x808   : >> { %v3041_v48 = vadd.f32 %v3033_v1, %v2989_v63  }
 0x809   : >> { %v3058_v45 = vpop.permute.xlu1 %3057 }
 0x80a   : >> { %v3079_v19 = vmul.f32 %v3058_v45, %v6089_v51  ;;  %v3081_v9 = vmul.f32 %v3066_v25, %v3041_v48 }
 0x80c   : >> { %v3086_v22 = vadd.f32 %v3085_v62, %v3079_v19  ;;  %v3753_v62 = vld [vmem:[%s941_s16] ss:$0 sm:$0xff] (%p1902_p8)  ;;  %v6433_v19 = vld [vmem:[#allocation30_spill] sm:$0xff] (%p1902_p8) }
 0x80d   : >> { %v3018_v11 = vpop.permute.xlu1 %3017  ;;  %v3122_v1 = vmul.f32 (%p1902_p8), %v3753_v62, %v6432_v31  ;;  %v3123_v25 = vmul.f32 (%p1902_p8), %v3753_v62, %v6433_v19 }
 0x80e   : >> { %v3087_v61 = vadd.f32 %v3086_v22, %v3080_v38  ;;  %v3034_v41 = vmul.f32 %v6028_v42, %v3018_v11 }
 0x810   : >> { %v3088_v52 = vadd.f32 %v3087_v61, %v3081_v9  ;;  %v3042_v30 = vadd.f32 %v3034_v41, %v6048_v40  }
 0x812   : >> { %v3082_v13 = vmul.f32 %v3070_v23, %v3042_v30  ;;  %v2925_v43 = vpop.permute.xlu1 %2924 }
 0x813   : >> { %v2940_v28 = vmul.f32 %v2925_v43, %v2900_v47 }
 0x814   : >> { %v3089_v15 = vadd.f32 %v3088_v52, %v3082_v13  ;;  %v6429_v52 = vmov %v6084_v26  ;;  %v6430_v26 = vld [vmem:[#allocation27_spill] sm:$0xff] (%p1902_p8) }
 0x815   : >> { %v2947_v10 = vadd.f32 %v2946_v3, %v2940_v28  ;;  %v3126_v21 = vsub.f32 (%p1902_p8), 0.0, %v6430_v26 }
 0x817   : >> { %v3022_v20 = vpop.permute.xlu1 %3021  ;;  %v3128_v33 = vmul.f32 (%p1902_p8), 1.442695, %v3126_v21 }
 0x818   : >> { %v3035_v59 = vmul.f32 %v6028_v42, %v3022_v20 }
 0x819   : > { %4346 = vpow2.f32 (%p1902_p8), %v3128_v33 }
 0x81a   : >> { %v3043_v46 = vadd.f32 %v3035_v59, %v2991_v16   ;;  %4348 = vpow2.f32 (%p1902_p8), %v3130_v5 }
 0x81c   : >> { %v3083_v63 = vmul.f32 %v3074_v4, %v3043_v46  ;;  %v2929_v58 = vpop.permute.xlu1 %2928 }
 0x81d   : >> { %v2941_v24 = vmul.f32 %v2929_v58, %v6043_v44 }
 0x81e   : >> { %v3090_v29 = vadd.f32 %v3089_v15, %v3083_v63 }
 0x81f   : >> { %v2948_v17 = vadd.f32 %v2947_v10, %v2941_v24 }
 0x820   : >> { %v3091_v18 = vrot.slane %v3090_v29, 4  ;;  %v2933_v37 = vpop.permute.xlu1 %2932 }
 0x821   : >> { %v2942_v40 = vmul.f32 %v2933_v37, %v2902_v0  ;;  %v4589_v0 = vmov (%p1902_p8), 0.0  }
 0x822   : >> { %v3092_v57 = vadd.f32 %v3091_v18, %v3090_v29  ;;  %3868 = vmatprep.subr.bf16.mxu0 (%p1902_p8), %v4589_v0  ;;  %3884 = vmatprep.mubr.msk.bf16.mxu0 (%p1902_p8), %vm4590_vm6, %v4589_v0 }
 0x823   : >> { %v2949_v2 = vadd.f32 %v2948_v17, %v2942_v40  ;;  %v4347_v51 = vpop.eup (%p1902_p8), %4346 }
 0x824   : >> { %v3093_v47 = vrot.slane %v3092_v57, 2  ;;  %v4349_v48 = vpop.eup (%p1902_p8), %4348  ;;  %v3132_v46 = vadd.f32 (%p1902_p8), 1.0, %v4347_v51 }
 0x825   : >> { %v2950_v50 = vrot.slane %v2949_v2, 4  ;;  %v3133_v3 = vadd.f32 (%p1902_p8), 1.0, %v4349_v48 }
 0x826   : >> { %v3094_v27 = vadd.f32 %v3093_v47, %v3092_v57  ;;  %v6428_v47 = vmov %v3042_v30  ;;  %4350 = vrcp.f32 (%p1902_p8), %v3132_v46 }
 0x827   : >> { %v2951_v39 = vadd.f32 %v2950_v50, %v2949_v2  ;;  %4352 = vrcp.f32 (%p1902_p8), %v3133_v3 }
 0x828   : >> { %v3095_v16 = vrot.slane %v3094_v27, 1 }
 0x829   : >> { %v2952_v55 = vrot.slane %v2951_v39, 2 }
 0x82a   : >> { %v3096_v44 = vadd.f32 %v3095_v16, %v3094_v27  ;;  %v3762_v16 = vld [vmem:[%s949_s5] ss:$0 sm:$0xff] (%p1902_p8) }
 0x82b   : >> { %v2953_v42 = vadd.f32 %v2952_v55, %v2951_v39 }
 0x82d   : >> { %v2954_v36 = vrot.slane %v2953_v42, 1  ;;  %1904 = sbr.rel (!%p1902_p8) target bundleno = 1450 (0x5aa), region = 221 }
 0x82f   : >> { %v2955_v6 = vadd.f32 %v2954_v36, %v2953_v42 }
 0x830   : > { %v4351_v11 = vpop.eup (%p1902_p8), %4350 }
 0x831   : >> { %v3108_v60 = vsel %vm3107_vm4, %v6074_v8, %v2955_v6  ;;  %v4338_v8 = vld [vmem:[%s4930_s28] sm:$0xff] (%p1902_p8)   ;;  %v4353_v61 = vpop.eup (%p1902_p8), %4352  ;;  %v3138_v41 = vmul.f32 (%p1902_p8), %v4351_v11, %v6430_v26 }
 0x832   : >> { %v3110_v32 = vsel %vm3109_vm5, %v3108_v60, %v3096_v44  ;;  %3869 = vmatpush3.bf16.msra.mxu0 (%p1902_p8), %v4338_v8  ;;  %v3139_v52 = vmul.f32 (%p1902_p8), %v4353_v61, %v6431_v56  ;;  %v3763_v6 = vld [vmem:[%s952_s0] ss:$0 sm:$0xff] (%p1902_p8)  ;;  %v6436_v56 = vld [vmem:[#allocation23_spill] sm:$0xff] (%p1902_p8) }
 0x833   : >> { %3112 = vst [vmem:[%s3111_s29] sm:$0xff] %v3110_v32  ;;  %3870 = vmatprep.subr.bf16.mxu0 (%p1902_p8), %v4589_v0 }
 0x834   : > { %s6437_s0 = sld [smem:[#allocation68_spill]] (!%p3764_p2)  ;;  %v4591_v33 = vmov (!%p3764_p2), 0.0   ;;  %vm4592_vm7 = vmmov (!%p3764_p2), 0   ;;  %s6438_s1 = sld [smem:[#allocation69_spill]] (!%p3764_p2)  ;;  %vm3401_vm9 = vcmask (!%p3764_p2), 64512  }
 0x836   : > { %3871 = vmatpush3.bf16.msra.mxu0 %v4339_v35 }
 0x837   : > { %3872 = vmatprep.subr.bf16.mxu0 %v4589_v0 }
 0x83a   : > { %3873 = vmatpush3.bf16.msra.mxu0 %v4340_v34  ;;  %v3113_v45 = vld [vmem:[#allocation6] sm:$0xff]  ;;  %v3114_v38 = vld [vmem:[#allocation6 + $0x8] sm:$0xff] }
 0x83b   : > { %3874 = vmatprep.subr.bf16.mxu0 %v4589_v0  ;;  %v3124_v22 = vadd.f32 %v3122_v1, %v3113_v45  ;;  %v3125_v9 = vadd.f32 %v3123_v25, %v3114_v38  ;;  %v4358_v34 = vld [vmem:[%s6437_s0] sm:$0xff] (!%p3764_p2)   ;;  %v4359_v5 = vld [vmem:[%s6437_s0 + $0x8] sm:$0xff] (!%p3764_p2)  }
 0x83c   : > { %v3765_v51 = vld [vmem:[%s6438_s1] ss:$0 sm:$0xff] (!%p3764_p2) }
 0x83d   : > { %v3140_v30 = vmul.f32 %v3138_v41, %v3124_v22  ;;  %v3141_v23 = vmul.f32 %v3139_v52, %v3125_v9  ;;  %v6439_v9 = vlaneseq (!%p3764_p2) }
 0x83e   : > { %3875 = vmatpush3.bf16.msra.mxu0 %v4341_v7  ;;  %v4360_v7 = vld [vmem:[%s6437_s0 + $0x10] sm:$0xff] (!%p3764_p2)  }
 0x83f   : > { %3876 = vmatprep.subr.bf16.mxu0 %v4589_v0  ;;  %v3158_v13 = vpack.c.bf16 %v3141_v23, %v3140_v30  ;;  %v3385_v61 = vand.u32 (!%p3764_p2), 127, %v6439_v9 }
 0x842   : > { %3877 = vmatpush3.bf16.msra.mxu0 %v4342_v49  ;;  %v4361_v49 = vld [vmem:[%s6437_s0 + $0x18] sm:$0xff] (!%p3764_p2)  }
 0x843   : > { %3878 = vmatprep.subr.bf16.mxu0 %v4589_v0 }
 0x846   : > { %3879 = vmatpush3.bf16.msra.mxu0 %v4343_v53 }
 0x847   : > { %3880 = vmatprep.subr.bf16.mxu0 %v4589_v0 }
 0x84a   : > { %3881 = vmatpush3.bf16.msra.mxu0 %v4344_v14 }
 0x84b   : > { %3882 = vmatprep.subr.bf16.mxu0 %v4589_v0  ;;  %v6435_v0 = vld [vmem:[#allocation22_spill] sm:$0xff] }
 0x84e   : > { %3883 = vmatpush3.bf16.msra.mxu0 %v4345_v12 }
 0x84f   : > { %3888 = vmatprep.subr.bf16.mxu0 (!%p3764_p2), %v4591_v33 }
 0x851   : > { %3885 = vmatmul.mubr.bf16.vlgmr.msra.gmra.mrb[4].mxu0 %v3158_v13 }
 0x852   : > { %3889 = vmatpush3.bf16.msra.mxu0 (!%p3764_p2), %v4358_v34  ;;  %3896 = vmatprep.mubr.msk.bf16.mxu0 (!%p3764_p2), %vm4592_vm7, %v4591_v33 }
 0x853   : > { %3890 = vmatprep.subr.bf16.mxu0 (!%p3764_p2), %v4591_v33 }
 0x856   : > { %3891 = vmatpush3.bf16.msra.mxu0 (!%p3764_p2), %v4359_v5 }
 0x857   : > { %3892 = vmatprep.subr.bf16.mxu0 (!%p3764_p2), %v4591_v33 }
 0x85a   : > { %3893 = vmatpush3.bf16.msra.mxu0 (!%p3764_p2), %v4360_v7 }
 0x85b   : > { %3894 = vmatprep.subr.bf16.mxu0 (!%p3764_p2), %v4591_v33 }
 0x85e   : > { %3895 = vmatpush3.bf16.msra.mxu0 (!%p3764_p2), %v4361_v49 }
 0x924   : > { %v3241_v43 = vpop.f32.mrb[4].mxu0 }
 0x925   : > { %v3886_v28 = vpop.f32.mrb[5].mxu0  ;;  %v3250_v15 = vsel %vm1469_vm8, %v3241_v43, 0.0 }
 0x926   : > { %3251 = vadd.xlane.f32.xlu0 %v3250_v15  ;;  %v3244_v10 = vpop.f32.mrb[6].mxu0 }
 0x927   : > { %v3887_v20 = vpop.f32.mrb[7].mxu0  ;;  %v3253_v59 = vsel %vm1469_vm8, %v3244_v10, 0.0 }
 0x92a   : > { %3254 = vadd.xlane.f32.xlu0 %v3253_v59 }
 0x9b3   : > { %v3252_v4 = vpop.xlane.xlu0 %3251 }
 0x9b4   : > { %v3256_v63 = vmul.f32 0.015625, %v3252_v4 }
 0x9b6   : > { %v3258_v58 = vsub.f32 %v3241_v43, %v3256_v63 }
 0x9b7   : > { %v3255_v24 = vpop.xlane.xlu0 %3254 }
 0x9b8   : > { %v3257_v29 = vmul.f32 0.015625, %v3255_v24  ;;  %v3260_v17 = vmul.f32 %v3258_v58, %v3258_v58 }
 0x9ba   : > { %v3259_v18 = vsub.f32 %v3244_v10, %v3257_v29  ;;  %v3262_v37 = vsel %vm1469_vm8, %v3260_v17, 0.0 }
 0x9bb   : > { %3263 = vadd.xlane.f32.xlu1 %v3262_v37 }
 0x9bc   : > { %v3261_v40 = vmul.f32 %v3259_v18, %v3259_v18 }
 0x9be   : > { %v3265_v57 = vsel %vm1469_vm8, %v3261_v40, 0.0 }
 0x9bf   : > { %3266 = vadd.xlane.f32.xlu1 %v3265_v57 }
 0xa48   : > { %v3264_v2 = vpop.xlane.xlu1 %3263 }
 0xa49   : > { %v3268_v47 = vmul.f32 0.015625, %v3264_v2 }
 0xa4b   : > { %v3270_v50 = vadd.f32 1e-05, %v3268_v47 }
 0xa4c   : > { %v3267_v39 = vpop.xlane.xlu1 %3266 }
 0xa4d   : > { %4354 = vrsqrt.f32 %v3270_v50  ;;  %v3269_v27 = vmul.f32 0.015625, %v3267_v39 }
 0xa4f   : > { %v3271_v55 = vadd.f32 1e-05, %v3269_v27 }
 0xa51   : > { %4356 = vrsqrt.f32 %v3271_v55 }
 0xa57   : > { %v4355_v42 = vpop.eup %4354 }
 0xa58   : > { %v3274_v36 = vmul.f32 %v4355_v42, %v3258_v58 }
 0xa5a   : > { %v3282_v44 = vmul.f32 %v3762_v16, %v3274_v36 }
 0xa5b   : > { %v4357_v60 = vpop.eup %4356 }
 0xa5c   : > { %v3290_v32 = vadd.f32 %v3763_v6, %v3282_v44  ;;  %v3275_v8 = vmul.f32 %v4357_v60, %v3259_v18 }
 0xa5e   : > { %v3292_v35 = vadd.f32 %v3290_v32, %v6435_v0  ;;  %v3283_v26 = vmul.f32 %v3762_v16, %v3275_v8  ;;  %3299 = sbr.rel (%p3764_p2) target bundleno = 2908 (0xb5c), region = 135 }
 0xa60   : > { %3294 = vst.msk [vmem:[#allocation2] sm:$0xff] %vm1469_vm8, %v3292_v35  ;;  %v3291_v21 = vadd.f32 %v3763_v6, %v3283_v26 }
 0xa62   : > { %v3293_v54 = vadd.f32 %v3291_v21, %v6436_v56 }
 0xa64   : > { %3295 = vst.msk [vmem:[#allocation2 + $0x8] sm:$0xff] %vm1469_vm8, %v3293_v54  ;;  %v3308_v53 = vpack.c.bf16 (!%p3764_p2), %v3293_v54, %v3292_v35 }
 0xa66   : > { %3897 = vmatmul.mubr.msk.bf16.vlgmr.msra.gmra.mrb[0].mxu0 %vm1469_vm8, %v3308_v53  ;;  %vm3386_vm8 = vcmp.eq.s32.totalorder %v3385_v61, 0 }
 0xb39   : > { %v3377_v48 = vpop.f32.mrb[0].mxu0 }
 0xb3a   : > { %v3378_v46 = vadd.f32 %v3765_v51, %v3377_v48  ;;  %v3898_v14 = vpop.f32.mrb[1].mxu0 }
 0xb3b   : > { %v3380_v3 = vpop.f32.mrb[2].mxu0 }
 0xb3c   : > { %v3387_v62 = vsub.f32 0.0, %v3378_v46  ;;  %v3381_v12 = vadd.f32 %v3765_v51, %v3380_v3  ;;  %v3899_v31 = vpop.f32.mrb[3].mxu0 }
 0xb3e   : > { %v3389_v1 = vmul.f32 1.442695, %v3387_v62  ;;  %v3388_v45 = vsub.f32 0.0, %v3381_v12 }
 0xb40   : > { %4362 = vpow2.f32 %v3389_v1  ;;  %v3391_v19 = vmul.f32 1.442695, %v3388_v45 }
 0xb42   : > { %4364 = vpow2.f32 %v3391_v19 }
 0xb4a   : > { %v4363_v25 = vpop.eup %4362 }
 0xb4b   : > { %v3393_v38 = vadd.f32 1.0, %v4363_v25 }
 0xb4c   : > { %v4365_v22 = vpop.eup %4364 }
 0xb4d   : > { %4366 = vrcp.f32 %v3393_v38  ;;  %v3394_v11 = vadd.f32 1.0, %v4365_v22 }
 0xb4f   : > { %4368 = vrcp.f32 %v3394_v11 }
 0xb57   : > { %v4367_v41 = vpop.eup %4366 }
 0xb58   : > { %v3399_v52 = vsel %vm3386_vm8, %v4367_v41, %v3378_v46 }
 0xb59   : > { %v4369_v30 = vpop.eup %4368  ;;  %3402 = vst.msk [vmem:[%s4943_s4] sm:$0xff] %vm3401_vm9, %v3399_v52 }
 0xb5a   : > { %v3400_v23 = vsel %vm3386_vm8, %v4369_v30, %v3381_v12 }
 0xb5b   : > { %3403 = vst.msk [vmem:[%s4943_s4 + $0x8] sm:$0xff] %vm3401_vm9, %v3400_v23 }
 0xb5c PF: > { %s6440_s26 = sld [smem:[#allocation17_spill]]  ;;  %s6441_s4 = sld [smem:[#allocation13_spill]] }
 0xb5d   : > { %s6442_s30 = sld [smem:[#allocation14_spill]]  ;;  %s6443_s24 = sld [smem:[#allocation20_spill]] }
 0xb5e   : > { %s6444_s25 = sld [smem:[#allocation15_spill]]  ;;  %s6445_s5 = sld [smem:[#allocation16_spill]] }
 0xb5f   : > { %s6446_s1 = sld [smem:[#allocation18_spill]] }
 0xb62   : > { %s39_s2 = sadd.s32 1, %s6440_s26   ;;  %s6447_s26 = sld [smem:[#allocation19_spill]] }
 0xb63   : > { %p36_p3 = scmp.ge.s32.totalorder %s39_s2, 26  }
 0xb65   :  { %38 = sbr.rel (!%p36_p3) target bundleno = 26 (0x1a), region = 232 }
 0xb6c   :  { %3425 = vsyncpa [#allocation8], 1 }
 0xb6d   :  { %3427 = vsyncpa [#allocation8 + $0x1], 1 }
 0xb6e   :  { %3428 = vsyncpa [#allocation10], 1 }
 0xb6f   :  { %3430 = vsyncpa [#allocation10 + $0x1], 1 }

</bundles_post_ra>
